<compile_context>
chip_gen: v7x
topology: tpu7x:2x2x1
jax: 0.10.0
libtpu: 0.0.40
codegen_flags: <defaults>
</compile_context>

<pallas_src>
import functools

import jax
import jax.numpy as jnp
from jax.experimental import pallas as pl
from jax.experimental.pallas import tpu as pltpu


def _round_up(x, m):
    return (x + m - 1) // m * m


# ----------------------------------------------------------------------------
# Pass 1 kernel: Y = X @ W (MXU, bf16 in / f32 out) + per-channel sum / sumsq
# accumulated into a resident (8, Cp) stats block across the M grid axis.
# ----------------------------------------------------------------------------
def _matmul_stats_kernel(x_ref, w_ref, y_ref, stats_ref):
    @pl.when(pl.program_id(0) == 0)
    def _init():
        stats_ref[...] = jnp.zeros_like(stats_ref)

    y = jnp.dot(x_ref[...], w_ref[...], preferred_element_type=jnp.float32)
    y_ref[...] = y.astype(y_ref.dtype)

    s = jnp.sum(y, axis=0, keepdims=True)        # (1, Cp)
    sq = jnp.sum(y * y, axis=0, keepdims=True)   # (1, Cp)
    pad = jnp.zeros((stats_ref.shape[0] - 2, s.shape[1]), jnp.float32)
    stats_ref[...] = stats_ref[...] + jnp.concatenate([s, sq, pad], axis=0)


# ----------------------------------------------------------------------------
# Pass 2 kernel: BN(batch stats) -> [+residual] -> [ReLU] epilogue per M-tile.
# ----------------------------------------------------------------------------
def _bn_apply_kernel(y_ref, stats_ref, gamma_ref, beta_ref, *rest,
                     relu, add_residual, eps, m_total):
    if add_residual:
        res_ref, o_ref = rest
    else:
        (o_ref,) = rest

    y = y_ref[...].astype(jnp.float32)
    inv_m = 1.0 / m_total
    mean = stats_ref[0:1, :] * inv_m
    ex2 = stats_ref[1:2, :] * inv_m
    var = jnp.maximum(ex2 - mean * mean, 0.0)
    inv_std = jax.lax.rsqrt(var + eps)
    scale = inv_std * gamma_ref[...]
    shift = beta_ref[...] - mean * scale
    out = y * scale + shift

    if add_residual:
        out = out + res_ref[...].astype(jnp.float32)
    if relu:
        out = jnp.maximum(out, 0.0)

    o_ref[...] = out.astype(o_ref.dtype)


# ----------------------------------------------------------------------------
# Fused conv-as-matmul + training-mode BN + (residual) + (ReLU), tiled over M.
# patches: (M, K) im2col rows, w_mat: (K, Cout), gamma/beta: (Cout,)
# ----------------------------------------------------------------------------
def conv_bn_act(patches, w_mat, gamma, beta, residual=None, relu=True,
                eps=1e-5, tile_m=512):
    M, K = patches.shape
    Kw, Cout = w_mat.shape
    assert K == Kw
    assert tile_m % 8 == 0

    Cp = _round_up(Cout, 128)                      # lane-dense output channels
    TM = tile_m if M >= tile_m else _round_up(M, 8)
    Mp = _round_up(M, TM)
    grid_m = Mp // TM

    x_p = jnp.pad(patches.astype(jnp.bfloat16), ((0, Mp - M), (0, 0)))
    w_p = jnp.pad(w_mat.astype(jnp.bfloat16), ((0, 0), (0, Cp - Cout)))
    g_p = jnp.pad(gamma.reshape(1, -1).astype(jnp.float32), ((0, 0), (0, Cp - Cout)))
    b_p = jnp.pad(beta.reshape(1, -1).astype(jnp.float32), ((0, 0), (0, Cp - Cout)))

    # ---- pass 1: matmul + stats accumulation (reduction over M => "arbitrary") ----
    y, stats = pl.pallas_call(
        _matmul_stats_kernel,
        grid=(grid_m,),
        in_specs=[
            pl.BlockSpec((TM, K), lambda i: (i, 0)),
            pl.BlockSpec((K, Cp), lambda i: (0, 0)),
        ],
        out_specs=[
            pl.BlockSpec((TM, Cp), lambda i: (i, 0)),
            pl.BlockSpec((8, Cp), lambda i: (0, 0)),
        ],
        out_shape=[
            jax.ShapeDtypeStruct((Mp, Cp), jnp.float32),
            jax.ShapeDtypeStruct((8, Cp), jnp.float32),
        ],
        compiler_params=pltpu.CompilerParams(
            dimension_semantics=("arbitrary",),
            vmem_limit_bytes=64 * 1024 * 1024,
        ),
        cost_estimate=pl.CostEstimate(
            flops=2 * Mp * K * Cp,
            transcendentals=0,
            bytes_accessed=Mp * K * 2 + K * Cp * 2 + Mp * Cp * 4 + 8 * Cp * 4,
        ),
    )(x_p, w_p)

    # ---- pass 2: BN(global stats) + residual + ReLU (independent tiles => parallel) ----
    inputs2 = [y, stats, g_p, b_p]
    in_specs2 = [
        pl.BlockSpec((TM, Cp), lambda i: (i, 0)),
        pl.BlockSpec((8, Cp), lambda i: (0, 0)),
        pl.BlockSpec((1, Cp), lambda i: (0, 0)),
        pl.BlockSpec((1, Cp), lambda i: (0, 0)),
    ]
    res_bytes = 0
    if residual is not None:
        assert residual.shape == (M, Cout)
        res_p = jnp.pad(residual.astype(jnp.float32),
                        ((0, Mp - M), (0, Cp - Cout)))
        inputs2.append(res_p)
        in_specs2.append(pl.BlockSpec((TM, Cp), lambda i: (i, 0)))
        res_bytes = Mp * Cp * 4

    kernel2 = functools.partial(
        _bn_apply_kernel,
        relu=relu,
        add_residual=residual is not None,
        eps=eps,
        m_total=float(M),
    )
    out = pl.pallas_call(
        kernel2,
        grid=(grid_m,),
        in_specs=in_specs2,
        out_specs=pl.BlockSpec((TM, Cp), lambda i: (i, 0)),
        out_shape=jax.ShapeDtypeStruct((Mp, Cp), jnp.float32),
        compiler_params=pltpu.CompilerParams(
            dimension_semantics=("parallel",),
            vmem_limit_bytes=64 * 1024 * 1024,
        ),
        cost_estimate=pl.CostEstimate(
            flops=10 * Mp * Cp,
            transcendentals=Cp,
            bytes_accessed=2 * Mp * Cp * 4 + res_bytes + 10 * Cp * 4,
        ),
    )(*inputs2)

    return out[:M, :Cout]


# ----------------------------------------------------------------------------
# Glue: im2col and weight packing (plain JAX); patches emitted in bf16.
# ----------------------------------------------------------------------------
def im2col_3x3(x_nhwc, stride):
    """3x3 / pad=1 im2col. Returns ((N*Ho*Wo, 9*C), Ho, Wo); last-dim order (kh, kw, c)."""
    N, H, W, C = x_nhwc.shape
    xp = jnp.pad(x_nhwc, ((0, 0), (1, 1), (1, 1), (0, 0)))
    Ho = (H + 2 - 3) // stride + 1
    Wo = (W + 2 - 3) // stride + 1
    cols = []
    for kh in range(3):
        for kw in range(3):
            patch = xp[:, kh:kh + (Ho - 1) * stride + 1:stride,
                          kw:kw + (Wo - 1) * stride + 1:stride, :]
            cols.append(patch)
    patches = jnp.concatenate(cols, axis=-1)          # (N, Ho, Wo, 9*C)
    return patches.reshape(N * Ho * Wo, 9 * C), Ho, Wo


def pack_w3x3(w_oihw):
    """(Cout, Cin, 3, 3) -> (9*Cin, Cout), matching im2col (kh, kw, c) ordering."""
    return jnp.transpose(w_oihw, (2, 3, 1, 0)).reshape(-1, w_oihw.shape[0])


def pack_w1x1(w_oihw):
    """(Cout, Cin, 1, 1) -> (Cin, Cout)."""
    return jnp.transpose(w_oihw[:, :, 0, 0], (1, 0))


# ----------------------------------------------------------------------------
# BasicBlock forward (NCHW in / NCHW out)
# ----------------------------------------------------------------------------
def basic_block_forward(x_nchw, params, stride, downsample, eps=1e-5, tile_m=512):
    x = jnp.transpose(x_nchw, (0, 2, 3, 1))          # -> NHWC (f32)
    N, H, W, Cin = x.shape
    Cout = params["w1_oihw"].shape[0]
    x_bf = x.astype(jnp.bfloat16)                    # bf16 feeds the MXU / im2col

    # residual branch
    if downsample:
        xs = x_bf[:, ::stride, ::stride, :]          # 1x1 conv, stride s, pad 0
        Nr, Hr, Wr, _ = xs.shape
        res = conv_bn_act(xs.reshape(Nr * Hr * Wr, Cin),
                          pack_w1x1(params["w_ds_oihw"]),
                          params["gamma_ds"], params["beta_ds"],
                          relu=False, eps=eps, tile_m=tile_m)
    else:
        assert stride == 1 and Cin == Cout
        res = x.reshape(N * H * W, Cin)              # keep residual in f32

    # conv1 -> bn1 -> relu
    p1, Ho, Wo = im2col_3x3(x_bf, stride)
    out1 = conv_bn_act(p1, pack_w3x3(params["w1_oihw"]),
                       params["gamma1"], params["beta1"],
                       relu=True, eps=eps, tile_m=tile_m)
    out1_nhwc = out1.reshape(N, Ho, Wo, Cout)

    # conv2 -> bn2 -> (+ residual) -> relu
    # TODO(synk): fuse the whole conv1->conv2 chain (halo conv in-kernel) to avoid
    # re-expanding out1 through a second materialized im2col.
    p2, _, _ = im2col_3x3(out1_nhwc.astype(jnp.bfloat16), 1)
    out2 = conv_bn_act(p2, pack_w3x3(params["w2_oihw"]),
                       params["gamma2"], params["beta2"],
                       residual=res, relu=True, eps=eps, tile_m=tile_m)

    out = out2.reshape(N, Ho, Wo, Cout)
    return jnp.transpose(out, (0, 3, 1, 2))          # -> NCHW (f32)


# ----------------------------------------------------------------------------
# Reference (lax.conv) mirroring the kernel's precision policy:
# bf16 conv operands, f32 accumulation, f32 BatchNorm with batch statistics.
# ----------------------------------------------------------------------------
def ref_forward(x_nchw, params, stride, downsample, eps=1e-5):
    def conv(x, w, s, pad):
        return jax.lax.conv_general_dilated(
            x.astype(jnp.bfloat16), w.astype(jnp.bfloat16), (s, s),
            ((pad, pad), (pad, pad)),
            dimension_numbers=("NCHW", "OIHW", "NCHW"),
            preferred_element_type=jnp.float32)

    def bn(y, gamma, beta):
        mean = jnp.mean(y, axis=(0, 2, 3), keepdims=True)
        var = jnp.mean((y - mean) ** 2, axis=(0, 2, 3), keepdims=True)
        return ((y - mean) * jax.lax.rsqrt(var + eps)
                * gamma.reshape(1, -1, 1, 1) + beta.reshape(1, -1, 1, 1))

    if downsample:
        r = bn(conv(x_nchw, params["w_ds_oihw"], stride, 0),
               params["gamma_ds"], params["beta_ds"])
    else:
        r = x_nchw
    o = jnp.maximum(bn(conv(x_nchw, params["w1_oihw"], stride, 1),
                       params["gamma1"], params["beta1"]), 0.0)
    o = bn(conv(o, params["w2_oihw"], 1, 1),
           params["gamma2"], params["beta2"]) + r
    return jnp.maximum(o, 0.0)


# ----------------------------------------------------------------------------
if __name__ == "__main__":
    # Small, deterministic config: in_channels=4, planes=8, stride=2, downsample=True
    in_channels, planes, stride, downsample = 4, 8, 2, True
    N, H, W = 2, 16, 16

    key = jax.random.PRNGKey(0)
    k = jax.random.split(key, 8)
    params = {
        "w1_oihw":  0.2 * jax.random.normal(k[0], (planes, in_channels, 3, 3), jnp.float32),
        "gamma1":   1.0 + 0.1 * jax.random.normal(k[1], (planes,), jnp.float32),
        "beta1":    0.1 * jax.random.normal(k[2], (planes,), jnp.float32),
        "w2_oihw":  0.2 * jax.random.normal(k[3], (planes, planes, 3, 3), jnp.float32),
        "gamma2":   1.0 + 0.1 * jax.random.normal(k[4], (planes,), jnp.float32),
        "beta2":    0.1 * jax.random.normal(k[5], (planes,), jnp.float32),
        "w_ds_oihw": 0.2 * jax.random.normal(k[6], (planes, in_channels, 1, 1), jnp.float32),
        "gamma_ds": jnp.ones((planes,), jnp.float32),
        "beta_ds":  jnp.zeros((planes,), jnp.float32),
    }

    x = jax.random.normal(jax.random.PRNGKey(42), (N, in_channels, H, W), jnp.float32)

    # tile_m=64 so the toy shape (M=128) exercises the multi-tile (grid>1) path,
    # i.e. the cross-tile BN statistics accumulation.
    fwd = jax.jit(functools.partial(basic_block_forward, stride=stride,
                                    downsample=downsample, tile_m=64))
    out = jax.block_until_ready(fwd(x, params))

    ref = jax.block_until_ready(ref_forward(x, params, stride, downsample))
    assert out.shape == ref.shape == (N, planes, H // stride, W // stride)
    err = float(jnp.max(jnp.abs(out - ref)))
    assert jnp.allclose(out, ref, atol=1e-2, rtol=1e-2), f"max abs err {err}"

    # TODO(synk): LsqActivation path (constr_activation is not None) not implemented;
    # this config uses ReLU as in the reference with constr_activation=None.
    print("KERNEL_OK")
</pallas_src>

<mosaic_0001>
module attributes {stable_mosaic.version = 11 : i64} {
  func.func @_matmul_stats_kernel(%arg0: i32, %arg1: memref<64x36xbf16, #tpu.memory_space<vmem>>, %arg2: memref<36x128xbf16, #tpu.memory_space<vmem>>, %arg3: memref<64x128xf32, #tpu.memory_space<vmem>>, %arg4: memref<8x128xf32, #tpu.memory_space<vmem>>) attributes {dimension_semantics = [#tpu.dimension_semantics<arbitrary>], iteration_bounds = array<i64: 2>, scalar_prefetch = 0 : i64, scratch_operands = 0 : i64, tpu.core_type = #tpu.core_type<tc>, window_params = [{transform_indices = @transform_0, window_bounds = array<i64: 64, 36>}, {pipeline_mode = #tpu.pipeline_mode<synchronous>, transform_indices = @transform_1, window_bounds = array<i64: 36, 128>}, {transform_indices = @transform_2, window_bounds = array<i64: 64, 128>}, {pipeline_mode = #tpu.pipeline_mode<synchronous>, transform_indices = @transform_3, window_bounds = array<i64: 8, 128>}]} {
    %c0_i32 = arith.constant 0 : i32
    %0 = arith.cmpi eq, %arg0, %c0_i32 : i32
    %1 = arith.extui %0 : i1 to i32
    %c0_i32_0 = arith.constant 0 : i32
    %2 = arith.cmpi ne, %1, %c0_i32_0 : i32
    scf.if %2 {
      %cst_13 = arith.constant 0.000000e+00 : f32
      %17 = vector.broadcast %cst_13 : f32 to vector<8x128xf32>
      %c0_14 = arith.constant 0 : index
      %c0_15 = arith.constant 0 : index
      %18 = vector.load %arg4[%c0_14, %c0_15] : memref<8x128xf32, #tpu.memory_space<vmem>>, vector<8x128xf32>
      tpu.vector_store %arg4[%c0_14, %c0_15], %17 {strides = array<i32>} : memref<8x128xf32, #tpu.memory_space<vmem>>, vector<8x128xf32>,
    } else {
    }
    %c0 = arith.constant 0 : index
    %c0_1 = arith.constant 0 : index
    %3 = vector.load %arg1[%c0, %c0_1] : memref<64x36xbf16, #tpu.memory_space<vmem>>, vector<64x36xbf16>
    %c0_2 = arith.constant 0 : index
    %c0_3 = arith.constant 0 : index
    %4 = vector.load %arg2[%c0_2, %c0_3] : memref<36x128xbf16, #tpu.memory_space<vmem>>, vector<36x128xbf16>
    %cst = arith.constant dense<0.000000e+00> : vector<64x128xf32>
    %5 = tpu.matmul %3, %4, %cst {dimension_numbers = #tpu.dot_dimension_numbers<[1], [0], [0], [1], [0, 0, 1, 1], [], []>} : vector<64x36xbf16>, vector<36x128xbf16>, vector<64x128xf32> -> vector<64x128xf32>
    %c0_4 = arith.constant 0 : index
    %c0_5 = arith.constant 0 : index
    %6 = vector.load %arg3[%c0_4, %c0_5] : memref<64x128xf32, #tpu.memory_space<vmem>>, vector<64x128xf32>
    tpu.vector_store %arg3[%c0_4, %c0_5], %5 {strides = array<i32>} : memref<64x128xf32, #tpu.memory_space<vmem>>, vector<64x128xf32>,
    %cst_6 = arith.constant dense<0.000000e+00> : vector<128xf32>
    %7 = vector.multi_reduction <add>, %5, %cst_6 [0] : vector<64x128xf32> to vector<128xf32>
    %8 = vector.shape_cast %7 : vector<128xf32> to vector<1x128xf32>
    %9 = arith.mulf %5, %5 : vector<64x128xf32>
    %cst_7 = arith.constant dense<0.000000e+00> : vector<128xf32>
    %10 = vector.multi_reduction <add>, %9, %cst_7 [0] : vector<64x128xf32> to vector<128xf32>
    %11 = vector.shape_cast %10 : vector<128xf32> to vector<1x128xf32>
    %cst_8 = arith.constant 0.000000e+00 : f32
    %12 = vector.broadcast %cst_8 : f32 to vector<6x128xf32>
    %c0_9 = arith.constant 0 : index
    %c0_10 = arith.constant 0 : index
    %13 = vector.load %arg4[%c0_9, %c0_10] : memref<8x128xf32, #tpu.memory_space<vmem>>, vector<8x128xf32>
    %14 = tpu.concatenate %8, %11, %12 in 0 : vector<1x128xf32>, vector<1x128xf32>, vector<6x128xf32> -> vector<8x128xf32>
    %15 = arith.addf %13, %14 : vector<8x128xf32>
    %c0_11 = arith.constant 0 : index
    %c0_12 = arith.constant 0 : index
    %16 = vector.load %arg4[%c0_11, %c0_12] : memref<8x128xf32, #tpu.memory_space<vmem>>, vector<8x128xf32>
    tpu.vector_store %arg4[%c0_11, %c0_12], %15 {strides = array<i32>} : memref<8x128xf32, #tpu.memory_space<vmem>>, vector<8x128xf32>,
    return
  }
  func.func @transform_0(%arg0: i32) -> (i32, i32) {
    %c0_i32 = arith.constant 0 : i32
    %c0_i32_0 = arith.constant 0 : i32
    return %arg0, %c0_i32 : i32, i32
  }
  func.func @transform_1(%arg0: i32) -> (i32, i32) {
    %c0_i32 = arith.constant 0 : i32
    %c0_i32_0 = arith.constant 0 : i32
    %c0_i32_1 = arith.constant 0 : i32
    return %c0_i32, %c0_i32_0 : i32, i32
  }
  func.func @transform_2(%arg0: i32) -> (i32, i32) {
    %c0_i32 = arith.constant 0 : i32
    %c0_i32_0 = arith.constant 0 : i32
    return %arg0, %c0_i32 : i32, i32
  }
  func.func @transform_3(%arg0: i32) -> (i32, i32) {
    %c0_i32 = arith.constant 0 : i32
    %c0_i32_0 = arith.constant 0 : i32
    %c0_i32_1 = arith.constant 0 : i32
    return %c0_i32, %c0_i32_0 : i32, i32
  }
}

module attributes {stable_mosaic.version = 11 : i64} {
  func.func @_bn_apply_kernel(%arg0: i32, %arg1: memref<64x128xf32, #tpu.memory_space<vmem>>, %arg2: memref<8x128xf32, #tpu.memory_space<vmem>>, %arg3: memref<1x128xf32, #tpu.memory_space<vmem>>, %arg4: memref<1x128xf32, #tpu.memory_space<vmem>>, %arg5: memref<64x128xf32, #tpu.memory_space<vmem>>) attributes {dimension_semantics = [#tpu.dimension_semantics<parallel>], iteration_bounds = array<i64: 2>, scalar_prefetch = 0 : i64, scratch_operands = 0 : i64, tpu.core_type = #tpu.core_type<tc>, window_params = [{transform_indices = @transform_0, window_bounds = array<i64: 64, 128>}, {pipeline_mode = #tpu.pipeline_mode<synchronous>, transform_indices = @transform_1, window_bounds = array<i64: 8, 128>}, {pipeline_mode = #tpu.pipeline_mode<synchronous>, transform_indices = @transform_2, window_bounds = array<i64: 1, 128>}, {pipeline_mode = #tpu.pipeline_mode<synchronous>, transform_indices = @transform_3, window_bounds = array<i64: 1, 128>}, {transform_indices = @transform_4, window_bounds = array<i64: 64, 128>}]} {
    %c0 = arith.constant 0 : index
    %c0_0 = arith.constant 0 : index
    %0 = vector.load %arg1[%c0, %c0_0] : memref<64x128xf32, #tpu.memory_space<vmem>>, vector<64x128xf32>
    %c0_1 = arith.constant 0 : index
    %c0_2 = arith.constant 0 : index
    %1 = vector.load %arg2[%c0_1, %c0_2] : memref<8x128xf32, #tpu.memory_space<vmem>>, vector<1x128xf32>
    %cst = arith.constant 7.812500e-03 : f32
    %2 = vector.broadcast %cst : f32 to vector<1x128xf32>
    %3 = arith.mulf %1, %2 : vector<1x128xf32>
    %c1 = arith.constant 1 : index
    %c0_3 = arith.constant 0 : index
    %4 = vector.load %arg2[%c1, %c0_3] : memref<8x128xf32, #tpu.memory_space<vmem>>, vector<1x128xf32>
    %cst_4 = arith.constant 7.812500e-03 : f32
    %5 = vector.broadcast %cst_4 : f32 to vector<1x128xf32>
    %6 = arith.mulf %4, %5 : vector<1x128xf32>
    %7 = arith.mulf %3, %3 : vector<1x128xf32>
    %8 = arith.subf %6, %7 : vector<1x128xf32>
    %cst_5 = arith.constant 0.000000e+00 : f32
    %9 = vector.broadcast %cst_5 : f32 to vector<1x128xf32>
    %10 = arith.maximumf %8, %9 : vector<1x128xf32>
    %cst_6 = arith.constant 9.99999974E-6 : f32
    %11 = vector.broadcast %cst_6 : f32 to vector<1x128xf32>
    %12 = arith.addf %10, %11 : vector<1x128xf32>
    %13 = math.rsqrt %12 : vector<1x128xf32>
    %c0_7 = arith.constant 0 : index
    %c0_8 = arith.constant 0 : index
    %14 = vector.load %arg3[%c0_7, %c0_8] : memref<1x128xf32, #tpu.memory_space<vmem>>, vector<1x128xf32>
    %15 = arith.mulf %13, %14 : vector<1x128xf32>
    %c0_9 = arith.constant 0 : index
    %c0_10 = arith.constant 0 : index
    %16 = vector.load %arg4[%c0_9, %c0_10] : memref<1x128xf32, #tpu.memory_space<vmem>>, vector<1x128xf32>
    %17 = arith.mulf %3, %15 : vector<1x128xf32>
    %18 = arith.subf %16, %17 : vector<1x128xf32>
    %19 = vector.broadcast %15 : vector<1x128xf32> to vector<64x128xf32>
    %20 = arith.mulf %0, %19 : vector<64x128xf32>
    %21 = vector.broadcast %18 : vector<1x128xf32> to vector<64x128xf32>
    %22 = arith.addf %20, %21 : vector<64x128xf32>
    %cst_11 = arith.constant 0.000000e+00 : f32
    %23 = vector.broadcast %cst_11 : f32 to vector<64x128xf32>
    %24 = arith.maximumf %22, %23 : vector<64x128xf32>
    %c0_12 = arith.constant 0 : index
    %c0_13 = arith.constant 0 : index
    %25 = vector.load %arg5[%c0_12, %c0_13] : memref<64x128xf32, #tpu.memory_space<vmem>>, vector<64x128xf32>
    tpu.vector_store %arg5[%c0_12, %c0_13], %24 {strides = array<i32>} : memref<64x128xf32, #tpu.memory_space<vmem>>, vector<64x128xf32>,
    return
  }
  func.func @transform_0(%arg0: i32) -> (i32, i32) {
    %c0_i32 = arith.constant 0 : i32
    %c0_i32_0 = arith.constant 0 : i32
    return %arg0, %c0_i32 : i32, i32
  }
  func.func @transform_1(%arg0: i32) -> (i32, i32) {
    %c0_i32 = arith.constant 0 : i32
    %c0_i32_0 = arith.constant 0 : i32
    %c0_i32_1 = arith.constant 0 : i32
    return %c0_i32, %c0_i32_0 : i32, i32
  }
  func.func @transform_2(%arg0: i32) -> (i32, i32) {
    %c0_i32 = arith.constant 0 : i32
    %c0_i32_0 = arith.constant 0 : i32
    %c0_i32_1 = arith.constant 0 : i32
    return %c0_i32, %c0_i32_0 : i32, i32
  }
  func.func @transform_3(%arg0: i32) -> (i32, i32) {
    %c0_i32 = arith.constant 0 : i32
    %c0_i32_0 = arith.constant 0 : i32
    %c0_i32_1 = arith.constant 0 : i32
    return %c0_i32, %c0_i32_0 : i32, i32
  }
  func.func @transform_4(%arg0: i32) -> (i32, i32) {
    %c0_i32 = arith.constant 0 : i32
    %c0_i32_0 = arith.constant 0 : i32
    return %arg0, %c0_i32 : i32, i32
  }
}

module attributes {stable_mosaic.version = 11 : i64} {
  func.func @_matmul_stats_kernel(%arg0: i32, %arg1: memref<64x72xbf16, #tpu.memory_space<vmem>>, %arg2: memref<72x128xbf16, #tpu.memory_space<vmem>>, %arg3: memref<64x128xf32, #tpu.memory_space<vmem>>, %arg4: memref<8x128xf32, #tpu.memory_space<vmem>>) attributes {dimension_semantics = [#tpu.dimension_semantics<arbitrary>], iteration_bounds = array<i64: 2>, scalar_prefetch = 0 : i64, scratch_operands = 0 : i64, tpu.core_type = #tpu.core_type<tc>, window_params = [{transform_indices = @transform_0, window_bounds = array<i64: 64, 72>}, {pipeline_mode = #tpu.pipeline_mode<synchronous>, transform_indices = @transform_1, window_bounds = array<i64: 72, 128>}, {transform_indices = @transform_2, window_bounds = array<i64: 64, 128>}, {pipeline_mode = #tpu.pipeline_mode<synchronous>, transform_indices = @transform_3, window_bounds = array<i64: 8, 128>}]} {
    %c0_i32 = arith.constant 0 : i32
    %0 = arith.cmpi eq, %arg0, %c0_i32 : i32
    %1 = arith.extui %0 : i1 to i32
    %c0_i32_0 = arith.constant 0 : i32
    %2 = arith.cmpi ne, %1, %c0_i32_0 : i32
    scf.if %2 {
      %cst_13 = arith.constant 0.000000e+00 : f32
      %17 = vector.broadcast %cst_13 : f32 to vector<8x128xf32>
      %c0_14 = arith.constant 0 : index
      %c0_15 = arith.constant 0 : index
      %18 = vector.load %arg4[%c0_14, %c0_15] : memref<8x128xf32, #tpu.memory_space<vmem>>, vector<8x128xf32>
      tpu.vector_store %arg4[%c0_14, %c0_15], %17 {strides = array<i32>} : memref<8x128xf32, #tpu.memory_space<vmem>>, vector<8x128xf32>,
    } else {
    }
    %c0 = arith.constant 0 : index
    %c0_1 = arith.constant 0 : index
    %3 = vector.load %arg1[%c0, %c0_1] : memref<64x72xbf16, #tpu.memory_space<vmem>>, vector<64x72xbf16>
    %c0_2 = arith.constant 0 : index
    %c0_3 = arith.constant 0 : index
    %4 = vector.load %arg2[%c0_2, %c0_3] : memref<72x128xbf16, #tpu.memory_space<vmem>>, vector<72x128xbf16>
    %cst = arith.constant dense<0.000000e+00> : vector<64x128xf32>
    %5 = tpu.matmul %3, %4, %cst {dimension_numbers = #tpu.dot_dimension_numbers<[1], [0], [0], [1], [0, 0, 1, 1], [], []>} : vector<64x72xbf16>, vector<72x128xbf16>, vector<64x128xf32> -> vector<64x128xf32>
    %c0_4 = arith.constant 0 : index
    %c0_5 = arith.constant 0 : index
    %6 = vector.load %arg3[%c0_4, %c0_5] : memref<64x128xf32, #tpu.memory_space<vmem>>, vector<64x128xf32>
    tpu.vector_store %arg3[%c0_4, %c0_5], %5 {strides = array<i32>} : memref<64x128xf32, #tpu.memory_space<vmem>>, vector<64x128xf32>,
    %cst_6 = arith.constant dense<0.000000e+00> : vector<128xf32>
    %7 = vector.multi_reduction <add>, %5, %cst_6 [0] : vector<64x128xf32> to vector<128xf32>
    %8 = vector.shape_cast %7 : vector<128xf32> to vector<1x128xf32>
    %9 = arith.mulf %5, %5 : vector<64x128xf32>
    %cst_7 = arith.constant dense<0.000000e+00> : vector<128xf32>
    %10 = vector.multi_reduction <add>, %9, %cst_7 [0] : vector<64x128xf32> to vector<128xf32>
    %11 = vector.shape_cast %10 : vector<128xf32> to vector<1x128xf32>
    %cst_8 = arith.constant 0.000000e+00 : f32
    %12 = vector.broadcast %cst_8 : f32 to vector<6x128xf32>
    %c0_9 = arith.constant 0 : index
    %c0_10 = arith.constant 0 : index
    %13 = vector.load %arg4[%c0_9, %c0_10] : memref<8x128xf32, #tpu.memory_space<vmem>>, vector<8x128xf32>
    %14 = tpu.concatenate %8, %11, %12 in 0 : vector<1x128xf32>, vector<1x128xf32>, vector<6x128xf32> -> vector<8x128xf32>
    %15 = arith.addf %13, %14 : vector<8x128xf32>
    %c0_11 = arith.constant 0 : index
    %c0_12 = arith.constant 0 : index
    %16 = vector.load %arg4[%c0_11, %c0_12] : memref<8x128xf32, #tpu.memory_space<vmem>>, vector<8x128xf32>
    tpu.vector_store %arg4[%c0_11, %c0_12], %15 {strides = array<i32>} : memref<8x128xf32, #tpu.memory_space<vmem>>, vector<8x128xf32>,
    return
  }
  func.func @transform_0(%arg0: i32) -> (i32, i32) {
    %c0_i32 = arith.constant 0 : i32
    %c0_i32_0 = arith.constant 0 : i32
    return %arg0, %c0_i32 : i32, i32
  }
  func.func @transform_1(%arg0: i32) -> (i32, i32) {
    %c0_i32 = arith.constant 0 : i32
    %c0_i32_0 = arith.constant 0 : i32
    %c0_i32_1 = arith.constant 0 : i32
    return %c0_i32, %c0_i32_0 : i32, i32
  }
  func.func @transform_2(%arg0: i32) -> (i32, i32) {
    %c0_i32 = arith.constant 0 : i32
    %c0_i32_0 = arith.constant 0 : i32
    return %arg0, %c0_i32 : i32, i32
  }
  func.func @transform_3(%arg0: i32) -> (i32, i32) {
    %c0_i32 = arith.constant 0 : i32
    %c0_i32_0 = arith.constant 0 : i32
    %c0_i32_1 = arith.constant 0 : i32
    return %c0_i32, %c0_i32_0 : i32, i32
  }
}

module attributes {stable_mosaic.version = 11 : i64} {
  func.func @_matmul_stats_kernel(%arg0: i32, %arg1: memref<64x4xbf16, #tpu.memory_space<vmem>>, %arg2: memref<4x128xbf16, #tpu.memory_space<vmem>>, %arg3: memref<64x128xf32, #tpu.memory_space<vmem>>, %arg4: memref<8x128xf32, #tpu.memory_space<vmem>>) attributes {dimension_semantics = [#tpu.dimension_semantics<arbitrary>], iteration_bounds = array<i64: 2>, scalar_prefetch = 0 : i64, scratch_operands = 0 : i64, tpu.core_type = #tpu.core_type<tc>, window_params = [{transform_indices = @transform_0, window_bounds = array<i64: 64, 4>}, {pipeline_mode = #tpu.pipeline_mode<synchronous>, transform_indices = @transform_1, window_bounds = array<i64: 4, 128>}, {transform_indices = @transform_2, window_bounds = array<i64: 64, 128>}, {pipeline_mode = #tpu.pipeline_mode<synchronous>, transform_indices = @transform_3, window_bounds = array<i64: 8, 128>}]} {
    %c0_i32 = arith.constant 0 : i32
    %0 = arith.cmpi eq, %arg0, %c0_i32 : i32
    %1 = arith.extui %0 : i1 to i32
    %c0_i32_0 = arith.constant 0 : i32
    %2 = arith.cmpi ne, %1, %c0_i32_0 : i32
    scf.if %2 {
      %cst_13 = arith.constant 0.000000e+00 : f32
      %17 = vector.broadcast %cst_13 : f32 to vector<8x128xf32>
      %c0_14 = arith.constant 0 : index
      %c0_15 = arith.constant 0 : index
      %18 = vector.load %arg4[%c0_14, %c0_15] : memref<8x128xf32, #tpu.memory_space<vmem>>, vector<8x128xf32>
      tpu.vector_store %arg4[%c0_14, %c0_15], %17 {strides = array<i32>} : memref<8x128xf32, #tpu.memory_space<vmem>>, vector<8x128xf32>,
    } else {
    }
    %c0 = arith.constant 0 : index
    %c0_1 = arith.constant 0 : index
    %3 = vector.load %arg1[%c0, %c0_1] : memref<64x4xbf16, #tpu.memory_space<vmem>>, vector<64x4xbf16>
    %c0_2 = arith.constant 0 : index
    %c0_3 = arith.constant 0 : index
    %4 = vector.load %arg2[%c0_2, %c0_3] : memref<4x128xbf16, #tpu.memory_space<vmem>>, vector<4x128xbf16>
    %cst = arith.constant dense<0.000000e+00> : vector<64x128xf32>
    %5 = tpu.matmul %3, %4, %cst {dimension_numbers = #tpu.dot_dimension_numbers<[1], [0], [0], [1], [0, 0, 1, 1], [], []>} : vector<64x4xbf16>, vector<4x128xbf16>, vector<64x128xf32> -> vector<64x128xf32>
    %c0_4 = arith.constant 0 : index
    %c0_5 = arith.constant 0 : index
    %6 = vector.load %arg3[%c0_4, %c0_5] : memref<64x128xf32, #tpu.memory_space<vmem>>, vector<64x128xf32>
    tpu.vector_store %arg3[%c0_4, %c0_5], %5 {strides = array<i32>} : memref<64x128xf32, #tpu.memory_space<vmem>>, vector<64x128xf32>,
    %cst_6 = arith.constant dense<0.000000e+00> : vector<128xf32>
    %7 = vector.multi_reduction <add>, %5, %cst_6 [0] : vector<64x128xf32> to vector<128xf32>
    %8 = vector.shape_cast %7 : vector<128xf32> to vector<1x128xf32>
    %9 = arith.mulf %5, %5 : vector<64x128xf32>
    %cst_7 = arith.constant dense<0.000000e+00> : vector<128xf32>
    %10 = vector.multi_reduction <add>, %9, %cst_7 [0] : vector<64x128xf32> to vector<128xf32>
    %11 = vector.shape_cast %10 : vector<128xf32> to vector<1x128xf32>
    %cst_8 = arith.constant 0.000000e+00 : f32
    %12 = vector.broadcast %cst_8 : f32 to vector<6x128xf32>
    %c0_9 = arith.constant 0 : index
    %c0_10 = arith.constant 0 : index
    %13 = vector.load %arg4[%c0_9, %c0_10] : memref<8x128xf32, #tpu.memory_space<vmem>>, vector<8x128xf32>
    %14 = tpu.concatenate %8, %11, %12 in 0 : vector<1x128xf32>, vector<1x128xf32>, vector<6x128xf32> -> vector<8x128xf32>
    %15 = arith.addf %13, %14 : vector<8x128xf32>
    %c0_11 = arith.constant 0 : index
    %c0_12 = arith.constant 0 : index
    %16 = vector.load %arg4[%c0_11, %c0_12] : memref<8x128xf32, #tpu.memory_space<vmem>>, vector<8x128xf32>
    tpu.vector_store %arg4[%c0_11, %c0_12], %15 {strides = array<i32>} : memref<8x128xf32, #tpu.memory_space<vmem>>, vector<8x128xf32>,
    return
  }
  func.func @transform_0(%arg0: i32) -> (i32, i32) {
    %c0_i32 = arith.constant 0 : i32
    %c0_i32_0 = arith.constant 0 : i32
    return %arg0, %c0_i32 : i32, i32
  }
  func.func @transform_1(%arg0: i32) -> (i32, i32) {
    %c0_i32 = arith.constant 0 : i32
    %c0_i32_0 = arith.constant 0 : i32
    %c0_i32_1 = arith.constant 0 : i32
    return %c0_i32, %c0_i32_0 : i32, i32
  }
  func.func @transform_2(%arg0: i32) -> (i32, i32) {
    %c0_i32 = arith.constant 0 : i32
    %c0_i32_0 = arith.constant 0 : i32
    return %arg0, %c0_i32 : i32, i32
  }
  func.func @transform_3(%arg0: i32) -> (i32, i32) {
    %c0_i32 = arith.constant 0 : i32
    %c0_i32_0 = arith.constant 0 : i32
    %c0_i32_1 = arith.constant 0 : i32
    return %c0_i32, %c0_i32_0 : i32, i32
  }
}

module attributes {stable_mosaic.version = 11 : i64} {
  func.func @_bn_apply_kernel(%arg0: i32, %arg1: memref<64x128xf32, #tpu.memory_space<vmem>>, %arg2: memref<8x128xf32, #tpu.memory_space<vmem>>, %arg3: memref<1x128xf32, #tpu.memory_space<vmem>>, %arg4: memref<1x128xf32, #tpu.memory_space<vmem>>, %arg5: memref<64x128xf32, #tpu.memory_space<vmem>>) attributes {dimension_semantics = [#tpu.dimension_semantics<parallel>], iteration_bounds = array<i64: 2>, scalar_prefetch = 0 : i64, scratch_operands = 0 : i64, tpu.core_type = #tpu.core_type<tc>, window_params = [{transform_indices = @transform_0, window_bounds = array<i64: 64, 128>}, {pipeline_mode = #tpu.pipeline_mode<synchronous>, transform_indices = @transform_1, window_bounds = array<i64: 8, 128>}, {pipeline_mode = #tpu.pipeline_mode<synchronous>, transform_indices = @transform_2, window_bounds = array<i64: 1, 128>}, {pipeline_mode = #tpu.pipeline_mode<synchronous>, transform_indices = @transform_3, window_bounds = array<i64: 1, 128>}, {transform_indices = @transform_4, window_bounds = array<i64: 64, 128>}]} {
    %c0 = arith.constant 0 : index
    %c0_0 = arith.constant 0 : index
    %0 = vector.load %arg1[%c0, %c0_0] : memref<64x128xf32, #tpu.memory_space<vmem>>, vector<64x128xf32>
    %c0_1 = arith.constant 0 : index
    %c0_2 = arith.constant 0 : index
    %1 = vector.load %arg2[%c0_1, %c0_2] : memref<8x128xf32, #tpu.memory_space<vmem>>, vector<1x128xf32>
    %cst = arith.constant 7.812500e-03 : f32
    %2 = vector.broadcast %cst : f32 to vector<1x128xf32>
    %3 = arith.mulf %1, %2 : vector<1x128xf32>
    %c1 = arith.constant 1 : index
    %c0_3 = arith.constant 0 : index
    %4 = vector.load %arg2[%c1, %c0_3] : memref<8x128xf32, #tpu.memory_space<vmem>>, vector<1x128xf32>
    %cst_4 = arith.constant 7.812500e-03 : f32
    %5 = vector.broadcast %cst_4 : f32 to vector<1x128xf32>
    %6 = arith.mulf %4, %5 : vector<1x128xf32>
    %7 = arith.mulf %3, %3 : vector<1x128xf32>
    %8 = arith.subf %6, %7 : vector<1x128xf32>
    %cst_5 = arith.constant 0.000000e+00 : f32
    %9 = vector.broadcast %cst_5 : f32 to vector<1x128xf32>
    %10 = arith.maximumf %8, %9 : vector<1x128xf32>
    %cst_6 = arith.constant 9.99999974E-6 : f32
    %11 = vector.broadcast %cst_6 : f32 to vector<1x128xf32>
    %12 = arith.addf %10, %11 : vector<1x128xf32>
    %13 = math.rsqrt %12 : vector<1x128xf32>
    %c0_7 = arith.constant 0 : index
    %c0_8 = arith.constant 0 : index
    %14 = vector.load %arg3[%c0_7, %c0_8] : memref<1x128xf32, #tpu.memory_space<vmem>>, vector<1x128xf32>
    %15 = arith.mulf %13, %14 : vector<1x128xf32>
    %c0_9 = arith.constant 0 : index
    %c0_10 = arith.constant 0 : index
    %16 = vector.load %arg4[%c0_9, %c0_10] : memref<1x128xf32, #tpu.memory_space<vmem>>, vector<1x128xf32>
    %17 = arith.mulf %3, %15 : vector<1x128xf32>
    %18 = arith.subf %16, %17 : vector<1x128xf32>
    %19 = vector.broadcast %15 : vector<1x128xf32> to vector<64x128xf32>
    %20 = arith.mulf %0, %19 : vector<64x128xf32>
    %21 = vector.broadcast %18 : vector<1x128xf32> to vector<64x128xf32>
    %22 = arith.addf %20, %21 : vector<64x128xf32>
    %c0_11 = arith.constant 0 : index
    %c0_12 = arith.constant 0 : index
    %23 = vector.load %arg5[%c0_11, %c0_12] : memref<64x128xf32, #tpu.memory_space<vmem>>, vector<64x128xf32>
    tpu.vector_store %arg5[%c0_11, %c0_12], %22 {strides = array<i32>} : memref<64x128xf32, #tpu.memory_space<vmem>>, vector<64x128xf32>,
    return
  }
  func.func @transform_0(%arg0: i32) -> (i32, i32) {
    %c0_i32 = arith.constant 0 : i32
    %c0_i32_0 = arith.constant 0 : i32
    return %arg0, %c0_i32 : i32, i32
  }
  func.func @transform_1(%arg0: i32) -> (i32, i32) {
    %c0_i32 = arith.constant 0 : i32
    %c0_i32_0 = arith.constant 0 : i32
    %c0_i32_1 = arith.constant 0 : i32
    return %c0_i32, %c0_i32_0 : i32, i32
  }
  func.func @transform_2(%arg0: i32) -> (i32, i32) {
    %c0_i32 = arith.constant 0 : i32
    %c0_i32_0 = arith.constant 0 : i32
    %c0_i32_1 = arith.constant 0 : i32
    return %c0_i32, %c0_i32_0 : i32, i32
  }
  func.func @transform_3(%arg0: i32) -> (i32, i32) {
    %c0_i32 = arith.constant 0 : i32
    %c0_i32_0 = arith.constant 0 : i32
    %c0_i32_1 = arith.constant 0 : i32
    return %c0_i32, %c0_i32_0 : i32, i32
  }
  func.func @transform_4(%arg0: i32) -> (i32, i32) {
    %c0_i32 = arith.constant 0 : i32
    %c0_i32_0 = arith.constant 0 : i32
    return %arg0, %c0_i32 : i32, i32
  }
}

module attributes {stable_mosaic.version = 11 : i64} {
  func.func @_bn_apply_kernel(%arg0: i32, %arg1: memref<64x128xf32, #tpu.memory_space<vmem>>, %arg2: memref<8x128xf32, #tpu.memory_space<vmem>>, %arg3: memref<1x128xf32, #tpu.memory_space<vmem>>, %arg4: memref<1x128xf32, #tpu.memory_space<vmem>>, %arg5: memref<64x128xf32, #tpu.memory_space<vmem>>, %arg6: memref<64x128xf32, #tpu.memory_space<vmem>>) attributes {dimension_semantics = [#tpu.dimension_semantics<parallel>], iteration_bounds = array<i64: 2>, scalar_prefetch = 0 : i64, scratch_operands = 0 : i64, tpu.core_type = #tpu.core_type<tc>, window_params = [{transform_indices = @transform_0, window_bounds = array<i64: 64, 128>}, {pipeline_mode = #tpu.pipeline_mode<synchronous>, transform_indices = @transform_1, window_bounds = array<i64: 8, 128>}, {pipeline_mode = #tpu.pipeline_mode<synchronous>, transform_indices = @transform_2, window_bounds = array<i64: 1, 128>}, {pipeline_mode = #tpu.pipeline_mode<synchronous>, transform_indices = @transform_3, window_bounds = array<i64: 1, 128>}, {transform_indices = @transform_4, window_bounds = array<i64: 64, 128>}, {transform_indices = @transform_5, window_bounds = array<i64: 64, 128>}]} {
    %c0 = arith.constant 0 : index
    %c0_0 = arith.constant 0 : index
    %0 = vector.load %arg1[%c0, %c0_0] : memref<64x128xf32, #tpu.memory_space<vmem>>, vector<64x128xf32>
    %c0_1 = arith.constant 0 : index
    %c0_2 = arith.constant 0 : index
    %1 = vector.load %arg2[%c0_1, %c0_2] : memref<8x128xf32, #tpu.memory_space<vmem>>, vector<1x128xf32>
    %cst = arith.constant 7.812500e-03 : f32
    %2 = vector.broadcast %cst : f32 to vector<1x128xf32>
    %3 = arith.mulf %1, %2 : vector<1x128xf32>
    %c1 = arith.constant 1 : index
    %c0_3 = arith.constant 0 : index
    %4 = vector.load %arg2[%c1, %c0_3] : memref<8x128xf32, #tpu.memory_space<vmem>>, vector<1x128xf32>
    %cst_4 = arith.constant 7.812500e-03 : f32
    %5 = vector.broadcast %cst_4 : f32 to vector<1x128xf32>
    %6 = arith.mulf %4, %5 : vector<1x128xf32>
    %7 = arith.mulf %3, %3 : vector<1x128xf32>
    %8 = arith.subf %6, %7 : vector<1x128xf32>
    %cst_5 = arith.constant 0.000000e+00 : f32
    %9 = vector.broadcast %cst_5 : f32 to vector<1x128xf32>
    %10 = arith.maximumf %8, %9 : vector<1x128xf32>
    %cst_6 = arith.constant 9.99999974E-6 : f32
    %11 = vector.broadcast %cst_6 : f32 to vector<1x128xf32>
    %12 = arith.addf %10, %11 : vector<1x128xf32>
    %13 = math.rsqrt %12 : vector<1x128xf32>
    %c0_7 = arith.constant 0 : index
    %c0_8 = arith.constant 0 : index
    %14 = vector.load %arg3[%c0_7, %c0_8] : memref<1x128xf32, #tpu.memory_space<vmem>>, vector<1x128xf32>
    %15 = arith.mulf %13, %14 : vector<1x128xf32>
    %c0_9 = arith.constant 0 : index
    %c0_10 = arith.constant 0 : index
    %16 = vector.load %arg4[%c0_9, %c0_10] : memref<1x128xf32, #tpu.memory_space<vmem>>, vector<1x128xf32>
    %17 = arith.mulf %3, %15 : vector<1x128xf32>
    %18 = arith.subf %16, %17 : vector<1x128xf32>
    %19 = vector.broadcast %15 : vector<1x128xf32> to vector<64x128xf32>
    %20 = arith.mulf %0, %19 : vector<64x128xf32>
    %21 = vector.broadcast %18 : vector<1x128xf32> to vector<64x128xf32>
    %22 = arith.addf %20, %21 : vector<64x128xf32>
    %c0_11 = arith.constant 0 : index
    %c0_12 = arith.constant 0 : index
    %23 = vector.load %arg5[%c0_11, %c0_12] : memref<64x128xf32, #tpu.memory_space<vmem>>, vector<64x128xf32>
    %24 = arith.addf %22, %23 : vector<64x128xf32>
    %cst_13 = arith.constant 0.000000e+00 : f32
    %25 = vector.broadcast %cst_13 : f32 to vector<64x128xf32>
    %26 = arith.maximumf %24, %25 : vector<64x128xf32>
    %c0_14 = arith.constant 0 : index
    %c0_15 = arith.constant 0 : index
    %27 = vector.load %arg6[%c0_14, %c0_15] : memref<64x128xf32, #tpu.memory_space<vmem>>, vector<64x128xf32>
    tpu.vector_store %arg6[%c0_14, %c0_15], %26 {strides = array<i32>} : memref<64x128xf32, #tpu.memory_space<vmem>>, vector<64x128xf32>,
    return
  }
  func.func @transform_0(%arg0: i32) -> (i32, i32) {
    %c0_i32 = arith.constant 0 : i32
    %c0_i32_0 = arith.constant 0 : i32
    return %arg0, %c0_i32 : i32, i32
  }
  func.func @transform_1(%arg0: i32) -> (i32, i32) {
    %c0_i32 = arith.constant 0 : i32
    %c0_i32_0 = arith.constant 0 : i32
    %c0_i32_1 = arith.constant 0 : i32
    return %c0_i32, %c0_i32_0 : i32, i32
  }
  func.func @transform_2(%arg0: i32) -> (i32, i32) {
    %c0_i32 = arith.constant 0 : i32
    %c0_i32_0 = arith.constant 0 : i32
    %c0_i32_1 = arith.constant 0 : i32
    return %c0_i32, %c0_i32_0 : i32, i32
  }
  func.func @transform_3(%arg0: i32) -> (i32, i32) {
    %c0_i32 = arith.constant 0 : i32
    %c0_i32_0 = arith.constant 0 : i32
    %c0_i32_1 = arith.constant 0 : i32
    return %c0_i32, %c0_i32_0 : i32, i32
  }
  func.func @transform_4(%arg0: i32) -> (i32, i32) {
    %c0_i32 = arith.constant 0 : i32
    %c0_i32_0 = arith.constant 0 : i32
    return %arg0, %c0_i32 : i32, i32
  }
  func.func @transform_5(%arg0: i32) -> (i32, i32) {
    %c0_i32 = arith.constant 0 : i32
    %c0_i32_0 = arith.constant 0 : i32
    return %arg0, %c0_i32 : i32, i32
  }
}

</mosaic_0001>

<bundles_post_ra>
// kernel: basic_block_forward.9
= control target key start
LH: loop header
LB: loop body
LE: loop exit
PB: predicated region body
PF: predicated region fallthrough
CT: control target
= control target key end

     0   :  { %9 = vsyncpa [#allocation3], 0  ;;  %s1037_s0 = inlined_call_operand.hbm [shape: f32[128,128], index: 0, kind: input, shape index: {}]   ;;  %s1038_s1 = inlined_call_operand.hbm [shape: f32[8,128], index: 1, kind: input, shape index: {}]   ;;  %s1039_s2 = inlined_call_operand.hbm [shape: f32[1,128], index: 2, kind: input, shape index: {}]   ;;  %s1040_s3 = inlined_call_operand.hbm [shape: f32[1,128], index: 3, kind: input, shape index: {}]   ;;  %s1041_s4 = inlined_call_operand.hbm [shape: f32[128,128], index: 4, kind: output, shape index: {}]  }
   0x1   :  { %11 = vsyncpa [#allocation3 + $0x1], 0 }
   0x2   :  { %12 = vsyncpa [#allocation6], 0 }
   0x3   :  { %13 = vsyncpa [#allocation9], 0 }
   0x4   :  { %14 = vsyncpa [#allocation4], 0 }
   0x5   :  { %16 = vsyncpa [#allocation4 + $0x1], 0  ;;  %s765_s15 = smov 0   ;;  %s767_s16 = smov 0  }
   0x6   :  { %s769_s17 = smov 0   ;;  %s771_s18 = smov 0  }
   0x7 LB: > { %s786_s19 = sadd.s32 4294967295, %s729_s18   ;;  %s436_s20 = sadd.s32 4294967294, %s729_s18   ;;  %s729_s18 = sphi %s771_s18, %s1064_s18   ;;  %s725_s17 = sphi %s769_s17, %s1063_s17   ;;  %s721_s16 = sphi %s767_s16, %s1062_s16   ;;  %s717_s15 = sphi %s765_s15, %s1061_s15  }
   0x8   : > { %p42_p0 = scmp.ne.s32.totalorder %s721_s16, %s717_s15  ;;  %p1042_p1 = scmp.eq.s32.totalorder %s786_s19, 0 }
   0x9   : > { %p135_p3 = scmp.eq.s32.totalorder %s436_s20, 1  ;;  %p437_p5 = scmp.ge.s32.totalorder %s729_s18, 1 }
   0xa   : > { %p795_p4 = por %p1042_p1, %p42_p0  ;;  %p142_p7 = scmp.lt.s32.totalorder %s729_s18, 3 }
   0xb   : > { %p800_p6 = por %p135_p3, %p42_p0  ;;  %s731_s24 = smov [#allocation5]  }
   0xc   : > { %s1045_s21 = scalar_select %p795_p4, 1, 0 }
   0xd   : > { %s1046_s22 = scalar_select %p800_p6, 1, 0 }
   0xe   : > { %p805_p8 = pnand %p437_p5, %p142_p7  ;;  %s155_s25 = sshll.u32 %s731_s24, 4  ;;  %s156_s25 = int_to_ptr.vmem [resolvable:$true] %s155_s25 }
   0xf   : > { %s732_s26 = smov [#allocation7]   ;;  %s733_s29 = smov [#allocation8]  }
  0x10   : > { %s1047_s23 = scalar_select %p805_p8, 1, 0 }
  0x11   : > { %p474_p10 = pneg %p805_p8  ;;  %s166_s27 = sshll.u32 %s732_s26, 4  ;;  %s818_s27 = int_to_ptr.vmem [resolvable:$true] %s166_s27 }
  0x12   : > { %s177_s30 = sshll.u32 %s733_s29, 4  ;;  %s541_s7 = scalar_lea.hbm %s1038_s1, 128  ;;  %s820_s30 = int_to_ptr.vmem [resolvable:$true] %s177_s30 }
  0x13   : > { %p814_p11 = pnand %p474_p10, %p1042_p1  ;;  %p542_p12 = scmp.ne.s32.totalorder %s1038_s1, %s541_s7 }
  0x14   : > { %p548_p5 = scmp.lt.u32.totalorder %s541_s7, %s1038_s1 }
  0x15   : > { %p830_p13 = pneg %p814_p11 }
  0x17   : > { %p544_p0 = pnand %p830_p13, %p542_p12 }
  0x19   : > { %p545_p3 = pneg %p544_p0 }
  0x1b   : > { %p550_p7 = pnand %p548_p5, %p545_p3 }
  0x1d   : > { %553 = shalt.err (!%p550_p7)
}
  0x1e   : > { %s554_s13 = scalar_lea.vmem %s156_s25, 128  ;;  %p562_p2 = scmp.lt.s32.totalorder %s156_s25, %s156_s25 }
  0x1f   : > { %p555_p10 = scmp.ne.s32.totalorder %s156_s25, %s554_s13  ;;  %p563_p6 = scmp.lt.s32.totalorder %s554_s13, %s554_s13 }
  0x21   : > { %p557_p9 = pnand %p555_p10, %p830_p13  ;;  %p564_p4 = por %p563_p6, %p562_p2 }
  0x23   : > { %p558_p1 = pneg %p557_p9 }
  0x25   : > { %p565_p8 = pnand %p564_p4, %p558_p1 }
  0x27   : > { %568 = shalt.err (!%p565_p8)
}
  0x28   : > { %477 = dma.hbm_to_vmem [thread:$0]  (!%p814_p11), %s1038_s1, 128, %s156_s25, [#allocation6]  }
  0x29   : > { %s569_s29 = scalar_lea.hbm %s1039_s2, 16 }
  0x2a   : > { %p570_p9 = scmp.ne.s32.totalorder %s1039_s2, %s569_s29  ;;  %p576_p1 = scmp.lt.u32.totalorder %s569_s29, %s1039_s2 }
  0x2c   : > { %p572_p12 = pnand %p570_p9, %p830_p13 }
  0x2e   : > { %p573_p2 = pneg %p572_p12 }
  0x30   : > { %p578_p4 = pnand %p576_p1, %p573_p2 }
  0x32   : > { %581 = shalt.err (!%p578_p4)
}
  0x33   : > { %s582_s25 = scalar_lea.vmem %s818_s27, 16  ;;  %s589_s9 = scalar_lea.vmem %s818_s27, 32 }
  0x34   : > { %p583_p6 = scmp.ne.s32.totalorder %s818_s27, %s582_s25  ;;  %p590_p3 = scmp.lt.s32.totalorder %s818_s27, %s818_s27 }
  0x35   : > { %p591_p5 = scmp.lt.s32.totalorder %s589_s9, %s582_s25 }
  0x36   : > { %p585_p8 = pnand %p583_p6, %p830_p13 }
  0x37   : > { %p592_p7 = por %p591_p5, %p590_p3 }
  0x38   : > { %p586_p0 = pneg %p585_p8 }
  0x3a   : > { %p593_p10 = pnand %p592_p7, %p586_p0 }
  0x3c   : > { %596 = shalt.err (!%p593_p10)
}
  0x3d   : > { %480 = dma.hbm_to_vmem [thread:$0]  (!%p814_p11), %s1039_s2, 16, %s818_s27, [#allocation6]  }
  0x3e   : > { %s597_s20 = scalar_lea.hbm %s1040_s3, 16 }
  0x3f   : > { %p598_p9 = scmp.ne.s32.totalorder %s1040_s3, %s597_s20  ;;  %p604_p1 = scmp.lt.u32.totalorder %s597_s20, %s1040_s3 }
  0x41   : > { %p600_p12 = pnand %p598_p9, %p830_p13 }
  0x43   : > { %p601_p2 = pneg %p600_p12 }
  0x45   : > { %p606_p4 = pnand %p604_p1, %p601_p2 }
  0x47   : > { %609 = shalt.err (!%p606_p4)
}
  0x48   : > { %s610_s27 = scalar_lea.vmem %s820_s30, 16  ;;  %s617_s6 = scalar_lea.vmem %s820_s30, 32 }
  0x49   : > { %p611_p6 = scmp.ne.s32.totalorder %s820_s30, %s610_s27  ;;  %p618_p3 = scmp.lt.s32.totalorder %s820_s30, %s820_s30 }
  0x4a   : > { %p619_p5 = scmp.lt.s32.totalorder %s617_s6, %s610_s27 }
  0x4b   : > { %p613_p8 = pnand %p611_p6, %p830_p13 }
  0x4c   : > { %p620_p7 = por %p619_p5, %p618_p3 }
  0x4d   : > { %p614_p0 = pneg %p613_p8 }
  0x4f   : > { %p621_p10 = pnand %p620_p7, %p614_p0 }
  0x51   : > { %624 = shalt.err (!%p621_p10)
}
  0x52   : > { %483 = dma.hbm_to_vmem [thread:$0]  (!%p814_p11), %s1040_s3, 16, %s820_s30, [#allocation9]  }
  0x53   : > { %s895_s10 = sadd.s32 1, %s729_s18   ;;  %s29_s25 = sadd.s32 1, %s725_s17 }
  0x54   : > { %s26_s28 = ssub.s32 %s729_s18, %s895_s10  ;;  %p36_p9 = scmp.ne.s32.totalorder %s725_s17, %s721_s16 }
  0x55   : > { %p27_p13 = scmp.eq.s32.totalorder %s26_s28, 0  ;;  %p37_p12 = scmp.eq.s32.totalorder %s729_s18, 0 }
  0x56   : > { %p495_p2 = scmp.lt.s32.totalorder %s729_s18, 2  ;;  %p1050_p4 = scmp.eq.s32.totalorder %s786_s19, 1 }
  0x57   : > { %s905_s9 = scalar_select %p27_p13, %s725_s17, %s29_s25  }
  0x58   : > { %p38_p1 = por %p37_p12, %p36_p9  ;;  %p909_p6 = por %p1050_p4, %p36_p9 }
  0x59   : > { %s188_s12 = sand.u32 1, %s725_s17   ;;  %s456_s13 = sshll.u32 %s729_s18, 10 }
  0x5a   : > { %s442_s30 = sshll.u32 %s188_s12, 6  ;;  %s918_s24 = scalar_lea.hbm %s1037_s0, %s456_s13 }
  0x5b   : > { %s192_s26 = scalar_lea.vmem [#allocation2], %s442_s30  ;;  %p920_p11 = pnand %p495_p2, %p38_p1 }
  0x5c   : > { %s199_s29 = sshll.u32 %s192_s26, 4  ;;  %s926_s27 = scalar_lea.sflag [#allocation3], %s188_s12  ;;  %s924_s29 = int_to_ptr.vmem [resolvable:$true] %s199_s29 }
  0x5d   : > { %s625_s6 = scalar_lea.hbm %s918_s24, 1024  ;;  %p627_p0 = pneg %p920_p11 }
  0x5e   : > { %p626_p8 = scmp.ne.s32.totalorder %s918_s24, %s625_s6  ;;  %s630_s28 = scalar_lea.hbm %s1037_s0, 2048 }
  0x5f   : > { %p631_p7 = scmp.lt.u32.totalorder %s918_s24, %s1037_s0  ;;  %p632_p10 = scmp.lt.u32.totalorder %s630_s28, %s625_s6 }
  0x60   : > { %p628_p3 = pnand %p627_p0, %p626_p8  ;;  %p634_p9 = scmp.lt.u32.totalorder %s625_s6, %s918_s24 }
  0x61   : > { %p633_p13 = por %p632_p10, %p631_p7 }
  0x62   : > { %p629_p5 = pneg %p628_p3 }
  0x63   : > { %p635_p12 = por %p634_p9, %p633_p13 }
  0x65   : > { %p636_p2 = pnand %p635_p12, %p629_p5 }
  0x67   : > { %639 = shalt.err (!%p636_p2)
}
  0x68   : > { %s640_s12 = scalar_lea.vmem %s924_s29, 1024  ;;  %s734_s30 = smov [#allocation2]  }
  0x69   : > { %p641_p1 = scmp.ne.s32.totalorder %s924_s29, %s640_s12  ;;  %s645_s14 = sshll.u32 %s734_s30, 4  ;;  %s646_s14 = int_to_ptr.vmem [resolvable:$false] %s645_s14 }
  0x6a   : > { %s647_s20 = scalar_lea.vmem %s646_s14, 2048  ;;  %p648_p3 = scmp.lt.s32.totalorder %s924_s29, %s646_s14 }
  0x6b   : > { %p643_p4 = pnand %p641_p1, %p627_p0  ;;  %p649_p7 = scmp.lt.s32.totalorder %s647_s20, %s640_s12 }
  0x6d   : > { %p644_p8 = pneg %p643_p4  ;;  %p650_p10 = por %p649_p7, %p648_p3 }
  0x6f   : > { %p651_p13 = pnand %p650_p10, %p644_p8 }
  0x71   : > { %654 = shalt.err (!%p651_p13)
}
  0x72   : > { %s735_s26 = smov 128   ;;  %s736_s6 = smov 8  }
  0x73   : > { %487 = dma.hbm_to_vmem [thread:$0]  (!%p920_p11), %s918_s24, 1024, %s924_s29, %s926_s27, %s735_s26, %s735_s26, %s736_s6  }
  0x74   : > { %p1053_p0 = scmp.ne.s32.totalorder %s1047_s23, 0 }
  0x75   : > { %s957_s7 = sand.u32 (!%p1053_p0), 1, %s721_s16   ;;  %p1054_p5 = scmp.ne.s32.totalorder (!%p1053_p0), %s1045_s21, 0 }
  0x76   : > { %211 = sbr.rel (%p1053_p0) target bundleno = 185 (0xb9), region = 36  ;;  %s446_s8 = sshll.u32 (!%p1053_p0), %s957_s7, 6 }
  0x77   : > { %s214_s28 = scalar_lea.sflag (!%p1053_p0), [#allocation3], %s957_s7  ;;  %s963_s25 = scalar_lea.vmem (!%p1053_p0), [#allocation2], %s446_s8 }
  0x7d   : > { %700 = dma.done.wait (%p1054_p5), %s214_s28, 1024  }
  0x7e   : > { %702 = vsyncadd (%p1054_p5), %s214_s28, 4294966272  ;;  %p1055_p11 = scmp.eq.s32.totalorder %s786_s19, 0 }
  0x80   : > { %704 = dma.done.wait (%p1055_p11), [#allocation6], 144   ;;  %p1056_p9 = pmov %p1055_p11 }
  0x82   : > { %706 = vsyncadd (%p1056_p9), [#allocation6], 4294967152  ;;  %p1057_p12 = pmov %p1056_p9 }
  0x83   : > { %p1058_p2 = pmov %p1056_p9 }
  0x84   : > { %708 = dma.done.wait (%p1057_p12), [#allocation9], 16  }
  0x85   : > { %710 = vsyncadd (%p1058_p2), [#allocation9], 4294967280  ;;  %v264_v0 = vld [vmem:[#allocation5] sm:$0x1]  ;;  %v266_v1 = vld [vmem:[#allocation5 + $0x1] sm:$0x1]  ;;  %v278_v8 = vlaneseq }
  0x86   : > { %v265_v2 = vmul.f32 0.0078125, %v264_v0  ;;  %v267_v3 = vmul.f32 0.0078125, %v266_v1  ;;  %v273_v10 = vld [vmem:[#allocation7] sm:$0x1]  ;;  %v256_v13 = vld [vmem:[%s963_s25] sm:$0xff]  ;;  %v258_v17 = vld [vmem:[%s963_s25 + $0x10] sm:$0xff] }
  0x87   : > { %v279_v9 = vshrl.u32 %v278_v8, 7  ;;  %v275_v15 = vld [vmem:[#allocation8] sm:$0x1]  ;;  %v259_v18 = vld [vmem:[%s963_s25 + $0x18] sm:$0xff]  ;;  %v260_v21 = vld [vmem:[%s963_s25 + $0x20] sm:$0xff]  ;;  %s253_s21 = scalar_lea.vmem [#allocation10], %s446_s8 }
  0x88   : > { %v268_v4 = vmul.f32 %v265_v2, %v265_v2  ;;  %v257_v16 = vld [vmem:[%s963_s25 + $0x8] sm:$0xff]  ;;  %v262_v23 = vld [vmem:[%s963_s25 + $0x30] sm:$0xff]  ;;  %v263_v24 = vld [vmem:[%s963_s25 + $0x38] sm:$0xff]  ;;  %s334_s23 = sshll.u32 %s253_s21, 4  ;;  %s457_s24 = sshll.u32 %s786_s19, 10  ;;  %s988_s23 = int_to_ptr.vmem [resolvable:$true] %s334_s23 }
  0x89   : > { %v280_v11 = vsub.s32 0, %v279_v9  ;;  %v261_v22 = vld [vmem:[%s963_s25 + $0x28] sm:$0xff]  ;;  %s993_s19 = scalar_lea.hbm %s1041_s4, %s457_s24  ;;  %s321_s27 = scalar_lea.sflag [#allocation4], %s957_s7 }
  0x8a   : > { %v269_v5 = vsub.f32 %v267_v3, %v268_v4  ;;  %s655_s13 = scalar_lea.vmem %s988_s23, 1024  ;;  %s737_s12 = smov [#allocation10]  }
  0x8b   : > { %p656_p1 = scmp.ne.s32.totalorder %s988_s23, %s655_s13  ;;  %s659_s30 = sshll.u32 %s737_s12, 4  ;;  %s660_s30 = int_to_ptr.vmem [resolvable:$false] %s659_s30 }
  0x8c   : > { %v270_v6 = vmax.f32 %v269_v5, 0.0  ;;  %s661_s14 = scalar_lea.vmem %s660_s30, 2048  ;;  %p662_p3 = scmp.lt.s32.totalorder %s988_s23, %s660_s30 }
  0x8d   : > { %p657_p4 = pnand %p656_p1, %p909_p6  ;;  %p663_p7 = scmp.lt.s32.totalorder %s661_s14, %s655_s13 }
  0x8e   : > { %v271_v7 = vadd.f32 1e-05, %v270_v6 }
  0x8f   : > { %p658_p8 = pneg %p657_p4  ;;  %p664_p10 = por %p663_p7, %p662_p3 }
  0x90   : > { %539 = vrsqrt.f32 %v271_v7 }
  0x91   : > { %p665_p13 = pnand %p664_p10, %p658_p8 }
  0x9a   : > { %v540_v12 = vpop.eup %539 }
  0x9b   : > { %v274_v14 = vmul.f32 %v540_v12, %v273_v10 }
  0x9d   : > { %v276_v19 = vmul.f32 %v274_v14, %v265_v2  ;;  %v281_v20 = vrot.slane %v274_v14, %v280_v11 }
  0x9f   : > { %v277_v25 = vsub.f32 %v275_v15, %v276_v19  ;;  %v282_v26 = vmul.f32 %v281_v20, %v256_v13  ;;  %v283_v27 = vmul.f32 %v281_v20, %v257_v16  ;;  %v284_v28 = vmul.f32 %v281_v20, %v258_v17 }
  0xa0   : > { %v285_v29 = vmul.f32 %v281_v20, %v259_v18  ;;  %v286_v30 = vmul.f32 %v281_v20, %v260_v21  ;;  %v287_v31 = vmul.f32 %v281_v20, %v261_v22  ;;  %v288_v32 = vmul.f32 %v281_v20, %v262_v23 }
  0xa1   : > { %v294_v33 = vrot.slane %v277_v25, %v280_v11  ;;  %v289_v34 = vmul.f32 %v281_v20, %v263_v24 }
  0xa3   : > { %v296_v35 = vadd.f32 %v294_v33, %v282_v26  ;;  %v297_v36 = vadd.f32 %v294_v33, %v283_v27  ;;  %v298_v37 = vadd.f32 %v294_v33, %v284_v28  ;;  %v299_v38 = vadd.f32 %v294_v33, %v285_v29 }
  0xa4   : > { %v300_v39 = vadd.f32 %v294_v33, %v286_v30  ;;  %v301_v40 = vadd.f32 %v294_v33, %v287_v31  ;;  %v302_v41 = vadd.f32 %v294_v33, %v288_v32  ;;  %v303_v42 = vadd.f32 %v294_v33, %v289_v34 }
  0xa5   : > { %v304_v43 = vmax.f32 %v296_v35, 0.0  ;;  %v305_v44 = vmax.f32 %v297_v36, 0.0  ;;  %v306_v45 = vmax.f32 %v298_v37, 0.0  ;;  %v307_v46 = vmax.f32 %v299_v38, 0.0 }
  0xa6   : > { %v308_v47 = vmax.f32 %v300_v39, 0.0  ;;  %v309_v48 = vmax.f32 %v301_v40, 0.0  ;;  %v310_v49 = vmax.f32 %v302_v41, 0.0  ;;  %v311_v50 = vmax.f32 %v303_v42, 0.0 }
  0xa7   : > { %312 = vst [vmem:[%s253_s21] sm:$0xff] %v304_v43  ;;  %313 = vst [vmem:[%s253_s21 + $0x8] sm:$0xff] %v305_v44 }
  0xa8   : > { %314 = vst [vmem:[%s253_s21 + $0x10] sm:$0xff] %v306_v45  ;;  %315 = vst [vmem:[%s253_s21 + $0x18] sm:$0xff] %v307_v46 }
  0xa9   : > { %316 = vst [vmem:[%s253_s21 + $0x20] sm:$0xff] %v308_v47  ;;  %317 = vst [vmem:[%s253_s21 + $0x28] sm:$0xff] %v309_v48 }
  0xaa   : > { %318 = vst [vmem:[%s253_s21 + $0x30] sm:$0xff] %v310_v49  ;;  %319 = vst [vmem:[%s253_s21 + $0x38] sm:$0xff] %v311_v50 }
  0xab   : > { %668 = shalt.err (!%p665_p13)
}
  0xac   : > { %s669_s20 = scalar_lea.hbm %s993_s19, 1024  ;;  %s673_s8 = scalar_lea.hbm %s1041_s4, 2048 }
  0xad   : > { %p670_p0 = scmp.ne.s32.totalorder %s993_s19, %s669_s20  ;;  %p674_p9 = scmp.lt.u32.totalorder %s993_s19, %s1041_s4 }
  0xae   : > { %p675_p12 = scmp.lt.u32.totalorder %s673_s8, %s669_s20  ;;  %p677_p1 = scmp.lt.u32.totalorder %s669_s20, %s993_s19 }
  0xaf   : > { %p671_p5 = pnand %p670_p0, %p909_p6 }
  0xb0   : > { %p676_p2 = por %p675_p12, %p674_p9 }
  0xb1   : > { %p672_p11 = pneg %p671_p5 }
  0xb2   : > { %p678_p4 = por %p677_p1, %p676_p2 }
  0xb4   : > { %p679_p8 = pnand %p678_p4, %p672_p11 }
  0xb6   : > { %682 = shalt.err (!%p679_p8)
}
  0xb7   : > { %s738_s21 = smov 128   ;;  %s739_s24 = smov 8  }
  0xb8   : > { %472 = dma.vmem_to_hbm [thread:$0]  (%p909_p6), %s988_s23, 1024, %s993_s19, %s321_s27, %s738_s21, %s738_s21, %s739_s24  }
  0xb9 PF: > { %s349_s29 = sand.u32 1, %s717_s15   ;;  %p1059_p3 = scmp.ne.s32.totalorder %s1046_s22, 0 }
  0xba   : > { %p1060_p7 = scmp.ge.s32.totalorder %s729_s18, 2  ;;  %s350_s5 = scalar_lea.sflag [#allocation4], %s349_s29 }
  0xbc   : > { %p489_p10 = pnand %p1060_p7, %p1059_p3 }
  0xbe   : > { %712 = dma.done.wait (!%p489_p10), %s350_s5, 1024  }
  0xbf   : > { %714 = vsyncadd (!%p489_p10), %s350_s5, 4294966272  ;;  %p19_p13 = scmp.ge.s32.totalorder %s895_s10, 4   ;;  %s1061_s15 = smov %s721_s16 }
  0xc0   : > { %s1062_s16 = smov %s725_s17  ;;  %s1063_s17 = smov %s905_s9 }
  0xc1   : > { %s1064_s18 = smov %s895_s10  ;;  %21 = sbr.rel (!%p19_p13) target bundleno = 7 (0x7), region = 93 }
  0xc8   :  { %355 = vsyncpa [#allocation3], 1 }
  0xc9   :  { %357 = vsyncpa [#allocation3 + $0x1], 1 }
  0xca   :  { %358 = vsyncpa [#allocation6], 1 }
  0xcb   :  { %359 = vsyncpa [#allocation9], 1 }
  0xcc   :  { %360 = vsyncpa [#allocation4], 1 }
  0xcd   :  { %362 = vsyncpa [#allocation4 + $0x1], 1 }

// kernel: basic_block_forward.8
= control target key start
LH: loop header
LB: loop body
LE: loop exit
PB: predicated region body
PF: predicated region fallthrough
CT: control target
= control target key end

     0   :  { %9 = vsyncpa [#allocation3], 0  ;;  %s1092_s0 = inlined_call_operand.hbm [shape: bf16[128,36], index: 0, kind: input, shape index: {}]   ;;  %s1093_s1 = inlined_call_operand.hbm [shape: bf16[36,128], index: 1, kind: input, shape index: {}]   ;;  %s1094_s2 = inlined_call_operand.hbm [shape: f32[128,128], index: 2, kind: output, shape index: {0}]   ;;  %s1095_s3 = inlined_call_operand.hbm [shape: f32[8,128], index: 3, kind: output, shape index: {1}]  }
   0x1   :  { %11 = vsyncpa [#allocation3 + $0x1], 0 }
   0x2   :  { %12 = vsyncpa [#allocation6], 0 }
   0x3   :  { %13 = vsyncpa [#allocation4], 0 }
   0x4   :  { %15 = vsyncpa [#allocation4 + $0x1], 0 }
   0x5   :  { %16 = vsyncpa [#allocation9], 0  ;;  %s834_s12 = smov 0   ;;  %s836_s13 = smov 0  }
   0x6   :  { %s838_s14 = smov 0   ;;  %s840_s15 = smov 0  }
   0x7 LB: > { %s855_s16 = sadd.s32 4294967295, %s803_s15   ;;  %s508_s17 = sadd.s32 4294967294, %s803_s15   ;;  %s803_s15 = sphi %s840_s15, %s1121_s15   ;;  %s799_s14 = sphi %s838_s14, %s1120_s14   ;;  %s795_s13 = sphi %s836_s13, %s1119_s13   ;;  %s791_s12 = sphi %s834_s12, %s1118_s12  }
   0x8   : > { %p42_p0 = scmp.ne.s32.totalorder %s795_s13, %s791_s12  ;;  %p1096_p1 = scmp.eq.s32.totalorder %s855_s16, 0 }
   0x9   : > { %p93_p3 = scmp.eq.s32.totalorder %s508_s17, 1  ;;  %p509_p5 = scmp.ge.s32.totalorder %s803_s15, 1 }
   0xa   : > { %p864_p4 = por %p1096_p1, %p42_p0  ;;  %p121_p7 = scmp.lt.s32.totalorder %s803_s15, 3 }
   0xb   : > { %p869_p6 = por %p93_p3, %p42_p0  ;;  %s805_s21 = smov [#allocation5]  }
   0xc   : > { %s1099_s18 = scalar_select %p864_p4, 1, 0 }
   0xd   : > { %s1100_s19 = scalar_select %p869_p6, 1, 0 }
   0xe   : > { %p875_p9 = pnand %p509_p5, %p121_p7  ;;  %s133_s22 = sshll.u32 %s805_s21, 4  ;;  %s879_s22 = int_to_ptr.vmem [resolvable:$true] %s133_s22 }
   0xf   : > { %s891_s24 = sadd.s32 1, %s803_s15   ;;  %s29_s25 = sadd.s32 1, %s799_s14 }
  0x10   : > { %s1101_s20 = scalar_select %p875_p9, 1, 0 }
  0x11   : > { %p581_p10 = pneg %p875_p9  ;;  %s26_s26 = ssub.s32 %s803_s15, %s891_s24 }
  0x12   : > { %s645_s29 = scalar_lea.hbm %s1093_s1, 320 }
  0x13   : > { %p886_p12 = pnand %p581_p10, %p1096_p1  ;;  %p646_p13 = scmp.ne.s32.totalorder %s1093_s1, %s645_s29 }
  0x14   : > { %p652_p7 = scmp.lt.u32.totalorder %s645_s29, %s1093_s1 }
  0x15   : > { %p647_p0 = pneg %p886_p12 }
  0x17   : > { %p648_p3 = pnand %p647_p0, %p646_p13 }
  0x19   : > { %p649_p5 = pneg %p648_p3 }
  0x1b   : > { %p654_p10 = pnand %p652_p7, %p649_p5 }
  0x1d   : > { %657 = shalt.err (!%p654_p10)
}
  0x1e   : > { %s658_s7 = scalar_lea.vmem %s879_s22, 320  ;;  %p666_p2 = scmp.lt.s32.totalorder %s879_s22, %s879_s22 }
  0x1f   : > { %p659_p11 = scmp.ne.s32.totalorder %s879_s22, %s658_s7  ;;  %p667_p6 = scmp.lt.s32.totalorder %s658_s7, %s658_s7 }
  0x21   : > { %p661_p8 = pnand %p659_p11, %p647_p0  ;;  %p668_p4 = por %p667_p6, %p666_p2 }
  0x23   : > { %p662_p1 = pneg %p661_p8 }
  0x25   : > { %p669_p9 = pnand %p668_p4, %p662_p1 }
  0x27   : > { %672 = shalt.err (!%p669_p9)
}
  0x28   : > { %s806_s8 = smov 64   ;;  %s807_s9 = smov 4  }
  0x29   : > { %584 = dma.hbm_to_vmem [thread:$0]  (!%p886_p12), %s1093_s1, 320, %s879_s22, [#allocation6], %s806_s8, %s806_s8, %s807_s9  }
  0x2a   : > { %p27_p1 = scmp.eq.s32.totalorder %s26_s26, 0  ;;  %p36_p2 = scmp.ne.s32.totalorder %s799_s14, %s795_s13 }
  0x2b   : > { %p37_p4 = scmp.eq.s32.totalorder %s803_s15, 0  ;;  %p594_p6 = scmp.lt.s32.totalorder %s803_s15, 2 }
  0x2c   : > { %s925_s17 = scalar_select %p27_p1, %s799_s14, %s29_s25  }
  0x2d   : > { %p38_p8 = por %p37_p4, %p36_p2  ;;  %p1103_p9 = scmp.eq.s32.totalorder %s855_s16, 1 }
  0x2e   : > { %s147_s23 = sand.u32 1, %s799_s14   ;;  %s538_s27 = sshll.u32 %s803_s15, 9 }
  0x2f   : > { %p929_p11 = por %p1103_p9, %p36_p2  ;;  %s512_s28 = sshll.u32 %s147_s23, 5 }
  0x30   : > { %s938_s4 = scalar_lea.hbm %s1092_s0, %s538_s27  ;;  %s151_s22 = scalar_lea.vmem [#allocation2], %s512_s28 }
  0x31   : > { %s158_s25 = sshll.u32 %s151_s22, 4  ;;  %p940_p12 = pnand %p594_p6, %p38_p8  ;;  %s944_s25 = int_to_ptr.vmem [resolvable:$true] %s158_s25 }
  0x32   : > { %s946_s5 = scalar_lea.sflag [#allocation3], %s147_s23  ;;  %s673_s6 = scalar_lea.hbm %s938_s4, 512 }
  0x33   : > { %p674_p13 = scmp.ne.s32.totalorder %s938_s4, %s673_s6  ;;  %p675_p0 = pneg %p940_p12 }
  0x34   : > { %s678_s11 = scalar_lea.hbm %s1092_s0, 1024  ;;  %p679_p7 = scmp.lt.u32.totalorder %s938_s4, %s1092_s0 }
  0x35   : > { %p676_p3 = pnand %p675_p0, %p674_p13  ;;  %p680_p10 = scmp.lt.u32.totalorder %s678_s11, %s673_s6 }
  0x36   : > { %p682_p2 = scmp.lt.u32.totalorder %s673_s6, %s938_s4 }
  0x37   : > { %p677_p5 = pneg %p676_p3  ;;  %p681_p1 = por %p680_p10, %p679_p7 }
  0x39   : > { %p683_p4 = por %p682_p2, %p681_p1 }
  0x3b   : > { %p684_p6 = pnand %p683_p4, %p677_p5 }
  0x3d   : > { %687 = shalt.err (!%p684_p6)
}
  0x3e   : > { %s688_s23 = scalar_lea.vmem %s944_s25, 512  ;;  %s808_s29 = smov [#allocation2]  }
  0x3f   : > { %p689_p8 = scmp.ne.s32.totalorder %s944_s25, %s688_s23  ;;  %s693_s30 = sshll.u32 %s808_s29, 4  ;;  %s694_s30 = int_to_ptr.vmem [resolvable:$false] %s693_s30 }
  0x40   : > { %s695_s22 = scalar_lea.vmem %s694_s30, 1024  ;;  %p696_p3 = scmp.lt.s32.totalorder %s944_s25, %s694_s30 }
  0x41   : > { %p691_p9 = pnand %p689_p8, %p675_p0  ;;  %p697_p7 = scmp.lt.s32.totalorder %s695_s22, %s688_s23 }
  0x43   : > { %p692_p13 = pneg %p691_p9  ;;  %p698_p10 = por %p697_p7, %p696_p3 }
  0x45   : > { %p699_p1 = pnand %p698_p10, %p692_p13 }
  0x47   : > { %702 = shalt.err (!%p699_p1)
}
  0x48   : > { %588 = dma.hbm_to_vmem [thread:$0]  (!%p940_p12), %s938_s4, 512, %s944_s25, %s946_s5, %s806_s8, %s806_s8, %s807_s9  }
  0x49   : > { %p1106_p0 = scmp.ne.s32.totalorder %s1101_s20, 0 }
  0x4a   : > { %s980_s6 = sand.u32 (!%p1106_p0), 1, %s795_s13   ;;  %p1107_p5 = scmp.ne.s32.totalorder (!%p1106_p0), %s1099_s18, 0 }
  0x4b   : > { %170 = sbr.rel (%p1106_p0) target bundleno = 384 (0x180), region = 28  ;;  %s516_s7 = sshll.u32 (!%p1106_p0), %s980_s6, 5 }
  0x4c   : > { %s173_s10 = scalar_lea.sflag (!%p1106_p0), [#allocation3], %s980_s6  ;;  %s984_s11 = scalar_lea.vmem (!%p1106_p0), [#allocation2], %s516_s7 }
  0x52   : > { %774 = dma.done.wait (%p1107_p5), %s173_s10, 512  }
  0x53   : > { %776 = vsyncadd (%p1107_p5), %s173_s10, 4294966784  ;;  %p1108_p12 = scmp.eq.s32.totalorder %s855_s16, 0 }
  0x55   : > { %778 = dma.done.wait (%p1108_p12), [#allocation6], 320   ;;  %p1109_p2 = pmov %p1108_p12 }
  0x56   : > { %s518_s20 = sshll.u32 %s980_s6, 6  ;;  %p1110_p4 = scmp.ne.s32.totalorder %s855_s16, 0 }
  0x57   : > { %780 = vsyncadd (%p1109_p2), [#allocation6], 4294966976  ;;  %s995_s8 = scalar_lea.vmem [#allocation7], %s518_s20  ;;  %v809_v0 = vmov (!%p1110_p4), 0.0  }
  0x58   : > { %209 = sbr.rel (%p1110_p4) target bundleno = 95 (0x5f), region = 40  ;;  %210 = vst [vmem:[#allocation8] sm:$0xff] (!%p1110_p4), %v809_v0 }
  0x5f PF: > { %v638_v1 = vld [vmem:[#allocation5] sm:$0xff]   ;;  %v639_v2 = vld [vmem:[#allocation5 + $0x8] sm:$0xff]   ;;  %vm259_vm0 = vcmask 293888   ;;  %v640_v3 = vld [vmem:[#allocation5 + $0x10] ss:$0 sps:$4 sm:$0x33]  }
  0x60   : > { %547 = vmatprep.subr.bf16.mxu0 %v638_v1  ;;  %561 = vmatprep.subr.bf16.mxu1 %v638_v1  ;;  %v641_v4 = vld [vmem:[%s984_s11] sm:$0xff]   ;;  %vm272_vm1 = vcmask 1041408   ;;  %v643_v5 = vld [vmem:[%s984_s11 + $0x10] sm:$0xff]   ;;  %v642_v7 = vld [vmem:[%s984_s11 + $0x8] sm:$0xff]   ;;  %s539_s18 = sshll.u32 %s855_s16, 10  ;;  %s403_s9 = sshll.u32 %s995_s8, 4  ;;  %s1019_s9 = int_to_ptr.vmem [resolvable:$true] %s403_s9 }
  0x61   : > { %548 = vmatpush3.bf16.msra.mxu0 %v638_v1  ;;  %564 = vmatpush3.bf16.msra.mxu1 %v638_v1  ;;  %v274_v6 = vsel %vm272_vm1, %v640_v3, 0  ;;  %v644_v8 = vld [vmem:[%s984_s11 + $0x18] sm:$0xff]   ;;  %s1017_s26 = scalar_lea.hbm %s1094_s2, %s539_s18  ;;  %s390_s5 = scalar_lea.sflag [#allocation4], %s980_s6 }
  0x62   : > { %549 = vmatprep.subr.bf16.mxu0 %v639_v2  ;;  %562 = vmatprep.subr.bf16.mxu1 %v639_v2  ;;  %s703_s27 = scalar_lea.vmem %s1019_s9, 1024  ;;  %s810_s28 = smov [#allocation7]  }
  0x63   : > { %553 = vmatprep.mubr.msk.bf16.mxu0 %vm259_vm0, %v641_v4  ;;  %557 = vmatprep.mubr.msk.bf16.mxu1 %vm259_vm0, %v643_v5  ;;  %p704_p6 = scmp.ne.s32.totalorder %s1019_s9, %s703_s27  ;;  %s707_s23 = sshll.u32 %s810_s28, 4  ;;  %s708_s23 = int_to_ptr.vmem [resolvable:$false] %s707_s23 }
  0x64   : > { %s709_s29 = scalar_lea.vmem %s708_s23, 2048  ;;  %p710_p13 = scmp.lt.s32.totalorder %s1019_s9, %s708_s23 }
  0x65   : > { %550 = vmatpush3.bf16.msra.mxu0 %v639_v2  ;;  %565 = vmatpush3.bf16.msra.mxu1 %v639_v2  ;;  %p705_p8 = pnand %p704_p6, %p929_p11  ;;  %p711_p3 = scmp.lt.s32.totalorder %s709_s29, %s703_s27 }
  0x66   : > { %567 = vmatprep.subr.msk.bf16.mxu0 %vm272_vm1, %v640_v3  ;;  %568 = vmatprep.subr.msk.bf16.mxu1 %vm272_vm1, %v640_v3 }
  0x67   : > { %p706_p9 = pneg %p705_p8  ;;  %p712_p7 = por %p711_p3, %p710_p13 }
  0x69   : > { %552 = vmatpush3.bf16.msra.mxu0 %v274_v6  ;;  %566 = vmatpush3.bf16.msra.mxu1 %v274_v6  ;;  %p713_p10 = pnand %p712_p7, %p706_p9 }
  0x6c   : > { %554 = vmatmul.mubr.msk.bf16.vlgmr.msra.gmra.mrb[0].mxu0 %vm259_vm0, %v642_v7  ;;  %558 = vmatmul.mubr.msk.bf16.vlgmr.msra.gmra.mrb[0].mxu1 %vm259_vm0, %v644_v8 }
 0x13f   : > { %v555_v9 = vpop.f32.mrb[0].mxu0  ;;  %v559_v10 = vpop.f32.mrb[0].mxu1 }
 0x140   : > { %343 = vst [vmem:[%s995_s8 + $0x10] sm:$0xff] %v555_v9  ;;  %v310_v11 = vpop.f32.mrb[1].mxu0  ;;  %347 = vst [vmem:[%s995_s8 + $0x30] sm:$0xff] %v559_v10  ;;  %v326_v12 = vpop.f32.mrb[1].mxu1 }
 0x141   : > { %341 = vst [vmem:[%s995_s8] sm:$0xff] %v310_v11  ;;  %v556_v13 = vpop.f32.mrb[2].mxu0  ;;  %345 = vst [vmem:[%s995_s8 + $0x20] sm:$0xff] %v326_v12  ;;  %v560_v14 = vpop.f32.mrb[2].mxu1  ;;  %v362_v17 = vmul.f32 %v310_v11, %v310_v11 }
 0x142   : > { %344 = vst [vmem:[%s995_s8 + $0x18] sm:$0xff] %v556_v13  ;;  %v313_v15 = vpop.f32.mrb[3].mxu0  ;;  %348 = vst [vmem:[%s995_s8 + $0x38] sm:$0xff] %v560_v14  ;;  %v329_v16 = vpop.f32.mrb[3].mxu1 }
 0x143   : > { %342 = vst [vmem:[%s995_s8 + $0x8] sm:$0xff] %v313_v15  ;;  %v349_v18 = vadd.f32 %v313_v15, %v310_v11  ;;  %v363_v19 = vmul.f32 %v313_v15, %v313_v15  ;;  %346 = vst [vmem:[%s995_s8 + $0x28] sm:$0xff] %v329_v16 }
 0x144   : > { %716 = shalt.err (!%p713_p10)
}
 0x145   : > { %s717_s30 = scalar_lea.hbm %s1017_s26, 1024  ;;  %s721_s10 = scalar_lea.hbm %s1094_s2, 2048 }
 0x146   : > { %p718_p1 = scmp.ne.s32.totalorder %s1017_s26, %s717_s30  ;;  %p722_p12 = scmp.lt.u32.totalorder %s1017_s26, %s1094_s2 }
 0x147   : > { %p723_p2 = scmp.lt.u32.totalorder %s721_s10, %s717_s30  ;;  %p725_p6 = scmp.lt.u32.totalorder %s717_s30, %s1017_s26 }
 0x148   : > { %p719_p0 = pnand %p718_p1, %p929_p11 }
 0x149   : > { %p724_p4 = por %p723_p2, %p722_p12 }
 0x14a   : > { %p720_p5 = pneg %p719_p0 }
 0x14b   : > { %p726_p8 = por %p725_p6, %p724_p4 }
 0x14d   : > { %p727_p9 = pnand %p726_p8, %p720_p5 }
 0x14f   : > { %730 = shalt.err (!%p727_p9)
}
 0x150   : > { %s811_s8 = smov 128   ;;  %s812_s18 = smov 8   ;;  %v364_v20 = vmul.f32 %v555_v9, %v555_v9  ;;  %v350_v21 = vadd.f32 %v555_v9, %v349_v18  ;;  %v370_v22 = vadd.f32 %v363_v19, %v362_v17  ;;  %v365_v23 = vmul.f32 %v556_v13, %v556_v13  ;;  %v383_v51 = vld [vmem:[#allocation8] sm:$0xff] }
 0x151   : > { %575 = dma.vmem_to_hbm [thread:$0]  (%p929_p11), %s1019_s9, 1024, %s1017_s26, %s390_s5, %s811_s8, %s811_s8, %s812_s18   ;;  %v366_v26 = vmul.f32 %v326_v12, %v326_v12  ;;  %v367_v31 = vmul.f32 %v329_v16, %v329_v16  ;;  %v368_v32 = vmul.f32 %v559_v10, %v559_v10  ;;  %v369_v35 = vmul.f32 %v560_v14, %v560_v14 }
 0x152   : > { %v371_v24 = vadd.f32 %v370_v22, %v364_v20  ;;  %v351_v25 = vadd.f32 %v556_v13, %v350_v21  ;;  %vm384_vm2 = vcmask 1040384   ;;  %s813_s21 = smov [#allocation8]   ;;  %p1111_p13 = scmp.eq.s32.totalorder %s855_s16, 1 }
 0x153   : > { %s417_s6 = sshll.u32 %s813_s21, 4  ;;  %s418_s6 = int_to_ptr.vmem [resolvable:$true] %s417_s6 }
 0x154   : > { %v352_v27 = vadd.f32 %v351_v25, %v326_v12  ;;  %v372_v28 = vadd.f32 %v371_v24, %v365_v23  ;;  %s731_s9 = scalar_lea.vmem %s418_s6, 128  ;;  %p738_p10 = scmp.lt.s32.totalorder %s418_s6, %s418_s6 }
 0x155   : > { %p732_p11 = scmp.ne.s32.totalorder %s418_s6, %s731_s9  ;;  %p739_p1 = scmp.lt.s32.totalorder %s731_s9, %s731_s9 }
 0x156   : > { %v373_v29 = vadd.f32 %v372_v28, %v366_v26  ;;  %v353_v30 = vadd.f32 %v352_v27, %v329_v16 }
 0x157   : > { %p733_p3 = pnand %p732_p11, %p1111_p13  ;;  %p740_p0 = por %p739_p1, %p738_p10 }
 0x158   : > { %v354_v33 = vadd.f32 %v559_v10, %v353_v30  ;;  %v374_v34 = vadd.f32 %v373_v29, %v367_v31 }
 0x159   : > { %p734_p7 = pneg %p733_p3 }
 0x15a   : > { %v355_v36 = vadd.f32 %v560_v14, %v354_v33  ;;  %v375_v37 = vadd.f32 %v374_v34, %v368_v32 }
 0x15b   : > { %p741_p5 = pnand %p740_p0, %p734_p7 }
 0x15c   : > { %v356_v38 = vrot.slane %v355_v36, 4  ;;  %v376_v39 = vadd.f32 %v375_v37, %v369_v35 }
 0x15e   : > { %v357_v40 = vadd.f32 %v356_v38, %v355_v36  ;;  %v377_v41 = vrot.slane %v376_v39, 4 }
 0x160   : > { %v358_v42 = vrot.slane %v357_v40, 2  ;;  %v378_v43 = vadd.f32 %v377_v41, %v376_v39 }
 0x162   : > { %v359_v44 = vadd.f32 %v358_v42, %v357_v40  ;;  %v379_v45 = vrot.slane %v378_v43, 2 }
 0x164   : > { %v360_v46 = vrot.slane %v359_v44, 1  ;;  %v380_v47 = vadd.f32 %v379_v45, %v378_v43 }
 0x166   : > { %v381_v48 = vrot.slane %v380_v47, 1  ;;  %v361_v49 = vadd.f32 %v360_v46, %v359_v44 }
 0x168   : > { %v382_v50 = vadd.f32 %v381_v48, %v380_v47 }
 0x16a   : > { %v385_v52 = vsel %vm384_vm2, %v361_v49, %v382_v50 }
 0x16b   : > { %v386_v53 = vsel %vm272_vm1, %v385_v52, 0.0 }
 0x16c   : > { %v387_v54 = vadd.f32 %v386_v53, %v383_v51 }
 0x16e   : > { %388 = vst [vmem:[#allocation8] sm:$0xff] %v387_v54 }
 0x16f   : > { %744 = shalt.err (!%p741_p5)
}
 0x170   : > { %s745_s26 = scalar_lea.hbm %s1095_s3, 128  ;;  %p1112_p2 = pmov %p1111_p13 }
 0x171   : > { %p746_p12 = scmp.ne.s32.totalorder %s1095_s3, %s745_s26  ;;  %p751_p8 = scmp.lt.u32.totalorder %s745_s26, %s1095_s3 }
 0x173   : > { %p747_p4 = pnand %p746_p12, %p1112_p2 }
 0x175   : > { %p748_p6 = pneg %p747_p4 }
 0x177   : > { %p753_p9 = pnand %p751_p8, %p748_p6 }
 0x179   : > { %756 = shalt.err (!%p753_p9)
}
 0x17a   : > { %p1113_p11 = pmov %p1112_p2  ;;  %p1114_p13 = pmov %p1112_p2 }
 0x17c   : > { %577 = dma.vmem_to_hbm [thread:$0]  (%p1113_p11), %s418_s6, 128, %s1095_s3, [#allocation9]  }
 0x17d   : > { %782 = dma.done.wait (%p1114_p13), [#allocation9], 128   ;;  %p1115_p3 = pmov %p1112_p2 }
 0x17f   : > { %784 = vsyncadd (%p1115_p3), [#allocation9], 4294967168 }
 0x180 PF: > { %s433_s22 = sand.u32 1, %s791_s12   ;;  %p1116_p7 = scmp.ne.s32.totalorder %s1100_s19, 0 }
 0x181   : > { %p1117_p10 = scmp.ge.s32.totalorder %s803_s15, 2  ;;  %s434_s7 = scalar_lea.sflag [#allocation4], %s433_s22 }
 0x183   : > { %p590_p1 = pnand %p1117_p10, %p1116_p7 }
 0x185   : > { %786 = dma.done.wait (!%p590_p1), %s434_s7, 1024  }
 0x186   : > { %788 = vsyncadd (!%p590_p1), %s434_s7, 4294966272  ;;  %p19_p0 = scmp.ge.s32.totalorder %s891_s24, 4   ;;  %s1118_s12 = smov %s795_s13 }
 0x187   : > { %s1119_s13 = smov %s799_s14  ;;  %s1120_s14 = smov %s925_s17 }
 0x188   : > { %s1121_s15 = smov %s891_s24  ;;  %21 = sbr.rel (!%p19_p0) target bundleno = 7 (0x7), region = 89 }
 0x18f   :  { %439 = vsyncpa [#allocation3], 1 }
 0x190   :  { %441 = vsyncpa [#allocation3 + $0x1], 1 }
 0x191   :  { %442 = vsyncpa [#allocation6], 1 }
 0x192   :  { %443 = vsyncpa [#allocation4], 1 }
 0x193   :  { %445 = vsyncpa [#allocation4 + $0x1], 1 }
 0x194   :  { %446 = vsyncpa [#allocation9], 1 }

// kernel: basic_block_forward.10
= control target key start
LH: loop header
LB: loop body
LE: loop exit
PB: predicated region body
PF: predicated region fallthrough
CT: control target
= control target key end

     0   :  { %9 = vsyncpa [#allocation3], 0  ;;  %s1119_s0 = inlined_call_operand.hbm [shape: bf16[128,72], index: 0, kind: input, shape index: {}]   ;;  %s1120_s1 = inlined_call_operand.hbm [shape: bf16[72,128], index: 1, kind: input, shape index: {}]   ;;  %s1121_s2 = inlined_call_operand.hbm [shape: f32[128,128], index: 2, kind: output, shape index: {0}]   ;;  %s1122_s3 = inlined_call_operand.hbm [shape: f32[8,128], index: 3, kind: output, shape index: {1}]  }
   0x1   :  { %11 = vsyncpa [#allocation3 + $0x1], 0 }
   0x2   :  { %12 = vsyncpa [#allocation6], 0 }
   0x3   :  { %13 = vsyncpa [#allocation4], 0 }
   0x4   :  { %15 = vsyncpa [#allocation4 + $0x1], 0 }
   0x5   :  { %16 = vsyncpa [#allocation9], 0  ;;  %s865_s12 = smov 0   ;;  %s867_s13 = smov 0  }
   0x6   :  { %s869_s14 = smov 0   ;;  %s871_s15 = smov 0  }
   0x7 LB: > { %s886_s16 = sadd.s32 4294967295, %s834_s15   ;;  %s525_s17 = sadd.s32 4294967294, %s834_s15   ;;  %s834_s15 = sphi %s871_s15, %s1148_s15   ;;  %s830_s14 = sphi %s869_s14, %s1147_s14   ;;  %s826_s13 = sphi %s867_s13, %s1146_s13   ;;  %s822_s12 = sphi %s865_s12, %s1145_s12  }
   0x8   : > { %p42_p0 = scmp.ne.s32.totalorder %s826_s13, %s822_s12  ;;  %p1123_p1 = scmp.eq.s32.totalorder %s886_s16, 0 }
   0x9   : > { %p93_p3 = scmp.eq.s32.totalorder %s525_s17, 1  ;;  %p526_p5 = scmp.ge.s32.totalorder %s834_s15, 1 }
   0xa   : > { %p895_p4 = por %p1123_p1, %p42_p0  ;;  %p121_p7 = scmp.lt.s32.totalorder %s834_s15, 3 }
   0xb   : > { %p900_p6 = por %p93_p3, %p42_p0  ;;  %s836_s21 = smov [#allocation5]  }
   0xc   : > { %s1126_s18 = scalar_select %p895_p4, 1, 0 }
   0xd   : > { %s1127_s19 = scalar_select %p900_p6, 1, 0 }
   0xe   : > { %p906_p9 = pnand %p526_p5, %p121_p7  ;;  %s133_s22 = sshll.u32 %s836_s21, 4  ;;  %s910_s22 = int_to_ptr.vmem [resolvable:$true] %s133_s22 }
   0xf   : > { %s922_s24 = sadd.s32 1, %s834_s15   ;;  %s29_s25 = sadd.s32 1, %s830_s14 }
  0x10   : > { %s1128_s20 = scalar_select %p906_p9, 1, 0 }
  0x11   : > { %p610_p10 = pneg %p906_p9  ;;  %s26_s26 = ssub.s32 %s834_s15, %s922_s24 }
  0x12   : > { %s676_s29 = scalar_lea.hbm %s1120_s1, 576 }
  0x13   : > { %p917_p12 = pnand %p610_p10, %p1123_p1  ;;  %p677_p13 = scmp.ne.s32.totalorder %s1120_s1, %s676_s29 }
  0x14   : > { %p683_p7 = scmp.lt.u32.totalorder %s676_s29, %s1120_s1 }
  0x15   : > { %p678_p0 = pneg %p917_p12 }
  0x17   : > { %p679_p3 = pnand %p678_p0, %p677_p13 }
  0x19   : > { %p680_p5 = pneg %p679_p3 }
  0x1b   : > { %p685_p10 = pnand %p683_p7, %p680_p5 }
  0x1d   : > { %688 = shalt.err (!%p685_p10)
}
  0x1e   : > { %s689_s7 = scalar_lea.vmem %s910_s22, 576  ;;  %p697_p2 = scmp.lt.s32.totalorder %s910_s22, %s910_s22 }
  0x1f   : > { %p690_p11 = scmp.ne.s32.totalorder %s910_s22, %s689_s7  ;;  %p698_p6 = scmp.lt.s32.totalorder %s689_s7, %s689_s7 }
  0x21   : > { %p692_p8 = pnand %p690_p11, %p678_p0  ;;  %p699_p4 = por %p698_p6, %p697_p2 }
  0x23   : > { %p693_p1 = pneg %p692_p8 }
  0x25   : > { %p700_p9 = pnand %p699_p4, %p693_p1 }
  0x27   : > { %703 = shalt.err (!%p700_p9)
}
  0x28   : > { %s837_s8 = smov 64   ;;  %s838_s9 = smov 4  }
  0x29   : > { %613 = dma.hbm_to_vmem [thread:$0]  (!%p917_p12), %s1120_s1, 576, %s910_s22, [#allocation6], %s837_s8, %s837_s8, %s838_s9  }
  0x2a   : > { %p27_p1 = scmp.eq.s32.totalorder %s26_s26, 0  ;;  %p36_p2 = scmp.ne.s32.totalorder %s830_s14, %s826_s13 }
  0x2b   : > { %p37_p4 = scmp.eq.s32.totalorder %s834_s15, 0  ;;  %p623_p6 = scmp.lt.s32.totalorder %s834_s15, 2 }
  0x2c   : > { %s956_s17 = scalar_select %p27_p1, %s830_s14, %s29_s25  }
  0x2d   : > { %p38_p8 = por %p37_p4, %p36_p2  ;;  %p1130_p9 = scmp.eq.s32.totalorder %s886_s16, 1 }
  0x2e   : > { %s147_s23 = sand.u32 1, %s830_s14   ;;  %s557_s27 = sshll.u32 %s834_s15, 9 }
  0x2f   : > { %p960_p11 = por %p1130_p9, %p36_p2  ;;  %s529_s28 = sshll.u32 %s147_s23, 5 }
  0x30   : > { %s969_s4 = scalar_lea.hbm %s1119_s0, %s557_s27  ;;  %s151_s22 = scalar_lea.vmem [#allocation2], %s529_s28 }
  0x31   : > { %s158_s25 = sshll.u32 %s151_s22, 4  ;;  %p971_p12 = pnand %p623_p6, %p38_p8  ;;  %s975_s25 = int_to_ptr.vmem [resolvable:$true] %s158_s25 }
  0x32   : > { %s977_s5 = scalar_lea.sflag [#allocation3], %s147_s23  ;;  %s704_s6 = scalar_lea.hbm %s969_s4, 512 }
  0x33   : > { %p705_p13 = scmp.ne.s32.totalorder %s969_s4, %s704_s6  ;;  %p706_p0 = pneg %p971_p12 }
  0x34   : > { %s709_s11 = scalar_lea.hbm %s1119_s0, 1024  ;;  %p710_p7 = scmp.lt.u32.totalorder %s969_s4, %s1119_s0 }
  0x35   : > { %p707_p3 = pnand %p706_p0, %p705_p13  ;;  %p711_p10 = scmp.lt.u32.totalorder %s709_s11, %s704_s6 }
  0x36   : > { %p713_p2 = scmp.lt.u32.totalorder %s704_s6, %s969_s4 }
  0x37   : > { %p708_p5 = pneg %p707_p3  ;;  %p712_p1 = por %p711_p10, %p710_p7 }
  0x39   : > { %p714_p4 = por %p713_p2, %p712_p1 }
  0x3b   : > { %p715_p6 = pnand %p714_p4, %p708_p5 }
  0x3d   : > { %718 = shalt.err (!%p715_p6)
}
  0x3e   : > { %s719_s23 = scalar_lea.vmem %s975_s25, 512  ;;  %s839_s29 = smov [#allocation2]  }
  0x3f   : > { %p720_p8 = scmp.ne.s32.totalorder %s975_s25, %s719_s23  ;;  %s724_s30 = sshll.u32 %s839_s29, 4  ;;  %s725_s30 = int_to_ptr.vmem [resolvable:$false] %s724_s30 }
  0x40   : > { %s726_s22 = scalar_lea.vmem %s725_s30, 1024  ;;  %p727_p3 = scmp.lt.s32.totalorder %s975_s25, %s725_s30 }
  0x41   : > { %p722_p9 = pnand %p720_p8, %p706_p0  ;;  %p728_p7 = scmp.lt.s32.totalorder %s726_s22, %s719_s23 }
  0x43   : > { %p723_p13 = pneg %p722_p9  ;;  %p729_p10 = por %p728_p7, %p727_p3 }
  0x45   : > { %p730_p1 = pnand %p729_p10, %p723_p13 }
  0x47   : > { %733 = shalt.err (!%p730_p1)
}
  0x48   : > { %617 = dma.hbm_to_vmem [thread:$0]  (!%p971_p12), %s969_s4, 512, %s975_s25, %s977_s5, %s837_s8, %s837_s8, %s838_s9  }
  0x49   : > { %p1133_p0 = scmp.ne.s32.totalorder %s1128_s20, 0 }
  0x4a   : > { %s1011_s6 = sand.u32 (!%p1133_p0), 1, %s826_s13   ;;  %p1134_p5 = scmp.ne.s32.totalorder (!%p1133_p0), %s1126_s18, 0 }
  0x4b   : > { %170 = sbr.rel (%p1133_p0) target bundleno = 392 (0x188), region = 28  ;;  %s533_s7 = sshll.u32 (!%p1133_p0), %s1011_s6, 5 }
  0x4c   : > { %s173_s10 = scalar_lea.sflag (!%p1133_p0), [#allocation3], %s1011_s6  ;;  %s1015_s11 = scalar_lea.vmem (!%p1133_p0), [#allocation2], %s533_s7 }
  0x52   : > { %805 = dma.done.wait (%p1134_p5), %s173_s10, 512  }
  0x53   : > { %807 = vsyncadd (%p1134_p5), %s173_s10, 4294966784  ;;  %p1135_p12 = scmp.eq.s32.totalorder %s886_s16, 0 }
  0x55   : > { %809 = dma.done.wait (%p1135_p12), [#allocation6], 576   ;;  %p1136_p2 = pmov %p1135_p12 }
  0x56   : > { %s535_s20 = sshll.u32 %s1011_s6, 6  ;;  %p1137_p4 = scmp.ne.s32.totalorder %s886_s16, 0 }
  0x57   : > { %811 = vsyncadd (%p1136_p2), [#allocation6], 4294966720  ;;  %s1026_s8 = scalar_lea.vmem [#allocation7], %s535_s20  ;;  %v840_v0 = vmov (!%p1137_p4), 0.0  }
  0x58   : > { %209 = sbr.rel (%p1137_p4) target bundleno = 95 (0x5f), region = 40  ;;  %210 = vst [vmem:[#allocation8] sm:$0xff] (!%p1137_p4), %v840_v0 }
  0x5f PF: > { %v667_v1 = vld [vmem:[#allocation5] sm:$0xff]   ;;  %v668_v2 = vld [vmem:[#allocation5 + $0x8] sm:$0xff]   ;;  %v669_v3 = vld [vmem:[#allocation5 + $0x10] sm:$0xff]   ;;  %vm275_vm0 = vcmask 588800   ;;  %vm288_vm1 = vcmask 1043456   ;;  %s558_s18 = sshll.u32 %s886_s16, 10 }
  0x60   : > { %568 = vmatprep.subr.bf16.mxu0 %v667_v1  ;;  %586 = vmatprep.subr.bf16.mxu1 %v667_v1  ;;  %v672_v4 = vld [vmem:[%s1015_s11] sm:$0xff]   ;;  %v674_v5 = vld [vmem:[%s1015_s11 + $0x10] sm:$0xff]   ;;  %v670_v6 = vld [vmem:[#allocation5 + $0x18] sm:$0xff]   ;;  %s420_s9 = sshll.u32 %s1026_s8, 4  ;;  %s1045_s26 = scalar_lea.hbm %s1121_s2, %s558_s18  ;;  %s1047_s9 = int_to_ptr.vmem [resolvable:$true] %s420_s9 }
  0x61   : > { %569 = vmatpush3.bf16.msra.mxu0 %v667_v1  ;;  %591 = vmatpush3.bf16.msra.mxu1 %v667_v1  ;;  %v671_v7 = vld [vmem:[#allocation5 + $0x20] ss:$0 sps:$4 sm:$0xff]   ;;  %v673_v9 = vld [vmem:[%s1015_s11 + $0x8] sm:$0xff]   ;;  %v675_v10 = vld [vmem:[%s1015_s11 + $0x18] sm:$0xff]   ;;  %s407_s5 = scalar_lea.sflag [#allocation4], %s1011_s6  ;;  %s734_s27 = scalar_lea.vmem %s1047_s9, 1024 }
  0x62   : > { %570 = vmatprep.subr.bf16.mxu0 %v668_v2  ;;  %587 = vmatprep.subr.bf16.mxu1 %v668_v2  ;;  %v290_v8 = vsel %vm288_vm1, %v671_v7, 0  ;;  %p735_p6 = scmp.ne.s32.totalorder %s1047_s9, %s734_s27  ;;  %s841_s28 = smov [#allocation7]  }
  0x63   : > { %578 = vmatprep.mubr.msk.bf16.mxu0 %vm275_vm0, %v672_v4  ;;  %582 = vmatprep.mubr.msk.bf16.mxu1 %vm275_vm0, %v674_v5  ;;  %s738_s23 = sshll.u32 %s841_s28, 4  ;;  %s739_s23 = int_to_ptr.vmem [resolvable:$false] %s738_s23 }
  0x64   : > { %p736_p8 = pnand %p735_p6, %p960_p11  ;;  %s740_s29 = scalar_lea.vmem %s739_s23, 2048 }
  0x65   : > { %571 = vmatpush3.bf16.msra.mxu0 %v668_v2  ;;  %592 = vmatpush3.bf16.msra.mxu1 %v668_v2  ;;  %p741_p13 = scmp.lt.s32.totalorder %s1047_s9, %s739_s23  ;;  %p742_p3 = scmp.lt.s32.totalorder %s740_s29, %s734_s27 }
  0x66   : > { %572 = vmatprep.subr.bf16.mxu0 %v669_v3  ;;  %588 = vmatprep.subr.bf16.mxu1 %v669_v3  ;;  %p737_p9 = pneg %p736_p8 }
  0x67   : > { %p743_p7 = por %p742_p3, %p741_p13 }
  0x69   : > { %573 = vmatpush3.bf16.msra.mxu0 %v669_v3  ;;  %593 = vmatpush3.bf16.msra.mxu1 %v669_v3  ;;  %p744_p10 = pnand %p743_p7, %p737_p9 }
  0x6a   : > { %574 = vmatprep.subr.bf16.mxu0 %v670_v6  ;;  %589 = vmatprep.subr.bf16.mxu1 %v670_v6 }
  0x6d   : > { %575 = vmatpush3.bf16.msra.mxu0 %v670_v6  ;;  %594 = vmatpush3.bf16.msra.mxu1 %v670_v6 }
  0x6e   : > { %596 = vmatprep.subr.msk.bf16.mxu0 %vm288_vm1, %v671_v7  ;;  %597 = vmatprep.subr.msk.bf16.mxu1 %vm288_vm1, %v671_v7 }
  0x71   : > { %577 = vmatpush3.bf16.msra.mxu0 %v290_v8  ;;  %595 = vmatpush3.bf16.msra.mxu1 %v290_v8 }
  0x74   : > { %579 = vmatmul.mubr.msk.bf16.vlgmr.msra.gmra.mrb[0].mxu0 %vm275_vm0, %v673_v9  ;;  %583 = vmatmul.mubr.msk.bf16.vlgmr.msra.gmra.mrb[0].mxu1 %vm275_vm0, %v675_v10 }
 0x147   : > { %v580_v11 = vpop.f32.mrb[0].mxu0  ;;  %v584_v12 = vpop.f32.mrb[0].mxu1 }
 0x148   : > { %359 = vst [vmem:[%s1026_s8 + $0x10] sm:$0xff] %v580_v11  ;;  %v326_v13 = vpop.f32.mrb[1].mxu0  ;;  %363 = vst [vmem:[%s1026_s8 + $0x30] sm:$0xff] %v584_v12  ;;  %v342_v14 = vpop.f32.mrb[1].mxu1 }
 0x149   : > { %357 = vst [vmem:[%s1026_s8] sm:$0xff] %v326_v13  ;;  %v581_v15 = vpop.f32.mrb[2].mxu0  ;;  %361 = vst [vmem:[%s1026_s8 + $0x20] sm:$0xff] %v342_v14  ;;  %v585_v16 = vpop.f32.mrb[2].mxu1  ;;  %v378_v19 = vmul.f32 %v326_v13, %v326_v13 }
 0x14a   : > { %360 = vst [vmem:[%s1026_s8 + $0x18] sm:$0xff] %v581_v15  ;;  %v329_v17 = vpop.f32.mrb[3].mxu0  ;;  %364 = vst [vmem:[%s1026_s8 + $0x38] sm:$0xff] %v585_v16  ;;  %v345_v18 = vpop.f32.mrb[3].mxu1 }
 0x14b   : > { %358 = vst [vmem:[%s1026_s8 + $0x8] sm:$0xff] %v329_v17  ;;  %v365_v20 = vadd.f32 %v329_v17, %v326_v13  ;;  %v379_v21 = vmul.f32 %v329_v17, %v329_v17  ;;  %362 = vst [vmem:[%s1026_s8 + $0x28] sm:$0xff] %v345_v18 }
 0x14c   : > { %747 = shalt.err (!%p744_p10)
}
 0x14d   : > { %s748_s30 = scalar_lea.hbm %s1045_s26, 1024  ;;  %s752_s10 = scalar_lea.hbm %s1121_s2, 2048 }
 0x14e   : > { %p749_p1 = scmp.ne.s32.totalorder %s1045_s26, %s748_s30  ;;  %p753_p12 = scmp.lt.u32.totalorder %s1045_s26, %s1121_s2 }
 0x14f   : > { %p754_p2 = scmp.lt.u32.totalorder %s752_s10, %s748_s30  ;;  %p756_p6 = scmp.lt.u32.totalorder %s748_s30, %s1045_s26 }
 0x150   : > { %p750_p0 = pnand %p749_p1, %p960_p11 }
 0x151   : > { %p755_p4 = por %p754_p2, %p753_p12 }
 0x152   : > { %p751_p5 = pneg %p750_p0 }
 0x153   : > { %p757_p8 = por %p756_p6, %p755_p4 }
 0x155   : > { %p758_p9 = pnand %p757_p8, %p751_p5 }
 0x157   : > { %761 = shalt.err (!%p758_p9)
}
 0x158   : > { %s842_s8 = smov 128   ;;  %s843_s18 = smov 8   ;;  %v380_v22 = vmul.f32 %v580_v11, %v580_v11  ;;  %v366_v23 = vadd.f32 %v580_v11, %v365_v20  ;;  %v386_v24 = vadd.f32 %v379_v21, %v378_v19  ;;  %v381_v25 = vmul.f32 %v581_v15, %v581_v15  ;;  %v399_v53 = vld [vmem:[#allocation8] sm:$0xff] }
 0x159   : > { %604 = dma.vmem_to_hbm [thread:$0]  (%p960_p11), %s1047_s9, 1024, %s1045_s26, %s407_s5, %s842_s8, %s842_s8, %s843_s18   ;;  %v382_v28 = vmul.f32 %v342_v14, %v342_v14  ;;  %v383_v33 = vmul.f32 %v345_v18, %v345_v18  ;;  %v384_v34 = vmul.f32 %v584_v12, %v584_v12  ;;  %v385_v37 = vmul.f32 %v585_v16, %v585_v16 }
 0x15a   : > { %v387_v26 = vadd.f32 %v386_v24, %v380_v22  ;;  %v367_v27 = vadd.f32 %v581_v15, %v366_v23  ;;  %vm400_vm2 = vcmask 1040384   ;;  %vm402_vm3 = vcmask 1041408   ;;  %s844_s21 = smov [#allocation8]   ;;  %p1138_p13 = scmp.eq.s32.totalorder %s886_s16, 1 }
 0x15b   : > { %s434_s6 = sshll.u32 %s844_s21, 4  ;;  %s435_s6 = int_to_ptr.vmem [resolvable:$true] %s434_s6 }
 0x15c   : > { %v368_v29 = vadd.f32 %v367_v27, %v342_v14  ;;  %v388_v30 = vadd.f32 %v387_v26, %v381_v25  ;;  %s762_s9 = scalar_lea.vmem %s435_s6, 128  ;;  %p769_p10 = scmp.lt.s32.totalorder %s435_s6, %s435_s6 }
 0x15d   : > { %p763_p11 = scmp.ne.s32.totalorder %s435_s6, %s762_s9  ;;  %p770_p1 = scmp.lt.s32.totalorder %s762_s9, %s762_s9 }
 0x15e   : > { %v389_v31 = vadd.f32 %v388_v30, %v382_v28  ;;  %v369_v32 = vadd.f32 %v368_v29, %v345_v18 }
 0x15f   : > { %p764_p3 = pnand %p763_p11, %p1138_p13  ;;  %p771_p0 = por %p770_p1, %p769_p10 }
 0x160   : > { %v370_v35 = vadd.f32 %v584_v12, %v369_v32  ;;  %v390_v36 = vadd.f32 %v389_v31, %v383_v33 }
 0x161   : > { %p765_p7 = pneg %p764_p3 }
 0x162   : > { %v371_v38 = vadd.f32 %v585_v16, %v370_v35  ;;  %v391_v39 = vadd.f32 %v390_v36, %v384_v34 }
 0x163   : > { %p772_p5 = pnand %p771_p0, %p765_p7 }
 0x164   : > { %v372_v40 = vrot.slane %v371_v38, 4  ;;  %v392_v41 = vadd.f32 %v391_v39, %v385_v37 }
 0x166   : > { %v373_v42 = vadd.f32 %v372_v40, %v371_v38  ;;  %v393_v43 = vrot.slane %v392_v41, 4 }
 0x168   : > { %v374_v44 = vrot.slane %v373_v42, 2  ;;  %v394_v45 = vadd.f32 %v393_v43, %v392_v41 }
 0x16a   : > { %v375_v46 = vadd.f32 %v374_v44, %v373_v42  ;;  %v395_v47 = vrot.slane %v394_v45, 2 }
 0x16c   : > { %v376_v48 = vrot.slane %v375_v46, 1  ;;  %v396_v49 = vadd.f32 %v395_v47, %v394_v45 }
 0x16e   : > { %v397_v50 = vrot.slane %v396_v49, 1  ;;  %v377_v51 = vadd.f32 %v376_v48, %v375_v46 }
 0x170   : > { %v398_v52 = vadd.f32 %v397_v50, %v396_v49 }
 0x172   : > { %v401_v54 = vsel %vm400_vm2, %v377_v51, %v398_v52 }
 0x173   : > { %v403_v55 = vsel %vm402_vm3, %v401_v54, 0.0 }
 0x174   : > { %v404_v56 = vadd.f32 %v403_v55, %v399_v53 }
 0x176   : > { %405 = vst [vmem:[#allocation8] sm:$0xff] %v404_v56 }
 0x177   : > { %775 = shalt.err (!%p772_p5)
}
 0x178   : > { %s776_s26 = scalar_lea.hbm %s1122_s3, 128  ;;  %p1139_p2 = pmov %p1138_p13 }
 0x179   : > { %p777_p12 = scmp.ne.s32.totalorder %s1122_s3, %s776_s26  ;;  %p782_p8 = scmp.lt.u32.totalorder %s776_s26, %s1122_s3 }
 0x17b   : > { %p778_p4 = pnand %p777_p12, %p1139_p2 }
 0x17d   : > { %p779_p6 = pneg %p778_p4 }
 0x17f   : > { %p784_p9 = pnand %p782_p8, %p779_p6 }
 0x181   : > { %787 = shalt.err (!%p784_p9)
}
 0x182   : > { %p1140_p11 = pmov %p1139_p2  ;;  %p1141_p13 = pmov %p1139_p2 }
 0x184   : > { %606 = dma.vmem_to_hbm [thread:$0]  (%p1140_p11), %s435_s6, 128, %s1122_s3, [#allocation9]  }
 0x185   : > { %813 = dma.done.wait (%p1141_p13), [#allocation9], 128   ;;  %p1142_p3 = pmov %p1139_p2 }
 0x187   : > { %815 = vsyncadd (%p1142_p3), [#allocation9], 4294967168 }
 0x188 PF: > { %s450_s22 = sand.u32 1, %s822_s12   ;;  %p1143_p7 = scmp.ne.s32.totalorder %s1127_s19, 0 }
 0x189   : > { %p1144_p10 = scmp.ge.s32.totalorder %s834_s15, 2  ;;  %s451_s7 = scalar_lea.sflag [#allocation4], %s450_s22 }
 0x18b   : > { %p619_p1 = pnand %p1144_p10, %p1143_p7 }
 0x18d   : > { %817 = dma.done.wait (!%p619_p1), %s451_s7, 1024  }
 0x18e   : > { %819 = vsyncadd (!%p619_p1), %s451_s7, 4294966272  ;;  %p19_p0 = scmp.ge.s32.totalorder %s922_s24, 4   ;;  %s1145_s12 = smov %s826_s13 }
 0x18f   : > { %s1146_s13 = smov %s830_s14  ;;  %s1147_s14 = smov %s956_s17 }
 0x190   : > { %s1148_s15 = smov %s922_s24  ;;  %21 = sbr.rel (!%p19_p0) target bundleno = 7 (0x7), region = 89 }
 0x197   :  { %456 = vsyncpa [#allocation3], 1 }
 0x198   :  { %458 = vsyncpa [#allocation3 + $0x1], 1 }
 0x199   :  { %459 = vsyncpa [#allocation6], 1 }
 0x19a   :  { %460 = vsyncpa [#allocation4], 1 }
 0x19b   :  { %462 = vsyncpa [#allocation4 + $0x1], 1 }
 0x19c   :  { %463 = vsyncpa [#allocation9], 1 }

// kernel: basic_block_forward.6
= control target key start
LH: loop header
LB: loop body
LE: loop exit
PB: predicated region body
PF: predicated region fallthrough
CT: control target
= control target key end

     0   :  { %9 = vsyncpa [#allocation3], 0  ;;  %s1038_s0 = inlined_call_operand.hbm [shape: bf16[128,4], index: 0, kind: input, shape index: {}]   ;;  %s1039_s1 = inlined_call_operand.hbm [shape: bf16[4,128], index: 1, kind: input, shape index: {}]   ;;  %s1040_s2 = inlined_call_operand.hbm [shape: f32[128,128], index: 2, kind: output, shape index: {0}]   ;;  %s1041_s3 = inlined_call_operand.hbm [shape: f32[8,128], index: 3, kind: output, shape index: {1}]  }
   0x1   :  { %11 = vsyncpa [#allocation3 + $0x1], 0 }
   0x2   :  { %12 = vsyncpa [#allocation6], 0 }
   0x3   :  { %13 = vsyncpa [#allocation4], 0 }
   0x4   :  { %15 = vsyncpa [#allocation4 + $0x1], 0 }
   0x5   :  { %16 = vsyncpa [#allocation9], 0  ;;  %s797_s12 = smov 0   ;;  %s799_s13 = smov 0  }
   0x6   :  { %s801_s14 = smov 0   ;;  %s803_s15 = smov 0  }
   0x7 LB: > { %s818_s16 = sadd.s32 4294967295, %s766_s15   ;;  %s487_s17 = sadd.s32 4294967294, %s766_s15   ;;  %s766_s15 = sphi %s803_s15, %s1072_s15   ;;  %s762_s14 = sphi %s801_s14, %s1071_s14   ;;  %s758_s13 = sphi %s799_s13, %s1070_s13   ;;  %s754_s12 = sphi %s797_s12, %s1069_s12  }
   0x8   : > { %s822_s18 = sadd.s32 1, %s766_s15   ;;  %s29_s19 = sadd.s32 1, %s762_s14 }
   0x9   : > { %s26_s20 = ssub.s32 %s766_s15, %s822_s18  ;;  %p36_p0 = scmp.ne.s32.totalorder %s762_s14, %s758_s13 }
   0xa   : > { %p27_p1 = scmp.eq.s32.totalorder %s26_s20, 0  ;;  %p37_p2 = scmp.eq.s32.totalorder %s766_s15, 0 }
   0xb   : > { %p42_p3 = scmp.ne.s32.totalorder %s758_s13, %s754_s12  ;;  %p1042_p4 = scmp.eq.s32.totalorder %s818_s16, 0 }
   0xc   : > { %s834_s21 = scalar_select %p27_p1, %s762_s14, %s29_s19  }
   0xd   : > { %p836_p5 = por %p37_p2, %p36_p0  ;;  %p842_p6 = por %p1042_p4, %p42_p3 }
   0xe   : > { %p1043_p7 = scmp.eq.s32.totalorder %s818_s16, 1  ;;  %p93_p8 = scmp.eq.s32.totalorder %s487_s17, 1 }
   0xf   : > { %s1049_s23 = scalar_select %p842_p6, 1, 0 }
  0x10   : > { %p488_p9 = scmp.ge.s32.totalorder %s766_s15, 1  ;;  %p121_p10 = scmp.lt.s32.totalorder %s766_s15, 3 }
  0x11   : > { %p851_p11 = por %p1043_p7, %p36_p0  ;;  %p855_p12 = por %p93_p8, %p42_p3 }
  0x12   : > { %p859_p13 = pnand %p488_p9, %p121_p10  ;;  %s768_s27 = smov [#allocation5]  }
  0x13   : > { %s1050_s24 = scalar_select %p851_p11, 1, 0 }
  0x14   : > { %s1051_s25 = scalar_select %p855_p12, 1, 0 }
  0x15   : > { %s1052_s26 = scalar_select %p859_p13, 1, 0 }
  0x16   : > { %p547_p4 = pneg %p859_p13  ;;  %s134_s28 = sshll.u32 %s768_s27, 4  ;;  %s135_s28 = int_to_ptr.vmem [resolvable:$true] %s134_s28 }
  0x17   : > { %p560_p0 = scmp.lt.s32.totalorder %s766_s15, 2  ;;  %p1053_p7 = scmp.eq.s32.totalorder %s818_s16, 0 }
  0x18   : > { %s145_s30 = sand.u32 1, %s762_s14   ;;  %s608_s8 = scalar_lea.hbm %s1039_s1, 32 }
  0x19   : > { %p870_p6 = pnand %p547_p4, %p1053_p7  ;;  %p877_p3 = pnand %p560_p0, %p836_p5 }
  0x1a   : > { %s491_s5 = sshll.u32 %s145_s30, 5  ;;  %p609_p8 = scmp.ne.s32.totalorder %s1039_s1, %s608_s8 }
  0x1b   : > { %s1055_s4 = scalar_select %p877_p3, 1, 0 }
  0x1c   : > { %p610_p4 = pneg %p870_p6  ;;  %p615_p5 = scmp.lt.u32.totalorder %s608_s8, %s1039_s1 }
  0x1e   : > { %p611_p7 = pnand %p610_p4, %p609_p8 }
  0x20   : > { %p612_p9 = pneg %p611_p7 }
  0x22   : > { %p617_p10 = pnand %p615_p5, %p612_p9 }
  0x24   : > { %620 = shalt.err (!%p617_p10)
}
  0x25   : > { %s621_s19 = scalar_lea.vmem %s135_s28, 32  ;;  %p629_p12 = scmp.lt.s32.totalorder %s135_s28, %s135_s28 }
  0x26   : > { %p622_p0 = scmp.ne.s32.totalorder %s135_s28, %s621_s19  ;;  %p630_p11 = scmp.lt.s32.totalorder %s621_s19, %s621_s19 }
  0x28   : > { %p624_p2 = pnand %p622_p0, %p610_p4  ;;  %p631_p13 = por %p630_p11, %p629_p12 }
  0x2a   : > { %p625_p1 = pneg %p624_p2 }
  0x2c   : > { %p632_p3 = pnand %p631_p13, %p625_p1 }
  0x2e   : > { %635 = shalt.err (!%p632_p3)
}
  0x2f   : > { %550 = dma.hbm_to_vmem [thread:$0]  (!%p870_p6), %s1039_s1, 32, %s135_s28, [#allocation6]  }
  0x30   : > { %s514_s27 = sshll.u32 %s766_s15, 9  ;;  %s149_s6 = scalar_lea.vmem [#allocation2], %s491_s5 }
  0x31   : > { %s156_s7 = sshll.u32 %s149_s6, 4  ;;  %s901_s10 = scalar_lea.hbm %s1038_s0, %s514_s27  ;;  %s903_s7 = int_to_ptr.vmem [resolvable:$true] %s156_s7 }
  0x32   : > { %s905_s29 = scalar_lea.sflag [#allocation3], %s145_s30  ;;  %s636_s11 = scalar_lea.hbm %s901_s10, 512 }
  0x33   : > { %p637_p11 = scmp.ne.s32.totalorder %s901_s10, %s636_s11  ;;  %p1056_p12 = scmp.ne.s32.totalorder %s1055_s4, 0 }
  0x34   : > { %s641_s17 = scalar_lea.hbm %s1038_s0, 1024  ;;  %p642_p2 = scmp.lt.u32.totalorder %s901_s10, %s1038_s0 }
  0x35   : > { %p638_p6 = pneg %p1056_p12  ;;  %p643_p3 = scmp.lt.u32.totalorder %s641_s17, %s636_s11 }
  0x36   : > { %p645_p4 = scmp.lt.u32.totalorder %s636_s11, %s901_s10 }
  0x37   : > { %p639_p13 = pnand %p638_p6, %p637_p11  ;;  %p644_p8 = por %p643_p3, %p642_p2 }
  0x39   : > { %p640_p1 = pneg %p639_p13  ;;  %p646_p7 = por %p645_p4, %p644_p8 }
  0x3b   : > { %p647_p9 = pnand %p646_p7, %p640_p1 }
  0x3d   : > { %650 = shalt.err (!%p647_p9)
}
  0x3e   : > { %s651_s30 = scalar_lea.vmem %s903_s7, 512  ;;  %s769_s22 = smov [#allocation2]  }
  0x3f   : > { %p652_p5 = scmp.ne.s32.totalorder %s903_s7, %s651_s30  ;;  %s656_s27 = sshll.u32 %s769_s22, 4  ;;  %s657_s27 = int_to_ptr.vmem [resolvable:$false] %s656_s27 }
  0x40   : > { %s658_s6 = scalar_lea.vmem %s657_s27, 1024  ;;  %p659_p11 = scmp.lt.s32.totalorder %s903_s7, %s657_s27 }
  0x41   : > { %p654_p10 = pnand %p652_p5, %p638_p6  ;;  %p660_p13 = scmp.lt.s32.totalorder %s658_s6, %s651_s30 }
  0x43   : > { %p655_p0 = pneg %p654_p10  ;;  %p661_p2 = por %p660_p13, %p659_p11 }
  0x45   : > { %p662_p3 = pnand %p661_p2, %p655_p0 }
  0x47   : > { %665 = shalt.err (!%p662_p3)
}
  0x48   : > { %s770_s8 = smov 64   ;;  %s771_s9 = smov 4  }
  0x49   : > { %554 = dma.hbm_to_vmem [thread:$0]  (!%p1056_p12), %s901_s10, 512, %s903_s7, %s905_s29, %s770_s8, %s770_s8, %s771_s9  }
  0x4a   : > { %p1057_p6 = scmp.ne.s32.totalorder %s1052_s26, 0 }
  0x4b   : > { %s936_s11 = sand.u32 (!%p1057_p6), 1, %s758_s13   ;;  %p1058_p1 = scmp.ne.s32.totalorder (!%p1057_p6), %s1049_s23, 0 }
  0x4c   : > { %168 = sbr.rel (%p1057_p6) target bundleno = 377 (0x179), region = 28  ;;  %s495_s28 = sshll.u32 (!%p1057_p6), %s936_s11, 5 }
  0x4d   : > { %s171_s5 = scalar_lea.sflag (!%p1057_p6), [#allocation3], %s936_s11  ;;  %s174_s17 = scalar_lea.vmem (!%p1057_p6), [#allocation2], %s495_s28 }
  0x53   : > { %737 = dma.done.wait (%p1058_p1), %s171_s5, 512  }
  0x54   : > { %739 = vsyncadd (%p1058_p1), %s171_s5, 4294966784  ;;  %p1059_p8 = scmp.eq.s32.totalorder %s818_s16, 0 }
  0x56   : > { %741 = dma.done.wait (%p1059_p8), [#allocation6], 32   ;;  %p1060_p12 = pmov %p1059_p8 }
  0x57   : > { %s497_s26 = sshll.u32 %s936_s11, 6  ;;  %p1061_p4 = scmp.ne.s32.totalorder %s818_s16, 0 }
  0x58   : > { %743 = vsyncadd (%p1060_p12), [#allocation6], 4294967264  ;;  %s949_s4 = scalar_lea.vmem [#allocation7], %s497_s26  ;;  %v772_v0 = vmov (!%p1061_p4), 0.0  }
  0x59   : > { %207 = sbr.rel (%p1061_p4) target bundleno = 96 (0x60), region = 40  ;;  %208 = vst [vmem:[#allocation8] sm:$0xff] (!%p1061_p4), %v772_v0 }
  0x60 PF: > { %v217_v1 = vld [vmem:[#allocation5] sm:$0x3]  ;;  %vm251_vm0 = vcmask 1041408   ;;  %vm238_vm1 = vcmask 31744   ;;  %v605_v4 = vld [vmem:[%s174_s17 + $0x8] sm:$0xff]   ;;  %v606_v5 = vld [vmem:[%s174_s17 + $0x10] sm:$0xff]  }
  0x61   : > { %v604_v2 = vld [vmem:[%s174_s17] sm:$0xff]   ;;  %533 = vmatprep.subr.msk.bf16.mxu0 %vm251_vm0, %v217_v1  ;;  %v253_v3 = vsel %vm251_vm0, %v217_v1, 0  ;;  %534 = vmatprep.subr.msk.bf16.mxu1 %vm251_vm0, %v217_v1  ;;  %v607_v6 = vld [vmem:[%s174_s17 + $0x18] sm:$0xff]   ;;  %s515_s23 = sshll.u32 %s818_s16, 10  ;;  %s382_s7 = sshll.u32 %s949_s4, 4  ;;  %s966_s7 = int_to_ptr.vmem [resolvable:$true] %s382_s7 }
  0x62   : > { %522 = vmatpush3.bf16.msra.mxu0 %v253_v3  ;;  %523 = vmatprep.mubr.msk.bf16.mxu0 %vm238_vm1, %v604_v2  ;;  %s964_s19 = scalar_lea.hbm %s1040_s2, %s515_s23  ;;  %s369_s20 = scalar_lea.sflag [#allocation4], %s936_s11 }
  0x63   : > { %532 = vmatpush3.bf16.msra.mxu1 %v253_v3  ;;  %527 = vmatprep.mubr.msk.bf16.mxu1 %vm238_vm1, %v606_v5  ;;  %s666_s30 = scalar_lea.vmem %s966_s7, 1024  ;;  %p1062_p9 = scmp.ne.s32.totalorder %s1050_s24, 0 }
  0x64   : > { %p667_p7 = scmp.ne.s32.totalorder %s966_s7, %s666_s30  ;;  %s773_s22 = smov [#allocation7]  }
  0x65   : > { %524 = vmatmul.mubr.msk.bf16.vlgmr.msra.gmra.mrb[0].mxu0 %vm238_vm1, %v605_v4  ;;  %s670_s27 = sshll.u32 %s773_s22, 4  ;;  %s671_s27 = int_to_ptr.vmem [resolvable:$false] %s670_s27 }
  0x66   : > { %528 = vmatmul.mubr.msk.bf16.vlgmr.msra.gmra.mrb[0].mxu1 %vm238_vm1, %v607_v6  ;;  %p668_p5 = pnand %p667_p7, %p1062_p9  ;;  %s672_s6 = scalar_lea.vmem %s671_s27, 2048 }
  0x67   : > { %p673_p0 = scmp.lt.s32.totalorder %s966_s7, %s671_s27  ;;  %p674_p11 = scmp.lt.s32.totalorder %s672_s6, %s666_s30 }
  0x68   : > { %p669_p10 = pneg %p668_p5 }
  0x69   : > { %p675_p13 = por %p674_p11, %p673_p0 }
  0x6b   : > { %p676_p2 = pnand %p675_p13, %p669_p10 }
 0x138   : > { %v525_v7 = vpop.f32.mrb[0].mxu0 }
 0x139   : > { %322 = vst [vmem:[%s949_s4 + $0x10] sm:$0xff] %v525_v7  ;;  %v289_v8 = vpop.f32.mrb[1].mxu0  ;;  %v529_v9 = vpop.f32.mrb[0].mxu1  ;;  %v343_v18 = vmul.f32 %v525_v7, %v525_v7 }
 0x13a   : > { %320 = vst [vmem:[%s949_s4] sm:$0xff] %v289_v8  ;;  %v526_v10 = vpop.f32.mrb[2].mxu0  ;;  %326 = vst [vmem:[%s949_s4 + $0x30] sm:$0xff] %v529_v9  ;;  %v305_v11 = vpop.f32.mrb[1].mxu1  ;;  %v341_v14 = vmul.f32 %v289_v8, %v289_v8 }
 0x13b   : > { %323 = vst [vmem:[%s949_s4 + $0x18] sm:$0xff] %v526_v10  ;;  %v292_v12 = vpop.f32.mrb[3].mxu0  ;;  %324 = vst [vmem:[%s949_s4 + $0x20] sm:$0xff] %v305_v11  ;;  %v530_v13 = vpop.f32.mrb[2].mxu1 }
 0x13c   : > { %321 = vst [vmem:[%s949_s4 + $0x8] sm:$0xff] %v292_v12  ;;  %v328_v15 = vadd.f32 %v292_v12, %v289_v8  ;;  %v342_v16 = vmul.f32 %v292_v12, %v292_v12  ;;  %327 = vst [vmem:[%s949_s4 + $0x38] sm:$0xff] %v530_v13  ;;  %v308_v17 = vpop.f32.mrb[3].mxu1 }
 0x13d   : > { %325 = vst [vmem:[%s949_s4 + $0x28] sm:$0xff] %v308_v17 }
 0x13e   : > { %v329_v19 = vadd.f32 %v525_v7, %v328_v15  ;;  %v349_v20 = vadd.f32 %v342_v16, %v341_v14 }
 0x13f   : > { %679 = shalt.err (!%p676_p2)
}
 0x140   : > { %s680_s8 = scalar_lea.hbm %s964_s19, 1024  ;;  %s684_s5 = scalar_lea.hbm %s1040_s2, 2048 }
 0x141   : > { %p681_p3 = scmp.ne.s32.totalorder %s964_s19, %s680_s8  ;;  %p685_p8 = scmp.lt.u32.totalorder %s964_s19, %s1040_s2 }
 0x142   : > { %p686_p12 = scmp.lt.u32.totalorder %s684_s5, %s680_s8  ;;  %p688_p7 = scmp.lt.u32.totalorder %s680_s8, %s964_s19 }
 0x143   : > { %p682_p6 = pnand %p681_p3, %p1062_p9 }
 0x144   : > { %p687_p4 = por %p686_p12, %p685_p8 }
 0x145   : > { %p683_p1 = pneg %p682_p6 }
 0x146   : > { %p689_p5 = por %p688_p7, %p687_p4 }
 0x148   : > { %p690_p10 = pnand %p689_p5, %p683_p1 }
 0x14a   : > { %693 = shalt.err (!%p690_p10)
}
 0x14b   : > { %s774_s4 = smov 128   ;;  %s775_s23 = smov 8   ;;  %v344_v21 = vmul.f32 %v526_v10, %v526_v10  ;;  %v350_v22 = vadd.f32 %v349_v20, %v343_v18  ;;  %v330_v23 = vadd.f32 %v526_v10, %v329_v19  ;;  %v345_v24 = vmul.f32 %v305_v11, %v305_v11  ;;  %v362_v49 = vld [vmem:[#allocation8] sm:$0xff] }
 0x14c   : > { %541 = dma.vmem_to_hbm [thread:$0]  (%p1062_p9), %s966_s7, 1024, %s964_s19, %s369_s20, %s774_s4, %s774_s4, %s775_s23   ;;  %v346_v29 = vmul.f32 %v308_v17, %v308_v17  ;;  %v347_v30 = vmul.f32 %v529_v9, %v529_v9  ;;  %v348_v33 = vmul.f32 %v530_v13, %v530_v13  ;;  %vm363_vm2 = vcmask 1040384  }
 0x14d   : > { %v331_v25 = vadd.f32 %v330_v23, %v305_v11  ;;  %v351_v26 = vadd.f32 %v350_v22, %v344_v21  ;;  %s776_s24 = smov [#allocation8]   ;;  %p1063_p0 = scmp.eq.s32.totalorder %s818_s16, 1 }
 0x14e   : > { %s396_s11 = sshll.u32 %s776_s24, 4  ;;  %s397_s11 = int_to_ptr.vmem [resolvable:$true] %s396_s11 }
 0x14f   : > { %v352_v27 = vadd.f32 %v351_v26, %v345_v24  ;;  %v332_v28 = vadd.f32 %v331_v25, %v308_v17  ;;  %s694_s7 = scalar_lea.vmem %s397_s11, 128  ;;  %p701_p2 = scmp.lt.s32.totalorder %s397_s11, %s397_s11 }
 0x150   : > { %p695_p9 = scmp.ne.s32.totalorder %s397_s11, %s694_s7  ;;  %p702_p3 = scmp.lt.s32.totalorder %s694_s7, %s694_s7 }
 0x151   : > { %v333_v31 = vadd.f32 %v529_v9, %v332_v28  ;;  %v353_v32 = vadd.f32 %v352_v27, %v346_v29 }
 0x152   : > { %p696_p11 = pnand %p695_p9, %p1063_p0  ;;  %p703_p6 = por %p702_p3, %p701_p2 }
 0x153   : > { %v334_v34 = vadd.f32 %v530_v13, %v333_v31  ;;  %v354_v35 = vadd.f32 %v353_v32, %v347_v30 }
 0x154   : > { %p697_p13 = pneg %p696_p11 }
 0x155   : > { %v335_v36 = vrot.slane %v334_v34, 4  ;;  %v355_v37 = vadd.f32 %v354_v35, %v348_v33 }
 0x156   : > { %p704_p1 = pnand %p703_p6, %p697_p13 }
 0x157   : > { %v336_v38 = vadd.f32 %v335_v36, %v334_v34  ;;  %v356_v39 = vrot.slane %v355_v37, 4 }
 0x159   : > { %v337_v40 = vrot.slane %v336_v38, 2  ;;  %v357_v41 = vadd.f32 %v356_v39, %v355_v37 }
 0x15b   : > { %v338_v42 = vadd.f32 %v337_v40, %v336_v38  ;;  %v358_v43 = vrot.slane %v357_v41, 2 }
 0x15d   : > { %v339_v44 = vrot.slane %v338_v42, 1  ;;  %v359_v45 = vadd.f32 %v358_v43, %v357_v41 }
 0x15f   : > { %v360_v46 = vrot.slane %v359_v45, 1  ;;  %v340_v47 = vadd.f32 %v339_v44, %v338_v42 }
 0x161   : > { %v361_v48 = vadd.f32 %v360_v46, %v359_v45 }
 0x163   : > { %v364_v50 = vsel %vm363_vm2, %v340_v47, %v361_v48 }
 0x164   : > { %v365_v51 = vsel %vm251_vm0, %v364_v50, 0.0 }
 0x165   : > { %v366_v52 = vadd.f32 %v365_v51, %v362_v49 }
 0x167   : > { %367 = vst [vmem:[#allocation8] sm:$0xff] %v366_v52 }
 0x168   : > { %707 = shalt.err (!%p704_p1)
}
 0x169   : > { %s708_s19 = scalar_lea.hbm %s1041_s3, 128  ;;  %p1064_p12 = pmov %p1063_p0 }
 0x16a   : > { %p709_p8 = scmp.ne.s32.totalorder %s1041_s3, %s708_s19  ;;  %p714_p5 = scmp.lt.u32.totalorder %s708_s19, %s1041_s3 }
 0x16c   : > { %p710_p4 = pnand %p709_p8, %p1064_p12 }
 0x16e   : > { %p711_p7 = pneg %p710_p4 }
 0x170   : > { %p716_p10 = pnand %p714_p5, %p711_p7 }
 0x172   : > { %719 = shalt.err (!%p716_p10)
}
 0x173   : > { %p1065_p9 = pmov %p1063_p0 }
 0x175   : > { %543 = dma.vmem_to_hbm [thread:$0]  (%p1065_p9), %s397_s11, 128, %s1041_s3, [#allocation9]  }
 0x176   : > { %745 = dma.done.wait (%p1063_p0), [#allocation9], 128   ;;  %p1066_p11 = pmov %p1063_p0 }
 0x178   : > { %747 = vsyncadd (%p1066_p11), [#allocation9], 4294967168 }
 0x179 PF: > { %s412_s9 = sand.u32 1, %s754_s12   ;;  %p1067_p13 = scmp.ne.s32.totalorder %s1051_s25, 0 }
 0x17a   : > { %p1068_p2 = scmp.ge.s32.totalorder %s766_s15, 2  ;;  %s413_s28 = scalar_lea.sflag [#allocation4], %s412_s9 }
 0x17c   : > { %p556_p3 = pnand %p1068_p2, %p1067_p13 }
 0x17e   : > { %749 = dma.done.wait (!%p556_p3), %s413_s28, 1024  }
 0x17f   : > { %751 = vsyncadd (!%p556_p3), %s413_s28, 4294966272  ;;  %p19_p6 = scmp.ge.s32.totalorder %s822_s18, 4   ;;  %s1069_s12 = smov %s758_s13 }
 0x180   : > { %s1070_s13 = smov %s762_s14  ;;  %s1071_s14 = smov %s834_s21 }
 0x181   : > { %s1072_s15 = smov %s822_s18  ;;  %21 = sbr.rel (!%p19_p6) target bundleno = 7 (0x7), region = 89 }
 0x188   :  { %418 = vsyncpa [#allocation3], 1 }
 0x189   :  { %420 = vsyncpa [#allocation3 + $0x1], 1 }
 0x18a   :  { %421 = vsyncpa [#allocation6], 1 }
 0x18b   :  { %422 = vsyncpa [#allocation4], 1 }
 0x18c   :  { %424 = vsyncpa [#allocation4 + $0x1], 1 }
 0x18d   :  { %425 = vsyncpa [#allocation9], 1 }

// kernel: basic_block_forward.7
= control target key start
LH: loop header
LB: loop body
LE: loop exit
PB: predicated region body
PF: predicated region fallthrough
CT: control target
= control target key end

     0   :  { %9 = vsyncpa [#allocation3], 0  ;;  %s1029_s0 = inlined_call_operand.hbm [shape: f32[128,128], index: 0, kind: input, shape index: {}]   ;;  %s1030_s1 = inlined_call_operand.hbm [shape: f32[8,128], index: 1, kind: input, shape index: {}]   ;;  %s1031_s2 = inlined_call_operand.hbm [shape: f32[1,128], index: 2, kind: input, shape index: {}]   ;;  %s1032_s3 = inlined_call_operand.hbm [shape: f32[1,128], index: 3, kind: input, shape index: {}]   ;;  %s1033_s4 = inlined_call_operand.hbm [shape: f32[128,128], index: 4, kind: output, shape index: {}]  }
   0x1   :  { %11 = vsyncpa [#allocation3 + $0x1], 0 }
   0x2   :  { %12 = vsyncpa [#allocation6], 0 }
   0x3   :  { %13 = vsyncpa [#allocation9], 0 }
   0x4   :  { %14 = vsyncpa [#allocation4], 0 }
   0x5   :  { %16 = vsyncpa [#allocation4 + $0x1], 0  ;;  %s757_s15 = smov 0   ;;  %s759_s16 = smov 0  }
   0x6   :  { %s761_s17 = smov 0   ;;  %s763_s18 = smov 0  }
   0x7 LB: > { %s778_s19 = sadd.s32 4294967295, %s721_s18   ;;  %s428_s20 = sadd.s32 4294967294, %s721_s18   ;;  %s721_s18 = sphi %s763_s18, %s1056_s18   ;;  %s717_s17 = sphi %s761_s17, %s1055_s17   ;;  %s713_s16 = sphi %s759_s16, %s1054_s16   ;;  %s709_s15 = sphi %s757_s15, %s1053_s15  }
   0x8   : > { %p42_p0 = scmp.ne.s32.totalorder %s713_s16, %s709_s15  ;;  %p1034_p1 = scmp.eq.s32.totalorder %s778_s19, 0 }
   0x9   : > { %p135_p3 = scmp.eq.s32.totalorder %s428_s20, 1  ;;  %p429_p5 = scmp.ge.s32.totalorder %s721_s18, 1 }
   0xa   : > { %p787_p4 = por %p1034_p1, %p42_p0  ;;  %p142_p7 = scmp.lt.s32.totalorder %s721_s18, 3 }
   0xb   : > { %p792_p6 = por %p135_p3, %p42_p0  ;;  %s723_s24 = smov [#allocation5]  }
   0xc   : > { %s1037_s21 = scalar_select %p787_p4, 1, 0 }
   0xd   : > { %s1038_s22 = scalar_select %p792_p6, 1, 0 }
   0xe   : > { %p797_p8 = pnand %p429_p5, %p142_p7  ;;  %s155_s25 = sshll.u32 %s723_s24, 4  ;;  %s156_s25 = int_to_ptr.vmem [resolvable:$true] %s155_s25 }
   0xf   : > { %s724_s26 = smov [#allocation7]   ;;  %s725_s29 = smov [#allocation8]  }
  0x10   : > { %s1039_s23 = scalar_select %p797_p8, 1, 0 }
  0x11   : > { %p466_p10 = pneg %p797_p8  ;;  %s166_s27 = sshll.u32 %s724_s26, 4  ;;  %s810_s27 = int_to_ptr.vmem [resolvable:$true] %s166_s27 }
  0x12   : > { %s177_s30 = sshll.u32 %s725_s29, 4  ;;  %s533_s7 = scalar_lea.hbm %s1030_s1, 128  ;;  %s812_s30 = int_to_ptr.vmem [resolvable:$true] %s177_s30 }
  0x13   : > { %p806_p11 = pnand %p466_p10, %p1034_p1  ;;  %p534_p12 = scmp.ne.s32.totalorder %s1030_s1, %s533_s7 }
  0x14   : > { %p540_p5 = scmp.lt.u32.totalorder %s533_s7, %s1030_s1 }
  0x15   : > { %p822_p13 = pneg %p806_p11 }
  0x17   : > { %p536_p0 = pnand %p822_p13, %p534_p12 }
  0x19   : > { %p537_p3 = pneg %p536_p0 }
  0x1b   : > { %p542_p7 = pnand %p540_p5, %p537_p3 }
  0x1d   : > { %545 = shalt.err (!%p542_p7)
}
  0x1e   : > { %s546_s13 = scalar_lea.vmem %s156_s25, 128  ;;  %p554_p2 = scmp.lt.s32.totalorder %s156_s25, %s156_s25 }
  0x1f   : > { %p547_p10 = scmp.ne.s32.totalorder %s156_s25, %s546_s13  ;;  %p555_p6 = scmp.lt.s32.totalorder %s546_s13, %s546_s13 }
  0x21   : > { %p549_p9 = pnand %p547_p10, %p822_p13  ;;  %p556_p4 = por %p555_p6, %p554_p2 }
  0x23   : > { %p550_p1 = pneg %p549_p9 }
  0x25   : > { %p557_p8 = pnand %p556_p4, %p550_p1 }
  0x27   : > { %560 = shalt.err (!%p557_p8)
}
  0x28   : > { %469 = dma.hbm_to_vmem [thread:$0]  (!%p806_p11), %s1030_s1, 128, %s156_s25, [#allocation6]  }
  0x29   : > { %s561_s29 = scalar_lea.hbm %s1031_s2, 16 }
  0x2a   : > { %p562_p9 = scmp.ne.s32.totalorder %s1031_s2, %s561_s29  ;;  %p568_p1 = scmp.lt.u32.totalorder %s561_s29, %s1031_s2 }
  0x2c   : > { %p564_p12 = pnand %p562_p9, %p822_p13 }
  0x2e   : > { %p565_p2 = pneg %p564_p12 }
  0x30   : > { %p570_p4 = pnand %p568_p1, %p565_p2 }
  0x32   : > { %573 = shalt.err (!%p570_p4)
}
  0x33   : > { %s574_s25 = scalar_lea.vmem %s810_s27, 16  ;;  %s581_s9 = scalar_lea.vmem %s810_s27, 32 }
  0x34   : > { %p575_p6 = scmp.ne.s32.totalorder %s810_s27, %s574_s25  ;;  %p582_p3 = scmp.lt.s32.totalorder %s810_s27, %s810_s27 }
  0x35   : > { %p583_p5 = scmp.lt.s32.totalorder %s581_s9, %s574_s25 }
  0x36   : > { %p577_p8 = pnand %p575_p6, %p822_p13 }
  0x37   : > { %p584_p7 = por %p583_p5, %p582_p3 }
  0x38   : > { %p578_p0 = pneg %p577_p8 }
  0x3a   : > { %p585_p10 = pnand %p584_p7, %p578_p0 }
  0x3c   : > { %588 = shalt.err (!%p585_p10)
}
  0x3d   : > { %472 = dma.hbm_to_vmem [thread:$0]  (!%p806_p11), %s1031_s2, 16, %s810_s27, [#allocation6]  }
  0x3e   : > { %s589_s20 = scalar_lea.hbm %s1032_s3, 16 }
  0x3f   : > { %p590_p9 = scmp.ne.s32.totalorder %s1032_s3, %s589_s20  ;;  %p596_p1 = scmp.lt.u32.totalorder %s589_s20, %s1032_s3 }
  0x41   : > { %p592_p12 = pnand %p590_p9, %p822_p13 }
  0x43   : > { %p593_p2 = pneg %p592_p12 }
  0x45   : > { %p598_p4 = pnand %p596_p1, %p593_p2 }
  0x47   : > { %601 = shalt.err (!%p598_p4)
}
  0x48   : > { %s602_s27 = scalar_lea.vmem %s812_s30, 16  ;;  %s609_s6 = scalar_lea.vmem %s812_s30, 32 }
  0x49   : > { %p603_p6 = scmp.ne.s32.totalorder %s812_s30, %s602_s27  ;;  %p610_p3 = scmp.lt.s32.totalorder %s812_s30, %s812_s30 }
  0x4a   : > { %p611_p5 = scmp.lt.s32.totalorder %s609_s6, %s602_s27 }
  0x4b   : > { %p605_p8 = pnand %p603_p6, %p822_p13 }
  0x4c   : > { %p612_p7 = por %p611_p5, %p610_p3 }
  0x4d   : > { %p606_p0 = pneg %p605_p8 }
  0x4f   : > { %p613_p10 = pnand %p612_p7, %p606_p0 }
  0x51   : > { %616 = shalt.err (!%p613_p10)
}
  0x52   : > { %475 = dma.hbm_to_vmem [thread:$0]  (!%p806_p11), %s1032_s3, 16, %s812_s30, [#allocation9]  }
  0x53   : > { %s887_s10 = sadd.s32 1, %s721_s18   ;;  %s29_s25 = sadd.s32 1, %s717_s17 }
  0x54   : > { %s26_s28 = ssub.s32 %s721_s18, %s887_s10  ;;  %p36_p9 = scmp.ne.s32.totalorder %s717_s17, %s713_s16 }
  0x55   : > { %p27_p13 = scmp.eq.s32.totalorder %s26_s28, 0  ;;  %p37_p12 = scmp.eq.s32.totalorder %s721_s18, 0 }
  0x56   : > { %p487_p2 = scmp.lt.s32.totalorder %s721_s18, 2  ;;  %p1042_p4 = scmp.eq.s32.totalorder %s778_s19, 1 }
  0x57   : > { %s897_s9 = scalar_select %p27_p13, %s717_s17, %s29_s25  }
  0x58   : > { %p38_p1 = por %p37_p12, %p36_p9  ;;  %p901_p6 = por %p1042_p4, %p36_p9 }
  0x59   : > { %s188_s12 = sand.u32 1, %s717_s17   ;;  %s448_s13 = sshll.u32 %s721_s18, 10 }
  0x5a   : > { %s434_s30 = sshll.u32 %s188_s12, 6  ;;  %s910_s24 = scalar_lea.hbm %s1029_s0, %s448_s13 }
  0x5b   : > { %s192_s26 = scalar_lea.vmem [#allocation2], %s434_s30  ;;  %p912_p11 = pnand %p487_p2, %p38_p1 }
  0x5c   : > { %s199_s29 = sshll.u32 %s192_s26, 4  ;;  %s918_s27 = scalar_lea.sflag [#allocation3], %s188_s12  ;;  %s916_s29 = int_to_ptr.vmem [resolvable:$true] %s199_s29 }
  0x5d   : > { %s617_s6 = scalar_lea.hbm %s910_s24, 1024  ;;  %p619_p0 = pneg %p912_p11 }
  0x5e   : > { %p618_p8 = scmp.ne.s32.totalorder %s910_s24, %s617_s6  ;;  %s622_s28 = scalar_lea.hbm %s1029_s0, 2048 }
  0x5f   : > { %p623_p7 = scmp.lt.u32.totalorder %s910_s24, %s1029_s0  ;;  %p624_p10 = scmp.lt.u32.totalorder %s622_s28, %s617_s6 }
  0x60   : > { %p620_p3 = pnand %p619_p0, %p618_p8  ;;  %p626_p9 = scmp.lt.u32.totalorder %s617_s6, %s910_s24 }
  0x61   : > { %p625_p13 = por %p624_p10, %p623_p7 }
  0x62   : > { %p621_p5 = pneg %p620_p3 }
  0x63   : > { %p627_p12 = por %p626_p9, %p625_p13 }
  0x65   : > { %p628_p2 = pnand %p627_p12, %p621_p5 }
  0x67   : > { %631 = shalt.err (!%p628_p2)
}
  0x68   : > { %s632_s12 = scalar_lea.vmem %s916_s29, 1024  ;;  %s726_s30 = smov [#allocation2]  }
  0x69   : > { %p633_p1 = scmp.ne.s32.totalorder %s916_s29, %s632_s12  ;;  %s637_s14 = sshll.u32 %s726_s30, 4  ;;  %s638_s14 = int_to_ptr.vmem [resolvable:$false] %s637_s14 }
  0x6a   : > { %s639_s20 = scalar_lea.vmem %s638_s14, 2048  ;;  %p640_p3 = scmp.lt.s32.totalorder %s916_s29, %s638_s14 }
  0x6b   : > { %p635_p4 = pnand %p633_p1, %p619_p0  ;;  %p641_p7 = scmp.lt.s32.totalorder %s639_s20, %s632_s12 }
  0x6d   : > { %p636_p8 = pneg %p635_p4  ;;  %p642_p10 = por %p641_p7, %p640_p3 }
  0x6f   : > { %p643_p13 = pnand %p642_p10, %p636_p8 }
  0x71   : > { %646 = shalt.err (!%p643_p13)
}
  0x72   : > { %s727_s26 = smov 128   ;;  %s728_s6 = smov 8  }
  0x73   : > { %479 = dma.hbm_to_vmem [thread:$0]  (!%p912_p11), %s910_s24, 1024, %s916_s29, %s918_s27, %s727_s26, %s727_s26, %s728_s6  }
  0x74   : > { %p1045_p0 = scmp.ne.s32.totalorder %s1039_s23, 0 }
  0x75   : > { %s949_s7 = sand.u32 (!%p1045_p0), 1, %s713_s16   ;;  %p1046_p5 = scmp.ne.s32.totalorder (!%p1045_p0), %s1037_s21, 0 }
  0x76   : > { %211 = sbr.rel (%p1045_p0) target bundleno = 183 (0xb7), region = 36  ;;  %s438_s8 = sshll.u32 (!%p1045_p0), %s949_s7, 6 }
  0x77   : > { %s214_s28 = scalar_lea.sflag (!%p1045_p0), [#allocation3], %s949_s7  ;;  %s955_s25 = scalar_lea.vmem (!%p1045_p0), [#allocation2], %s438_s8 }
  0x7d   : > { %692 = dma.done.wait (%p1046_p5), %s214_s28, 1024  }
  0x7e   : > { %694 = vsyncadd (%p1046_p5), %s214_s28, 4294966272  ;;  %p1047_p11 = scmp.eq.s32.totalorder %s778_s19, 0 }
  0x80   : > { %696 = dma.done.wait (%p1047_p11), [#allocation6], 144   ;;  %p1048_p9 = pmov %p1047_p11 }
  0x82   : > { %698 = vsyncadd (%p1048_p9), [#allocation6], 4294967152  ;;  %p1049_p12 = pmov %p1048_p9 }
  0x83   : > { %p1050_p2 = pmov %p1048_p9 }
  0x84   : > { %700 = dma.done.wait (%p1049_p12), [#allocation9], 16  }
  0x85   : > { %702 = vsyncadd (%p1050_p2), [#allocation9], 4294967280  ;;  %v264_v0 = vld [vmem:[#allocation5] sm:$0x1]  ;;  %v266_v1 = vld [vmem:[#allocation5 + $0x1] sm:$0x1]  ;;  %v278_v8 = vlaneseq }
  0x86   : > { %v265_v2 = vmul.f32 0.0078125, %v264_v0  ;;  %v267_v3 = vmul.f32 0.0078125, %v266_v1  ;;  %v273_v10 = vld [vmem:[#allocation7] sm:$0x1]  ;;  %v256_v13 = vld [vmem:[%s955_s25] sm:$0xff]  ;;  %v258_v17 = vld [vmem:[%s955_s25 + $0x10] sm:$0xff] }
  0x87   : > { %v279_v9 = vshrl.u32 %v278_v8, 7  ;;  %v275_v15 = vld [vmem:[#allocation8] sm:$0x1]  ;;  %v259_v18 = vld [vmem:[%s955_s25 + $0x18] sm:$0xff]  ;;  %v260_v21 = vld [vmem:[%s955_s25 + $0x20] sm:$0xff]  ;;  %s253_s21 = scalar_lea.vmem [#allocation10], %s438_s8 }
  0x88   : > { %v268_v4 = vmul.f32 %v265_v2, %v265_v2  ;;  %v257_v16 = vld [vmem:[%s955_s25 + $0x8] sm:$0xff]  ;;  %v262_v23 = vld [vmem:[%s955_s25 + $0x30] sm:$0xff]  ;;  %v263_v24 = vld [vmem:[%s955_s25 + $0x38] sm:$0xff]  ;;  %s326_s23 = sshll.u32 %s253_s21, 4  ;;  %s449_s24 = sshll.u32 %s778_s19, 10  ;;  %s980_s23 = int_to_ptr.vmem [resolvable:$true] %s326_s23 }
  0x89   : > { %v280_v11 = vsub.s32 0, %v279_v9  ;;  %v261_v22 = vld [vmem:[%s955_s25 + $0x28] sm:$0xff]  ;;  %s985_s27 = scalar_lea.hbm %s1033_s4, %s449_s24  ;;  %s313_s19 = scalar_lea.sflag [#allocation4], %s949_s7 }
  0x8a   : > { %v269_v5 = vsub.f32 %v267_v3, %v268_v4  ;;  %s647_s13 = scalar_lea.vmem %s980_s23, 1024  ;;  %s729_s12 = smov [#allocation10]  }
  0x8b   : > { %p648_p1 = scmp.ne.s32.totalorder %s980_s23, %s647_s13  ;;  %s651_s30 = sshll.u32 %s729_s12, 4  ;;  %s652_s30 = int_to_ptr.vmem [resolvable:$false] %s651_s30 }
  0x8c   : > { %v270_v6 = vmax.f32 %v269_v5, 0.0  ;;  %s653_s14 = scalar_lea.vmem %s652_s30, 2048  ;;  %p654_p3 = scmp.lt.s32.totalorder %s980_s23, %s652_s30 }
  0x8d   : > { %p649_p4 = pnand %p648_p1, %p901_p6  ;;  %p655_p7 = scmp.lt.s32.totalorder %s653_s14, %s647_s13 }
  0x8e   : > { %v271_v7 = vadd.f32 1e-05, %v270_v6 }
  0x8f   : > { %p650_p8 = pneg %p649_p4  ;;  %p656_p10 = por %p655_p7, %p654_p3 }
  0x90   : > { %531 = vrsqrt.f32 %v271_v7 }
  0x91   : > { %p657_p13 = pnand %p656_p10, %p650_p8 }
  0x9a   : > { %v532_v12 = vpop.eup %531 }
  0x9b   : > { %v274_v14 = vmul.f32 %v532_v12, %v273_v10 }
  0x9d   : > { %v276_v19 = vmul.f32 %v274_v14, %v265_v2  ;;  %v281_v20 = vrot.slane %v274_v14, %v280_v11 }
  0x9f   : > { %v277_v25 = vsub.f32 %v275_v15, %v276_v19  ;;  %v282_v26 = vmul.f32 %v281_v20, %v256_v13  ;;  %v283_v27 = vmul.f32 %v281_v20, %v257_v16  ;;  %v284_v28 = vmul.f32 %v281_v20, %v258_v17 }
  0xa0   : > { %v285_v29 = vmul.f32 %v281_v20, %v259_v18  ;;  %v286_v30 = vmul.f32 %v281_v20, %v260_v21  ;;  %v287_v31 = vmul.f32 %v281_v20, %v261_v22  ;;  %v288_v32 = vmul.f32 %v281_v20, %v262_v23 }
  0xa1   : > { %v294_v33 = vrot.slane %v277_v25, %v280_v11  ;;  %v289_v34 = vmul.f32 %v281_v20, %v263_v24 }
  0xa3   : > { %v296_v35 = vadd.f32 %v294_v33, %v282_v26  ;;  %v297_v36 = vadd.f32 %v294_v33, %v283_v27  ;;  %v298_v37 = vadd.f32 %v294_v33, %v284_v28  ;;  %v299_v38 = vadd.f32 %v294_v33, %v285_v29 }
  0xa4   : > { %v300_v39 = vadd.f32 %v294_v33, %v286_v30  ;;  %v301_v40 = vadd.f32 %v294_v33, %v287_v31  ;;  %v302_v41 = vadd.f32 %v294_v33, %v288_v32  ;;  %v303_v42 = vadd.f32 %v294_v33, %v289_v34 }
  0xa5   : > { %304 = vst [vmem:[%s253_s21] sm:$0xff] %v296_v35  ;;  %305 = vst [vmem:[%s253_s21 + $0x8] sm:$0xff] %v297_v36 }
  0xa6   : > { %306 = vst [vmem:[%s253_s21 + $0x10] sm:$0xff] %v298_v37  ;;  %307 = vst [vmem:[%s253_s21 + $0x18] sm:$0xff] %v299_v38 }
  0xa7   : > { %308 = vst [vmem:[%s253_s21 + $0x20] sm:$0xff] %v300_v39  ;;  %309 = vst [vmem:[%s253_s21 + $0x28] sm:$0xff] %v301_v40 }
  0xa8   : > { %310 = vst [vmem:[%s253_s21 + $0x30] sm:$0xff] %v302_v41  ;;  %311 = vst [vmem:[%s253_s21 + $0x38] sm:$0xff] %v303_v42 }
  0xa9   : > { %660 = shalt.err (!%p657_p13)
}
  0xaa   : > { %s661_s20 = scalar_lea.hbm %s985_s27, 1024  ;;  %s665_s8 = scalar_lea.hbm %s1033_s4, 2048 }
  0xab   : > { %p662_p0 = scmp.ne.s32.totalorder %s985_s27, %s661_s20  ;;  %p666_p9 = scmp.lt.u32.totalorder %s985_s27, %s1033_s4 }
  0xac   : > { %p667_p12 = scmp.lt.u32.totalorder %s665_s8, %s661_s20  ;;  %p669_p1 = scmp.lt.u32.totalorder %s661_s20, %s985_s27 }
  0xad   : > { %p663_p5 = pnand %p662_p0, %p901_p6 }
  0xae   : > { %p668_p2 = por %p667_p12, %p666_p9 }
  0xaf   : > { %p664_p11 = pneg %p663_p5 }
  0xb0   : > { %p670_p4 = por %p669_p1, %p668_p2 }
  0xb2   : > { %p671_p8 = pnand %p670_p4, %p664_p11 }
  0xb4   : > { %674 = shalt.err (!%p671_p8)
}
  0xb5   : > { %s730_s21 = smov 128   ;;  %s731_s24 = smov 8  }
  0xb6   : > { %464 = dma.vmem_to_hbm [thread:$0]  (%p901_p6), %s980_s23, 1024, %s985_s27, %s313_s19, %s730_s21, %s730_s21, %s731_s24  }
  0xb7 PF: > { %s341_s29 = sand.u32 1, %s709_s15   ;;  %p1051_p3 = scmp.ne.s32.totalorder %s1038_s22, 0 }
  0xb8   : > { %p1052_p7 = scmp.ge.s32.totalorder %s721_s18, 2  ;;  %s342_s5 = scalar_lea.sflag [#allocation4], %s341_s29 }
  0xba   : > { %p481_p10 = pnand %p1052_p7, %p1051_p3 }
  0xbc   : > { %704 = dma.done.wait (!%p481_p10), %s342_s5, 1024  }
  0xbd   : > { %706 = vsyncadd (!%p481_p10), %s342_s5, 4294966272  ;;  %p19_p13 = scmp.ge.s32.totalorder %s887_s10, 4   ;;  %s1053_s15 = smov %s713_s16 }
  0xbe   : > { %s1054_s16 = smov %s717_s17  ;;  %s1055_s17 = smov %s897_s9 }
  0xbf   : > { %s1056_s18 = smov %s887_s10  ;;  %21 = sbr.rel (!%p19_p13) target bundleno = 7 (0x7), region = 93 }
  0xc6   :  { %347 = vsyncpa [#allocation3], 1 }
  0xc7   :  { %349 = vsyncpa [#allocation3 + $0x1], 1 }
  0xc8   :  { %350 = vsyncpa [#allocation6], 1 }
  0xc9   :  { %351 = vsyncpa [#allocation9], 1 }
  0xca   :  { %352 = vsyncpa [#allocation4], 1 }
  0xcb   :  { %354 = vsyncpa [#allocation4 + $0x1], 1 }

// kernel: basic_block_forward.11
= control target key start
LH: loop header
LB: loop body
LE: loop exit
PB: predicated region body
PF: predicated region fallthrough
CT: control target
= control target key end

     0   :  { %s1257_s0 = inlined_call_operand.hbm [shape: f32[128,128], index: 0, kind: input, shape index: {}]   ;;  %s1258_s1 = inlined_call_operand.hbm [shape: f32[8,128], index: 1, kind: input, shape index: {}]   ;;  %s1259_s2 = inlined_call_operand.hbm [shape: f32[1,128], index: 2, kind: input, shape index: {}]   ;;  %s1260_s3 = inlined_call_operand.hbm [shape: f32[1,128], index: 3, kind: input, shape index: {}]   ;;  %s1261_s4 = inlined_call_operand.hbm [shape: f32[128,128], index: 4, kind: input, shape index: {}]   ;;  %s1262_s5 = inlined_call_operand.hbm [shape: f32[128,128], index: 5, kind: output, shape index: {}]  }
   0x1   :  { %1280 = sst [smem:[#allocation23_spill]] %s1257_s0 }
   0x2   :  { %1281 = sst [smem:[#allocation24_spill]] %s1258_s1 }
   0x3   :  { %10 = vsyncpa [#allocation3], 0 }
   0x4   :  { %12 = vsyncpa [#allocation3 + $0x1], 0 }
   0x5   :  { %13 = vsyncpa [#allocation6], 0 }
   0x6   :  { %14 = vsyncpa [#allocation9], 0 }
   0x7   :  { %15 = vsyncpa [#allocation4], 0 }
   0x8   :  { %17 = vsyncpa [#allocation4 + $0x1], 0  ;;  %s916_s18 = smov 0   ;;  %s918_s19 = smov 0  }
   0x9   :  { %s920_s20 = smov 0   ;;  %s922_s21 = smov 0  }
   0xa LB: > { %1282 = sst [smem:[#allocation17_spill]] %s862_s18  ;;  %s937_s22 = sadd.s32 4294967295, %s874_s21   ;;  %s874_s21 = sphi %s922_s21, %s1319_s21   ;;  %s870_s20 = sphi %s920_s20, %s1321_s20   ;;  %s866_s19 = sphi %s918_s19, %s1323_s19   ;;  %s862_s18 = sphi %s916_s18, %s1322_s18  }
   0xb   : > { %1283 = sst [smem:[#allocation18_spill]] %s870_s20  ;;  %s537_s23 = sadd.s32 4294967294, %s874_s21  }
   0xc   : > { %p43_p0 = scmp.ne.s32.totalorder %s866_s19, %s862_s18  ;;  %p1263_p1 = scmp.eq.s32.totalorder %s937_s22, 0 }
   0xd   : > { %p162_p3 = scmp.eq.s32.totalorder %s537_s23, 1  ;;  %p538_p5 = scmp.ge.s32.totalorder %s874_s21, 1 }
   0xe   : > { %p946_p4 = por %p1263_p1, %p43_p0  ;;  %p169_p7 = scmp.lt.s32.totalorder %s874_s21, 3 }
   0xf   : > { %p951_p6 = por %p162_p3, %p43_p0  ;;  %s876_s27 = smov [#allocation5]  }
  0x10   : > { %s1284_s24 = scalar_select %p946_p4, 1, 0 }
  0x11   : > { %s1285_s25 = scalar_select %p951_p6, 1, 0 }
  0x12   : > { %p956_p8 = pnand %p538_p5, %p169_p7  ;;  %s182_s28 = sshll.u32 %s876_s27, 4  ;;  %s183_s28 = int_to_ptr.vmem [resolvable:$true] %s182_s28 }
  0x13   : > { %1286 = sst [smem:[#allocation19_spill]] %s1285_s25  ;;  %s964_s29 = sadd.s32 1, %s874_s21  }
  0x14   : > { %s1287_s26 = scalar_select %p956_p8, 1, 0 }
  0x15   : > { %p582_p10 = pneg %p956_p8  ;;  %1288 = sst [smem:[#allocation20_spill]] %s964_s29 }
  0x16   : > { %s27_s6 = ssub.s32 %s874_s21, %s964_s29  ;;  %s30_s8 = sadd.s32 1, %s870_s20 }
  0x17   : > { %p968_p11 = pnand %p582_p10, %p1263_p1  ;;  %p974_p12 = scmp.eq.s32.totalorder %s27_s6, 0 }
  0x18   : > { %s1291_s1 = sld [smem:[#allocation24_spill]] }
  0x19   : > { %s1289_s30 = scalar_select %p968_p11, 1, 0 }
  0x1a   : > { %s1290_s7 = scalar_select %p974_p12, 1, 0 }
  0x1b   : > { %p989_p3 = pneg %p968_p11 }
  0x1e   : > { %s652_s11 = scalar_lea.hbm %s1291_s1, 128 }
  0x1f   : > { %p653_p0 = scmp.ne.s32.totalorder %s1291_s1, %s652_s11  ;;  %p659_p10 = scmp.lt.u32.totalorder %s652_s11, %s1291_s1 }
  0x21   : > { %p655_p5 = pnand %p989_p3, %p653_p0 }
  0x23   : > { %p656_p7 = pneg %p655_p5 }
  0x25   : > { %p661_p9 = pnand %p659_p10, %p656_p7 }
  0x27   : > { %664 = shalt.err (!%p661_p9)
}
  0x28   : > { %s665_s17 = scalar_lea.vmem %s183_s28, 128  ;;  %p673_p6 = scmp.lt.s32.totalorder %s183_s28, %s183_s28 }
  0x29   : > { %p666_p1 = scmp.ne.s32.totalorder %s183_s28, %s665_s17  ;;  %p674_p4 = scmp.lt.s32.totalorder %s665_s17, %s665_s17 }
  0x2b   : > { %p668_p2 = pnand %p666_p1, %p989_p3  ;;  %p675_p8 = por %p674_p4, %p673_p6 }
  0x2d   : > { %p669_p13 = pneg %p668_p2 }
  0x2f   : > { %p676_p12 = pnand %p675_p8, %p669_p13 }
  0x31   : > { %679 = shalt.err (!%p676_p12)
}
  0x32   : > { %585 = dma.hbm_to_vmem [thread:$0]  (!%p968_p11), %s1291_s1, 128, %s183_s28, [#allocation6]  }
  0x33   : > { %p1293_p1 = scmp.ne.s32.totalorder %s1290_s7, 0  ;;  %p38_p2 = scmp.eq.s32.totalorder %s874_s21, 0 }
  0x34   : > { %p1295_p4 = scmp.ne.s32.totalorder %s870_s20, %s866_s19  ;;  %p1296_p6 = scmp.eq.s32.totalorder %s937_s22, 1 }
  0x35   : > { %s1008_s6 = scalar_select %p1293_p1, %s870_s20, %s30_s8  }
  0x36   : > { %p1016_p8 = por %p1296_p6, %p1295_p4  ;;  %p606_p9 = scmp.lt.s32.totalorder %s874_s21, 2 }
  0x37   : > { %1294 = sst [smem:[#allocation21_spill]] %s1008_s6  ;;  %s215_s10 = sand.u32 1, %s874_s21  }
  0x38   : > { %s1297_s9 = scalar_select %p1016_p8, 1, 0 }
  0x39   : > { %p1299_p12 = pmov %p1295_p4  ;;  %s217_s11 = sand.u32 1, %s870_s20  }
  0x3a   : > { %1298 = sst [smem:[#allocation22_spill]] %s1297_s9  ;;  %s1266_s12 = sshll.u32 %s874_s21, 10 }
  0x3b   : > { %p39_p13 = por %p38_p2, %p1299_p12  ;;  %s1027_s13 = sshll.u32 %s217_s11, 6 }
  0x3c   : > { %s1300_s0 = sld [smem:[#allocation23_spill]]  ;;  %s219_s16 = scalar_lea.vmem [#allocation2], %s1027_s13 }
  0x3d   : > { %p1036_p0 = pnand %p606_p9, %p39_p13  ;;  %s226_s17 = sshll.u32 %s219_s16, 4  ;;  %s1041_s17 = int_to_ptr.vmem [resolvable:$true] %s226_s17 }
  0x3e   : > { %s1043_s23 = scalar_lea.sflag [#allocation3], %s215_s10 }
  0x3f   : > { %s1301_s15 = scalar_select %p1036_p0, 1, 0 }
  0x40   : > { %p1277_p7 = pneg %p1036_p0 }
  0x42   : > { %s1034_s8 = scalar_lea.hbm %s1300_s0, %s1266_s12  ;;  %s685_s7 = scalar_lea.hbm %s1300_s0, 2048 }
  0x43   : > { %s680_s27 = scalar_lea.hbm %s1034_s8, 1024  ;;  %p686_p2 = scmp.lt.u32.totalorder %s1034_s8, %s1300_s0 }
  0x44   : > { %p681_p5 = scmp.ne.s32.totalorder %s1034_s8, %s680_s27  ;;  %p687_p4 = scmp.lt.u32.totalorder %s685_s7, %s680_s27 }
  0x45   : > { %p689_p9 = scmp.lt.u32.totalorder %s680_s27, %s1034_s8 }
  0x46   : > { %p683_p10 = pnand %p1277_p7, %p681_p5  ;;  %p688_p6 = por %p687_p4, %p686_p2 }
  0x48   : > { %p684_p1 = pneg %p683_p10  ;;  %p690_p12 = por %p689_p9, %p688_p6 }
  0x4a   : > { %p691_p13 = pnand %p690_p12, %p684_p1 }
  0x4c   : > { %694 = shalt.err (!%p691_p13)
}
  0x4d   : > { %s695_s10 = scalar_lea.vmem %s1041_s17, 1024  ;;  %s877_s16 = smov [#allocation2]  }
  0x4e   : > { %p696_p5 = scmp.ne.s32.totalorder %s1041_s17, %s695_s10  ;;  %s700_s11 = sshll.u32 %s877_s16, 4  ;;  %s701_s11 = int_to_ptr.vmem [resolvable:$false] %s700_s11 }
  0x4f   : > { %s702_s1 = scalar_lea.vmem %s701_s11, 2048  ;;  %p703_p11 = scmp.lt.s32.totalorder %s1041_s17, %s701_s11 }
  0x50   : > { %p698_p10 = pnand %p696_p5, %p1277_p7  ;;  %p704_p2 = scmp.lt.s32.totalorder %s702_s1, %s695_s10 }
  0x52   : > { %p699_p8 = pneg %p698_p10  ;;  %p705_p4 = por %p704_p2, %p703_p11 }
  0x54   : > { %p706_p6 = pnand %p705_p4, %p699_p8 }
  0x56   : > { %709 = shalt.err (!%p706_p6)
}
  0x57   : > { %s878_s12 = smov 128   ;;  %s879_s27 = smov 8  }
  0x58   : > { %595 = dma.hbm_to_vmem [thread:$0]  (!%p1036_p0), %s1034_s8, 1024, %s1041_s17, %s1043_s23, %s878_s12, %s878_s12, %s879_s27  }
  0x59   : > { %s1302_s28 = sshll.u32 %s874_s21, 10  ;;  %s240_s11 = scalar_lea.vmem [#allocation10], %s1027_s13 }
  0x5a   : > { %s1079_s16 = scalar_lea.hbm %s1261_s4, %s1302_s28  ;;  %s247_s1 = sshll.u32 %s240_s11, 4  ;;  %s1082_s1 = int_to_ptr.vmem [resolvable:$true] %s247_s1 }
  0x5b   : > { %s880_s0 = smov [#allocation7]   ;;  %s881_s20 = smov [#allocation8]  }
  0x5c   : > { %s193_s6 = sshll.u32 %s880_s0, 4  ;;  %s204_s29 = sshll.u32 %s881_s20, 4  ;;  %s194_s6 = int_to_ptr.vmem [resolvable:$true] %s193_s6  ;;  %s205_s29 = int_to_ptr.vmem [resolvable:$true] %s204_s29 }
  0x5d   : > { %s710_s9 = scalar_lea.hbm %s1259_s2, 16 }
  0x5e   : > { %p711_p11 = scmp.ne.s32.totalorder %s1259_s2, %s710_s9  ;;  %p717_p9 = scmp.lt.u32.totalorder %s710_s9, %s1259_s2 }
  0x60   : > { %p713_p8 = pnand %p711_p11, %p989_p3 }
  0x62   : > { %p714_p1 = pneg %p713_p8 }
  0x64   : > { %p719_p12 = pnand %p717_p9, %p714_p1 }
  0x66   : > { %722 = shalt.err (!%p719_p12)
}
  0x67   : > { %s723_s0 = scalar_lea.vmem %s194_s6, 16  ;;  %s730_s18 = scalar_lea.vmem %s194_s6, 32 }
  0x68   : > { %p724_p13 = scmp.ne.s32.totalorder %s194_s6, %s723_s0  ;;  %p731_p2 = scmp.lt.s32.totalorder %s194_s6, %s194_s6 }
  0x69   : > { %p732_p4 = scmp.lt.s32.totalorder %s730_s18, %s723_s0 }
  0x6a   : > { %p726_p5 = pnand %p724_p13, %p989_p3 }
  0x6b   : > { %p733_p6 = por %p732_p4, %p731_p2 }
  0x6c   : > { %p727_p10 = pneg %p726_p5 }
  0x6e   : > { %p734_p7 = pnand %p733_p6, %p727_p10 }
  0x70   : > { %737 = shalt.err (!%p734_p7)
}
  0x71   : > { %p1303_p11 = scmp.ne.s32.totalorder %s1289_s30, 0  ;;  %s738_s10 = scalar_lea.hbm %s1260_s3, 16 }
  0x72   : > { %p739_p8 = scmp.ne.s32.totalorder %s1260_s3, %s738_s10  ;;  %p745_p7 = scmp.lt.u32.totalorder %s738_s10, %s1260_s3 }
  0x73   : > { %588 = dma.hbm_to_vmem [thread:$0]  (!%p1303_p11), %s1259_s2, 16, %s194_s6, [#allocation6]  }
  0x74   : > { %p741_p1 = pnand %p739_p8, %p989_p3 }
  0x76   : > { %p742_p9 = pneg %p741_p1 }
  0x78   : > { %p747_p12 = pnand %p745_p7, %p742_p9 }
  0x7a   : > { %750 = shalt.err (!%p747_p12)
}
  0x7b   : > { %s751_s28 = scalar_lea.vmem %s205_s29, 16  ;;  %s758_s6 = scalar_lea.vmem %s205_s29, 32 }
  0x7c   : > { %p752_p13 = scmp.ne.s32.totalorder %s205_s29, %s751_s28  ;;  %p759_p2 = scmp.lt.s32.totalorder %s205_s29, %s205_s29 }
  0x7d   : > { %p760_p4 = scmp.lt.s32.totalorder %s758_s6, %s751_s28 }
  0x7e   : > { %p754_p5 = pnand %p752_p13, %p989_p3 }
  0x7f   : > { %p761_p6 = por %p760_p4, %p759_p2 }
  0x80   : > { %p755_p10 = pneg %p754_p5 }
  0x82   : > { %p762_p0 = pnand %p761_p6, %p755_p10 }
  0x84   : > { %765 = shalt.err (!%p762_p0)
}
  0x85   : > { %591 = dma.hbm_to_vmem [thread:$0]  (!%p1303_p11), %s1260_s3, 16, %s205_s29, [#allocation9]  }
  0x86   : > { %s766_s14 = scalar_lea.hbm %s1079_s16, 1024  ;;  %p1304_p8 = scmp.ne.s32.totalorder %s1301_s15, 0 }
  0x87   : > { %p767_p3 = scmp.ne.s32.totalorder %s1079_s16, %s766_s14  ;;  %s771_s9 = scalar_lea.hbm %s1261_s4, 2048 }
  0x88   : > { %p1305_p1 = pneg %p1304_p8  ;;  %p772_p0 = scmp.lt.u32.totalorder %s1079_s16, %s1261_s4 }
  0x89   : > { %p773_p12 = scmp.lt.u32.totalorder %s771_s9, %s766_s14  ;;  %p775_p5 = scmp.lt.u32.totalorder %s766_s14, %s1079_s16 }
  0x8a   : > { %p769_p9 = pnand %p767_p3, %p1305_p1 }
  0x8b   : > { %p774_p13 = por %p773_p12, %p772_p0 }
  0x8c   : > { %p770_p7 = pneg %p769_p9 }
  0x8d   : > { %p776_p10 = por %p775_p5, %p774_p13 }
  0x8f   : > { %p777_p2 = pnand %p776_p10, %p770_p7 }
  0x91   : > { %780 = shalt.err (!%p777_p2)
}
  0x92   : > { %s781_s29 = scalar_lea.vmem %s1082_s1, 1024  ;;  %p1306_p4 = pmov %p1305_p1 }
  0x93   : > { %p782_p11 = scmp.ne.s32.totalorder %s1082_s1, %s781_s29  ;;  %s882_s10 = smov [#allocation10]  }
  0x94   : > { %s786_s11 = sshll.u32 %s882_s10, 4  ;;  %s787_s11 = int_to_ptr.vmem [resolvable:$false] %s786_s11 }
  0x95   : > { %p784_p6 = pnand %p782_p11, %p1306_p4  ;;  %s788_s8 = scalar_lea.vmem %s787_s11, 2048 }
  0x96   : > { %p789_p1 = scmp.lt.s32.totalorder %s1082_s1, %s787_s11  ;;  %p790_p9 = scmp.lt.s32.totalorder %s788_s8, %s781_s29 }
  0x97   : > { %p785_p3 = pneg %p784_p6 }
  0x98   : > { %p791_p0 = por %p790_p9, %p789_p1 }
  0x9a   : > { %p792_p12 = pnand %p791_p0, %p785_p3 }
  0x9c   : > { %795 = shalt.err (!%p792_p12)
}
  0x9d   : > { %598 = dma.hbm_to_vmem [thread:$0]  (!%p1304_p8), %s1079_s16, 1024, %s1082_s1, %s1043_s23, %s878_s12, %s878_s12, %s879_s27  }
  0x9e   : > { %p1307_p7 = scmp.ne.s32.totalorder %s1287_s26, 0 }
  0x9f   : > { %s261_s17 = sand.u32 (!%p1307_p7), 1, %s937_s22   ;;  %s263_s13 = sand.u32 (!%p1307_p7), 1, %s866_s19  }
  0xa0   : > { %259 = sbr.rel (%p1307_p7) target bundleno = 231 (0xe7), region = 40  ;;  %s1153_s28 = sshll.u32 (!%p1307_p7), %s263_s13, 6 }
  0xa1   : > { %s262_s15 = scalar_lea.sflag (!%p1307_p7), [#allocation3], %s261_s17  ;;  %s1156_s6 = scalar_lea.vmem (!%p1307_p7), [#allocation2], %s1153_s28 }
  0xa2   : > { %p1308_p13 = scmp.ne.s32.totalorder (!%p1307_p7), %s1284_s24, 0 }
  0xa7   : > { %841 = dma.done.wait (%p1308_p13), %s262_s15, 1024  }
  0xa8   : > { %843 = vsyncadd (%p1308_p13), %s262_s15, 4294966272  ;;  %p1309_p8 = scmp.eq.s32.totalorder %s937_s22, 0 }
  0xaa   : > { %845 = dma.done.wait (%p1309_p8), [#allocation6], 144   ;;  %p1310_p5 = pmov %p1309_p8 }
  0xac   : > { %847 = vsyncadd (%p1310_p5), [#allocation6], 4294967152  ;;  %p1311_p10 = pmov %p1310_p5 }
  0xad   : > { %p1312_p2 = pmov %p1310_p5 }
  0xae   : > { %849 = dma.done.wait (%p1311_p10), [#allocation9], 16  }
  0xaf   : > { %851 = vsyncadd (%p1312_p2), [#allocation9], 4294967280  ;;  %s1171_s26 = scalar_lea.vmem [#allocation10], %s1153_s28 }
  0xb0   : > { %853 = dma.done.wait (%p1308_p13), %s262_s15, 1024  }
  0xb1   : > { %855 = vsyncadd (%p1308_p13), %s262_s15, 4294966272  ;;  %v329_v0 = vld [vmem:[#allocation5] sm:$0x1]  ;;  %v331_v1 = vld [vmem:[#allocation5 + $0x1] sm:$0x1]  ;;  %v343_v8 = vlaneseq  ;;  %s1194_s24 = scalar_lea.vmem [#allocation11], %s1153_s28 }
  0xb2   : > { %v330_v2 = vmul.f32 0.0078125, %v329_v0  ;;  %v332_v3 = vmul.f32 0.0078125, %v331_v1  ;;  %v338_v10 = vld [vmem:[#allocation7] sm:$0x1]  ;;  %v321_v13 = vld [vmem:[%s1156_s6] sm:$0xff]  ;;  %v323_v17 = vld [vmem:[%s1156_s6 + $0x10] sm:$0xff] }
  0xb3   : > { %v344_v9 = vshrl.u32 %v343_v8, 7  ;;  %v340_v15 = vld [vmem:[#allocation8] sm:$0x1]  ;;  %v324_v18 = vld [vmem:[%s1156_s6 + $0x18] sm:$0xff]  ;;  %v325_v21 = vld [vmem:[%s1156_s6 + $0x20] sm:$0xff]  ;;  %s415_s23 = sshll.u32 %s1194_s24, 4  ;;  %s1198_s23 = int_to_ptr.vmem [resolvable:$true] %s415_s23 }
  0xb4   : > { %v333_v4 = vmul.f32 %v330_v2, %v330_v2  ;;  %v322_v16 = vld [vmem:[%s1156_s6 + $0x8] sm:$0xff]  ;;  %v327_v23 = vld [vmem:[%s1156_s6 + $0x30] sm:$0xff]  ;;  %v328_v24 = vld [vmem:[%s1156_s6 + $0x38] sm:$0xff]  ;;  %s563_s12 = sshll.u32 %s937_s22, 10  ;;  %s1313_s1 = sld [smem:[#allocation22_spill]] }
  0xb5   : > { %v345_v11 = vsub.s32 0, %v344_v9  ;;  %v326_v22 = vld [vmem:[%s1156_s6 + $0x28] sm:$0xff]  ;;  %v370_v35 = vld [vmem:[%s1171_s26 + $0x8] sm:$0xff]  ;;  %v371_v37 = vld [vmem:[%s1171_s26 + $0x10] sm:$0xff]  ;;  %s1203_s16 = scalar_lea.hbm %s1262_s5, %s563_s12  ;;  %s1215_s0 = scalar_lea.sflag [#allocation4], %s263_s13 }
  0xb6   : > { %v334_v5 = vsub.f32 %v332_v3, %v333_v4  ;;  %v369_v34 = vld [vmem:[%s1171_s26] sm:$0xff]  ;;  %v372_v38 = vld [vmem:[%s1171_s26 + $0x18] sm:$0xff]  ;;  %v374_v44 = vld [vmem:[%s1171_s26 + $0x28] sm:$0xff]  ;;  %s796_s18 = scalar_lea.vmem %s1198_s23, 1024  ;;  %s883_s14 = smov [#allocation11]  }
  0xb7   : > { %v373_v39 = vld [vmem:[%s1171_s26 + $0x20] sm:$0xff]  ;;  %v375_v45 = vld [vmem:[%s1171_s26 + $0x30] sm:$0xff]  ;;  %v376_v46 = vld [vmem:[%s1171_s26 + $0x38] sm:$0xff]  ;;  %p797_p11 = scmp.ne.s32.totalorder %s1198_s23, %s796_s18  ;;  %s800_s20 = sshll.u32 %s883_s14, 4  ;;  %s801_s20 = int_to_ptr.vmem [resolvable:$false] %s800_s20 }
  0xb8   : > { %v335_v6 = vmax.f32 %v334_v5, 0.0  ;;  %s802_s25 = scalar_lea.vmem %s801_s20, 2048  ;;  %p803_p1 = scmp.lt.s32.totalorder %s1198_s23, %s801_s20 }
  0xb9   : > { %p804_p9 = scmp.lt.s32.totalorder %s802_s25, %s796_s18 }
  0xba   : > { %v336_v7 = vadd.f32 1e-05, %v335_v6  ;;  %p1314_p4 = scmp.ne.s32.totalorder %s1313_s1, 0 }
  0xbb   : > { %p805_p0 = por %p804_p9, %p803_p1 }
  0xbc   : > { %650 = vrsqrt.f32 %v336_v7  ;;  %p798_p6 = pnand %p797_p11, %p1314_p4 }
  0xbe   : > { %p799_p3 = pneg %p798_p6 }
  0xc0   : > { %p806_p12 = pnand %p805_p0, %p799_p3 }
  0xc6   : > { %v651_v12 = vpop.eup %650 }
  0xc7   : > { %v339_v14 = vmul.f32 %v651_v12, %v338_v10 }
  0xc9   : > { %v341_v19 = vmul.f32 %v339_v14, %v330_v2  ;;  %v346_v20 = vrot.slane %v339_v14, %v345_v11 }
  0xcb   : > { %v342_v25 = vsub.f32 %v340_v15, %v341_v19  ;;  %v347_v26 = vmul.f32 %v346_v20, %v321_v13  ;;  %v348_v27 = vmul.f32 %v346_v20, %v322_v16  ;;  %v349_v28 = vmul.f32 %v346_v20, %v323_v17 }
  0xcc   : > { %v350_v29 = vmul.f32 %v346_v20, %v324_v18  ;;  %v351_v30 = vmul.f32 %v346_v20, %v325_v21  ;;  %v352_v31 = vmul.f32 %v346_v20, %v326_v22  ;;  %v353_v32 = vmul.f32 %v346_v20, %v327_v23 }
  0xcd   : > { %v359_v33 = vrot.slane %v342_v25, %v345_v11  ;;  %v354_v36 = vmul.f32 %v346_v20, %v328_v24 }
  0xcf   : > { %v361_v40 = vadd.f32 %v359_v33, %v347_v26  ;;  %v362_v41 = vadd.f32 %v359_v33, %v348_v27  ;;  %v363_v42 = vadd.f32 %v359_v33, %v349_v28  ;;  %v364_v43 = vadd.f32 %v359_v33, %v350_v29 }
  0xd0   : > { %v365_v47 = vadd.f32 %v359_v33, %v351_v30  ;;  %v366_v48 = vadd.f32 %v359_v33, %v352_v31  ;;  %v367_v49 = vadd.f32 %v359_v33, %v353_v32  ;;  %v368_v50 = vadd.f32 %v359_v33, %v354_v36 }
  0xd1   : > { %v377_v51 = vadd.f32 %v369_v34, %v361_v40  ;;  %v378_v52 = vadd.f32 %v370_v35, %v362_v41  ;;  %v379_v53 = vadd.f32 %v371_v37, %v363_v42  ;;  %v380_v54 = vadd.f32 %v372_v38, %v364_v43 }
  0xd2   : > { %v381_v55 = vadd.f32 %v373_v39, %v365_v47  ;;  %v382_v56 = vadd.f32 %v374_v44, %v366_v48  ;;  %v383_v57 = vadd.f32 %v375_v45, %v367_v49  ;;  %v384_v58 = vadd.f32 %v376_v46, %v368_v50 }
  0xd3   : > { %v385_v59 = vmax.f32 %v377_v51, 0.0  ;;  %v386_v60 = vmax.f32 %v378_v52, 0.0  ;;  %v387_v61 = vmax.f32 %v379_v53, 0.0  ;;  %v388_v62 = vmax.f32 %v380_v54, 0.0 }
  0xd4   : > { %v389_v63 = vmax.f32 %v381_v55, 0.0  ;;  %v390_v0 = vmax.f32 %v382_v56, 0.0  ;;  %v391_v1 = vmax.f32 %v383_v57, 0.0  ;;  %v392_v2 = vmax.f32 %v384_v58, 0.0 }
  0xd5   : > { %393 = vst [vmem:[%s1194_s24] sm:$0xff] %v385_v59  ;;  %394 = vst [vmem:[%s1194_s24 + $0x8] sm:$0xff] %v386_v60 }
  0xd6   : > { %395 = vst [vmem:[%s1194_s24 + $0x10] sm:$0xff] %v387_v61  ;;  %396 = vst [vmem:[%s1194_s24 + $0x18] sm:$0xff] %v388_v62 }
  0xd7   : > { %397 = vst [vmem:[%s1194_s24 + $0x20] sm:$0xff] %v389_v63  ;;  %398 = vst [vmem:[%s1194_s24 + $0x28] sm:$0xff] %v390_v0 }
  0xd8   : > { %399 = vst [vmem:[%s1194_s24 + $0x30] sm:$0xff] %v391_v1  ;;  %400 = vst [vmem:[%s1194_s24 + $0x38] sm:$0xff] %v392_v2 }
  0xd9   : > { %809 = shalt.err (!%p806_p12)
}
  0xda   : > { %s810_s9 = scalar_lea.hbm %s1203_s16, 1024  ;;  %s814_s29 = scalar_lea.hbm %s1262_s5, 2048 }
  0xdb   : > { %p811_p7 = scmp.ne.s32.totalorder %s1203_s16, %s810_s9  ;;  %p815_p5 = scmp.lt.u32.totalorder %s1203_s16, %s1262_s5 }
  0xdc   : > { %p816_p10 = scmp.lt.u32.totalorder %s814_s29, %s810_s9  ;;  %p818_p11 = scmp.lt.u32.totalorder %s810_s9, %s1203_s16 }
  0xdd   : > { %p812_p13 = pnand %p811_p7, %p1314_p4 }
  0xde   : > { %p817_p2 = por %p816_p10, %p815_p5 }
  0xdf   : > { %p813_p8 = pneg %p812_p13 }
  0xe0   : > { %p819_p6 = por %p818_p11, %p817_p2 }
  0xe2   : > { %p820_p3 = pnand %p819_p6, %p813_p8 }
  0xe4   : > { %823 = shalt.err (!%p820_p3)
}
  0xe5   : > { %s884_s8 = smov 128   ;;  %s885_s17 = smov 8  }
  0xe6   : > { %580 = dma.vmem_to_hbm [thread:$0]  (%p1314_p4), %s1198_s23, 1024, %s1203_s16, %s1215_s0, %s884_s8, %s884_s8, %s885_s17  }
  0xe7 PF: > { %s1315_s13 = sld [smem:[#allocation17_spill]]  ;;  %s1316_s28 = sld [smem:[#allocation19_spill]] }
  0xe8   : > { %p1318_p9 = scmp.ge.s32.totalorder %s874_s21, 2 }
  0xed   : > { %s430_s15 = sand.u32 1, %s1315_s13   ;;  %p1317_p1 = scmp.ne.s32.totalorder %s1316_s28, 0 }
  0xee   : > { %s431_s6 = scalar_lea.sflag [#allocation4], %s430_s15 }
  0xef   : > { %p600_p0 = pnand %p1318_p9, %p1317_p1 }
  0xf1   : > { %857 = dma.done.wait (!%p600_p0), %s431_s6, 1024  }
  0xf2   : > { %859 = vsyncadd (!%p600_p0), %s431_s6, 4294966272  ;;  %s1319_s21 = sld [smem:[#allocation20_spill]]  ;;  %s1320_s26 = sld [smem:[#allocation18_spill]] }
  0xf3   : > { %s1321_s20 = sld [smem:[#allocation21_spill]]  ;;  %s1322_s18 = smov %s866_s19 }
  0xf8   : > { %p20_p12 = scmp.ge.s32.totalorder %s1319_s21, 4   ;;  %s1323_s19 = smov %s1320_s26 }
  0xfa   :  { %22 = sbr.rel (!%p20_p12) target bundleno = 10 (0xa), region = 108 }
 0x101   :  { %436 = vsyncpa [#allocation3], 1 }
 0x102   :  { %438 = vsyncpa [#allocation3 + $0x1], 1 }
 0x103   :  { %439 = vsyncpa [#allocation6], 1 }
 0x104   :  { %440 = vsyncpa [#allocation9], 1 }
 0x105   :  { %441 = vsyncpa [#allocation4], 1 }
 0x106   :  { %443 = vsyncpa [#allocation4 + $0x1], 1 }

</bundles_post_ra>
